<compile_context>
chip_gen: v6e
topology: v6e:2x2x1
jax: 0.10.0
libtpu: 0.0.40
codegen_flags: <defaults>
</compile_context>

<pallas_src>
import jax
import jax.numpy as jnp
import numpy as np
from jax.experimental import pallas as pl
from jax.experimental.pallas import tpu as pltpu

EPS = 1e-5  # nn.BatchNorm2d default eps


def _vmem_limit_bytes():
    # Scale the scoped VMEM budget with the device: v5e/v6e (128 MiB physical)
    # -> 64 MiB, v7x (64 MiB physical) -> 32 MiB.  Guarded fallback: 32 MiB.
    try:
        return int(pltpu.get_tpu_info().vmem_capacity_bytes) // 2
    except Exception:
        return 32 * 1024 * 1024


def _smem_spec():
    # Whole-array scalar table resident in SMEM (per-channel weights / biases).
    return pl.BlockSpec(memory_space=pltpu.MemorySpace.SMEM)


def _dsconv_planes(x_ref, wdw_ref, bdw_ref, wpw_ref, bpw_ref):
    """Fused depthwise (KxK, groups=Cin, stride 1, VALID) + pointwise (1x1)
    conv for ONE batch element, computed as per-channel (H, W) planes with W
    on the lane axis.  Returns Cout f32 planes of shape (Ho, Wo)."""
    _, Cin, H, W = x_ref.shape
    Cout = wpw_ref.shape[0]
    KK = wdw_ref.shape[1]
    K = int(round(KK ** 0.5))
    Ho, Wo = H - K + 1, W - K + 1

    # Depthwise conv: one (H, W) plane load per channel; static tap-offset
    # slices become lane/sublane shifts; weights are SMEM scalars (f32 on the
    # VPU path -- required on v5e which has no bf16 VPU).
    dw = []
    for c in range(Cin):
        plane = x_ref[0, c]                                   # (H, W)
        acc = jnp.zeros((Ho, Wo), jnp.float32)
        for kh in range(K):
            for kw in range(K):
                acc = acc + (plane[kh:kh + Ho, kw:kw + Wo]
                             * wdw_ref[c, kh * K + kw])
        dw.append(acc + bdw_ref[c])

    # Pointwise 1x1 conv: at Cin=4/Cout=8 a handful of VPU FMAs beats an MXU
    # push/pop at <1% array utilization.
    # TODO(synk): for production channel counts (>= ~32) pad Cin/Cout to the
    # MXU tile (128 on v5e, 256-friendly on v6e/v7x), cast operands to bf16
    # and use jnp.dot(..., preferred_element_type=jnp.float32) instead.
    out = []
    for co in range(Cout):
        y = dw[0] * wpw_ref[co, 0]
        for c in range(1, Cin):
            y = y + dw[c] * wpw_ref[co, c]
        out.append(y + bpw_ref[co])
    return out


def stats_kernel(x_ref, wdw_ref, bdw_ref, wpw_ref, bpw_ref, s_ref, m2_ref):
    """Per-batch partial BN stats: per-channel row-sums and *centered*
    row-sums-of-squares (avoids the E[y^2]-E[y]^2 cancellation)."""
    planes = _dsconv_planes(x_ref, wdw_ref, bdw_ref, wpw_ref, bpw_ref)
    Ho, Wo = planes[0].shape
    inv_p = 1.0 / float(Ho * Wo)
    for co, y in enumerate(planes):
        srow = jnp.sum(y, axis=0, keepdims=True)              # (1, Wo)
        mu = jnp.sum(srow, axis=1, keepdims=True) * inv_p     # (1, 1)
        d = y - mu
        s_ref[0, co:co + 1, :] = srow
        m2_ref[0, co:co + 1, :] = jnp.sum(d * d, axis=0, keepdims=True)


def conv_bn_relu_kernel(x_ref, wdw_ref, bdw_ref, wpw_ref, bpw_ref,
                        scale_ref, shift_ref, o_ref):
    """Recompute the fused conv and apply the folded BN affine + ReLU straight
    into the NCHW output block (the conv intermediate never touches HBM)."""
    planes = _dsconv_planes(x_ref, wdw_ref, bdw_ref, wpw_ref, bpw_ref)
    for co, y in enumerate(planes):
        o_ref[0, co] = jnp.maximum(y * scale_ref[co] + shift_ref[co], 0.0)


@jax.jit
def dsconv2d(x, w_dw, b_dw, w_pw, b_pw, gamma, beta):
    """x: (N, Cin, H, W) NCHW; w_dw: (Cin, 1, K, K); w_pw: (Cout, Cin, 1, 1)."""
    N, Cin, H, W = x.shape
    Cout = w_pw.shape[0]
    K = w_dw.shape[-1]
    Ho, Wo = H - K + 1, W - K + 1

    # Tiny per-channel parameter repacks (scalar tables for SMEM).
    wdw = w_dw.reshape(Cin, K * K)
    wpw = w_pw.reshape(Cout, Cin)

    vmem_limit = _vmem_limit_bytes()
    # TODO(synk): for production image sizes add a halo'd H-row-slab grid axis
    # (also "parallel", so v7x's 2 TensorCores stay busy at small/odd N) and
    # keep per-step double-buffered footprint ~8-12 MiB on v7x's 64 MiB VMEM.
    x_spec = pl.BlockSpec((1, Cin, H, W), lambda n: (n, 0, 0, 0))
    cparams = pltpu.CompilerParams(dimension_semantics=("parallel",),
                                   vmem_limit_bytes=vmem_limit)

    # ---- Pass 1: per-batch partial BN statistics (no conv output to HBM). ----
    s_part, m2_part = pl.pallas_call(
        stats_kernel,
        out_shape=(jax.ShapeDtypeStruct((N, Cout, Wo), jnp.float32),
                   jax.ShapeDtypeStruct((N, Cout, Wo), jnp.float32)),
        grid=(N,),
        in_specs=[x_spec, _smem_spec(), _smem_spec(), _smem_spec(), _smem_spec()],
        out_specs=(pl.BlockSpec((1, Cout, Wo), lambda n: (n, 0, 0)),
                   pl.BlockSpec((1, Cout, Wo), lambda n: (n, 0, 0))),
        compiler_params=cparams,
    )(x, wdw, b_dw, wpw, b_pw)

    # ---- Global BN stats: numerically-stable chunk merge + folded affine. ----
    p = float(Ho * Wo)
    cnt = float(N) * p
    s_nc = jnp.sum(s_part, axis=-1)                       # (N, Cout) sums
    m2_nc = jnp.sum(m2_part, axis=-1)                     # (N, Cout) centered SSQ
    mu_nc = s_nc / p                                      # per-batch means
    mean = jnp.sum(s_nc, axis=0) / cnt                    # (Cout,)
    var = (jnp.sum(m2_nc, axis=0)
           + p * jnp.sum((mu_nc - mean[None, :]) ** 2, axis=0)) / cnt
    var = jnp.maximum(var, 0.0)                           # biased variance
    scale = gamma * jax.lax.rsqrt(var + EPS)
    shift = beta - mean * scale

    # ---- Pass 2: recompute conv, fused BN affine + ReLU, NCHW output. ----
    out = pl.pallas_call(
        conv_bn_relu_kernel,
        out_shape=jax.ShapeDtypeStruct((N, Cout, Ho, Wo), jnp.float32),
        grid=(N,),
        in_specs=[x_spec] + [_smem_spec() for _ in range(6)],
        out_specs=pl.BlockSpec((1, Cout, Ho, Wo), lambda n: (n, 0, 0, 0)),
        compiler_params=cparams,
    )(x, wdw, b_dw, wpw, b_pw, scale, shift)
    return out


def reference(x_nchw, w_dw, b_dw, w_pw, b_pw, gamma, beta):
    dn = ("NCHW", "OIHW", "NCHW")
    y = jax.lax.conv_general_dilated(
        x_nchw, w_dw, (1, 1), "VALID", dimension_numbers=dn,
        feature_group_count=x_nchw.shape[1])
    y = y + b_dw[None, :, None, None]
    y = jax.lax.conv_general_dilated(
        y, w_pw, (1, 1), "VALID", dimension_numbers=dn)
    y = y + b_pw[None, :, None, None]
    mean = jnp.mean(y, axis=(0, 2, 3), keepdims=True)
    var = jnp.mean((y - mean) ** 2, axis=(0, 2, 3), keepdims=True)
    y = (y - mean) * jax.lax.rsqrt(var + EPS)
    y = y * gamma[None, :, None, None] + beta[None, :, None, None]
    return jnp.maximum(y, 0.0)


if __name__ == "__main__":
    N, Cin, Cout, H, W, K = 2, 4, 8, 16, 16, 3

    key = jax.random.PRNGKey(0)
    k_x, k_wdw, k_bdw, k_wpw, k_bpw = jax.random.split(key, 5)

    x = jax.random.normal(k_x, (N, Cin, H, W), jnp.float32)
    # Deterministic synthetic params matching nn.Conv2d / nn.BatchNorm2d shapes.
    w_dw = jax.random.normal(k_wdw, (Cin, 1, K, K), jnp.float32) * 0.2
    b_dw = jax.random.normal(k_bdw, (Cin,), jnp.float32) * 0.1
    w_pw = jax.random.normal(k_wpw, (Cout, Cin, 1, 1), jnp.float32) * 0.2
    b_pw = jax.random.normal(k_bpw, (Cout,), jnp.float32) * 0.1
    gamma = jnp.ones((Cout,), jnp.float32)   # BatchNorm2d init: weight = 1
    beta = jnp.zeros((Cout,), jnp.float32)   # BatchNorm2d init: bias = 0

    out = dsconv2d(x, w_dw, b_dw, w_pw, b_pw, gamma, beta)
    out = jax.block_until_ready(out)

    ref = reference(x, w_dw, b_dw, w_pw, b_pw, gamma, beta)
    assert out.shape == (N, Cout, H - K + 1, W - K + 1)
    assert np.allclose(np.asarray(out), np.asarray(ref), rtol=1e-3, atol=1e-3)

    print("KERNEL_OK")
</pallas_src>

<mosaic_0001>
module attributes {stable_mosaic.version = 11 : i64} {
  func.func @conv_bn_relu_kernel(%arg0: i32, %arg1: memref<1x4x16x16xf32, #tpu.memory_space<vmem>>, %arg2: memref<4x9xf32, #tpu.memory_space<smem>>, %arg3: memref<4xf32, #tpu.memory_space<smem>>, %arg4: memref<8x4xf32, #tpu.memory_space<smem>>, %arg5: memref<8xf32, #tpu.memory_space<smem>>, %arg6: memref<8xf32, #tpu.memory_space<smem>>, %arg7: memref<8xf32, #tpu.memory_space<smem>>, %arg8: memref<1x8x14x14xf32, #tpu.memory_space<vmem>>) attributes {dimension_semantics = [#tpu.dimension_semantics<parallel>], iteration_bounds = array<i64: 2>, scalar_prefetch = 0 : i64, scratch_operands = 0 : i64, tpu.core_type = #tpu.core_type<tc>, window_params = [{transform_indices = @transform_0, window_bounds = array<i64: 1, 4, 16, 16>}, {transform_indices = @transform_1, window_bounds = array<i64: 4, 9>}, {transform_indices = @transform_2, window_bounds = array<i64: 4>}, {transform_indices = @transform_3, window_bounds = array<i64: 8, 4>}, {transform_indices = @transform_4, window_bounds = array<i64: 8>}, {transform_indices = @transform_5, window_bounds = array<i64: 8>}, {transform_indices = @transform_6, window_bounds = array<i64: 8>}, {transform_indices = @transform_7, window_bounds = array<i64: 1, 8, 14, 14>}]} {
    %c0 = arith.constant 0 : index
    %c0_0 = arith.constant 0 : index
    %c0_1 = arith.constant 0 : index
    %c0_2 = arith.constant 0 : index
    %0 = vector.load %arg1[%c0, %c0_0, %c0_1, %c0_2] : memref<1x4x16x16xf32, #tpu.memory_space<vmem>>, vector<1x1x16x16xf32>
    %1 = vector.shape_cast %0 : vector<1x1x16x16xf32> to vector<16x16xf32>
    %cst = arith.constant 0.000000e+00 : f32
    %2 = vector.broadcast %cst : f32 to vector<14x14xf32>
    %3 = vector.extract_strided_slice %1 {offsets = [0, 0], sizes = [14, 14], strides = [1, 1]} : vector<16x16xf32> to vector<14x14xf32>
    %c0_3 = arith.constant 0 : index
    %c0_4 = arith.constant 0 : index
    %4 = memref.load %arg2[%c0_3, %c0_4] : memref<4x9xf32, #tpu.memory_space<smem>>
    %5 = vector.broadcast %4 : f32 to vector<14x14xf32>
    %6 = arith.mulf %3, %5 : vector<14x14xf32>
    %7 = arith.addf %2, %6 : vector<14x14xf32>
    %8 = vector.extract_strided_slice %1 {offsets = [0, 1], sizes = [14, 14], strides = [1, 1]} : vector<16x16xf32> to vector<14x14xf32>
    %c0_5 = arith.constant 0 : index
    %c1 = arith.constant 1 : index
    %9 = memref.load %arg2[%c0_5, %c1] : memref<4x9xf32, #tpu.memory_space<smem>>
    %10 = vector.broadcast %9 : f32 to vector<14x14xf32>
    %11 = arith.mulf %8, %10 : vector<14x14xf32>
    %12 = arith.addf %7, %11 : vector<14x14xf32>
    %13 = vector.extract_strided_slice %1 {offsets = [0, 2], sizes = [14, 14], strides = [1, 1]} : vector<16x16xf32> to vector<14x14xf32>
    %c0_6 = arith.constant 0 : index
    %c2 = arith.constant 2 : index
    %14 = memref.load %arg2[%c0_6, %c2] : memref<4x9xf32, #tpu.memory_space<smem>>
    %15 = vector.broadcast %14 : f32 to vector<14x14xf32>
    %16 = arith.mulf %13, %15 : vector<14x14xf32>
    %17 = arith.addf %12, %16 : vector<14x14xf32>
    %18 = vector.extract_strided_slice %1 {offsets = [1, 0], sizes = [14, 14], strides = [1, 1]} : vector<16x16xf32> to vector<14x14xf32>
    %c0_7 = arith.constant 0 : index
    %c3 = arith.constant 3 : index
    %19 = memref.load %arg2[%c0_7, %c3] : memref<4x9xf32, #tpu.memory_space<smem>>
    %20 = vector.broadcast %19 : f32 to vector<14x14xf32>
    %21 = arith.mulf %18, %20 : vector<14x14xf32>
    %22 = arith.addf %17, %21 : vector<14x14xf32>
    %23 = vector.extract_strided_slice %1 {offsets = [1, 1], sizes = [14, 14], strides = [1, 1]} : vector<16x16xf32> to vector<14x14xf32>
    %c0_8 = arith.constant 0 : index
    %c4 = arith.constant 4 : index
    %24 = memref.load %arg2[%c0_8, %c4] : memref<4x9xf32, #tpu.memory_space<smem>>
    %25 = vector.broadcast %24 : f32 to vector<14x14xf32>
    %26 = arith.mulf %23, %25 : vector<14x14xf32>
    %27 = arith.addf %22, %26 : vector<14x14xf32>
    %28 = vector.extract_strided_slice %1 {offsets = [1, 2], sizes = [14, 14], strides = [1, 1]} : vector<16x16xf32> to vector<14x14xf32>
    %c0_9 = arith.constant 0 : index
    %c5 = arith.constant 5 : index
    %29 = memref.load %arg2[%c0_9, %c5] : memref<4x9xf32, #tpu.memory_space<smem>>
    %30 = vector.broadcast %29 : f32 to vector<14x14xf32>
    %31 = arith.mulf %28, %30 : vector<14x14xf32>
    %32 = arith.addf %27, %31 : vector<14x14xf32>
    %33 = vector.extract_strided_slice %1 {offsets = [2, 0], sizes = [14, 14], strides = [1, 1]} : vector<16x16xf32> to vector<14x14xf32>
    %c0_10 = arith.constant 0 : index
    %c6 = arith.constant 6 : index
    %34 = memref.load %arg2[%c0_10, %c6] : memref<4x9xf32, #tpu.memory_space<smem>>
    %35 = vector.broadcast %34 : f32 to vector<14x14xf32>
    %36 = arith.mulf %33, %35 : vector<14x14xf32>
    %37 = arith.addf %32, %36 : vector<14x14xf32>
    %38 = vector.extract_strided_slice %1 {offsets = [2, 1], sizes = [14, 14], strides = [1, 1]} : vector<16x16xf32> to vector<14x14xf32>
    %c0_11 = arith.constant 0 : index
    %c7 = arith.constant 7 : index
    %39 = memref.load %arg2[%c0_11, %c7] : memref<4x9xf32, #tpu.memory_space<smem>>
    %40 = vector.broadcast %39 : f32 to vector<14x14xf32>
    %41 = arith.mulf %38, %40 : vector<14x14xf32>
    %42 = arith.addf %37, %41 : vector<14x14xf32>
    %43 = vector.extract_strided_slice %1 {offsets = [2, 2], sizes = [14, 14], strides = [1, 1]} : vector<16x16xf32> to vector<14x14xf32>
    %c0_12 = arith.constant 0 : index
    %c8 = arith.constant 8 : index
    %44 = memref.load %arg2[%c0_12, %c8] : memref<4x9xf32, #tpu.memory_space<smem>>
    %45 = vector.broadcast %44 : f32 to vector<14x14xf32>
    %46 = arith.mulf %43, %45 : vector<14x14xf32>
    %47 = arith.addf %42, %46 : vector<14x14xf32>
    %c0_13 = arith.constant 0 : index
    %48 = memref.load %arg3[%c0_13] : memref<4xf32, #tpu.memory_space<smem>>
    %49 = vector.broadcast %48 : f32 to vector<14x14xf32>
    %50 = arith.addf %47, %49 : vector<14x14xf32>
    %c0_14 = arith.constant 0 : index
    %c1_15 = arith.constant 1 : index
    %c0_16 = arith.constant 0 : index
    %c0_17 = arith.constant 0 : index
    %51 = vector.load %arg1[%c0_14, %c1_15, %c0_16, %c0_17] : memref<1x4x16x16xf32, #tpu.memory_space<vmem>>, vector<1x1x16x16xf32>
    %52 = vector.shape_cast %51 : vector<1x1x16x16xf32> to vector<16x16xf32>
    %cst_18 = arith.constant 0.000000e+00 : f32
    %53 = vector.broadcast %cst_18 : f32 to vector<14x14xf32>
    %54 = vector.extract_strided_slice %52 {offsets = [0, 0], sizes = [14, 14], strides = [1, 1]} : vector<16x16xf32> to vector<14x14xf32>
    %c1_19 = arith.constant 1 : index
    %c0_20 = arith.constant 0 : index
    %55 = memref.load %arg2[%c1_19, %c0_20] : memref<4x9xf32, #tpu.memory_space<smem>>
    %56 = vector.broadcast %55 : f32 to vector<14x14xf32>
    %57 = arith.mulf %54, %56 : vector<14x14xf32>
    %58 = arith.addf %53, %57 : vector<14x14xf32>
    %59 = vector.extract_strided_slice %52 {offsets = [0, 1], sizes = [14, 14], strides = [1, 1]} : vector<16x16xf32> to vector<14x14xf32>
    %c1_21 = arith.constant 1 : index
    %c1_22 = arith.constant 1 : index
    %60 = memref.load %arg2[%c1_21, %c1_22] : memref<4x9xf32, #tpu.memory_space<smem>>
    %61 = vector.broadcast %60 : f32 to vector<14x14xf32>
    %62 = arith.mulf %59, %61 : vector<14x14xf32>
    %63 = arith.addf %58, %62 : vector<14x14xf32>
    %64 = vector.extract_strided_slice %52 {offsets = [0, 2], sizes = [14, 14], strides = [1, 1]} : vector<16x16xf32> to vector<14x14xf32>
    %c1_23 = arith.constant 1 : index
    %c2_24 = arith.constant 2 : index
    %65 = memref.load %arg2[%c1_23, %c2_24] : memref<4x9xf32, #tpu.memory_space<smem>>
    %66 = vector.broadcast %65 : f32 to vector<14x14xf32>
    %67 = arith.mulf %64, %66 : vector<14x14xf32>
    %68 = arith.addf %63, %67 : vector<14x14xf32>
    %69 = vector.extract_strided_slice %52 {offsets = [1, 0], sizes = [14, 14], strides = [1, 1]} : vector<16x16xf32> to vector<14x14xf32>
    %c1_25 = arith.constant 1 : index
    %c3_26 = arith.constant 3 : index
    %70 = memref.load %arg2[%c1_25, %c3_26] : memref<4x9xf32, #tpu.memory_space<smem>>
    %71 = vector.broadcast %70 : f32 to vector<14x14xf32>
    %72 = arith.mulf %69, %71 : vector<14x14xf32>
    %73 = arith.addf %68, %72 : vector<14x14xf32>
    %74 = vector.extract_strided_slice %52 {offsets = [1, 1], sizes = [14, 14], strides = [1, 1]} : vector<16x16xf32> to vector<14x14xf32>
    %c1_27 = arith.constant 1 : index
    %c4_28 = arith.constant 4 : index
    %75 = memref.load %arg2[%c1_27, %c4_28] : memref<4x9xf32, #tpu.memory_space<smem>>
    %76 = vector.broadcast %75 : f32 to vector<14x14xf32>
    %77 = arith.mulf %74, %76 : vector<14x14xf32>
    %78 = arith.addf %73, %77 : vector<14x14xf32>
    %79 = vector.extract_strided_slice %52 {offsets = [1, 2], sizes = [14, 14], strides = [1, 1]} : vector<16x16xf32> to vector<14x14xf32>
    %c1_29 = arith.constant 1 : index
    %c5_30 = arith.constant 5 : index
    %80 = memref.load %arg2[%c1_29, %c5_30] : memref<4x9xf32, #tpu.memory_space<smem>>
    %81 = vector.broadcast %80 : f32 to vector<14x14xf32>
    %82 = arith.mulf %79, %81 : vector<14x14xf32>
    %83 = arith.addf %78, %82 : vector<14x14xf32>
    %84 = vector.extract_strided_slice %52 {offsets = [2, 0], sizes = [14, 14], strides = [1, 1]} : vector<16x16xf32> to vector<14x14xf32>
    %c1_31 = arith.constant 1 : index
    %c6_32 = arith.constant 6 : index
    %85 = memref.load %arg2[%c1_31, %c6_32] : memref<4x9xf32, #tpu.memory_space<smem>>
    %86 = vector.broadcast %85 : f32 to vector<14x14xf32>
    %87 = arith.mulf %84, %86 : vector<14x14xf32>
    %88 = arith.addf %83, %87 : vector<14x14xf32>
    %89 = vector.extract_strided_slice %52 {offsets = [2, 1], sizes = [14, 14], strides = [1, 1]} : vector<16x16xf32> to vector<14x14xf32>
    %c1_33 = arith.constant 1 : index
    %c7_34 = arith.constant 7 : index
    %90 = memref.load %arg2[%c1_33, %c7_34] : memref<4x9xf32, #tpu.memory_space<smem>>
    %91 = vector.broadcast %90 : f32 to vector<14x14xf32>
    %92 = arith.mulf %89, %91 : vector<14x14xf32>
    %93 = arith.addf %88, %92 : vector<14x14xf32>
    %94 = vector.extract_strided_slice %52 {offsets = [2, 2], sizes = [14, 14], strides = [1, 1]} : vector<16x16xf32> to vector<14x14xf32>
    %c1_35 = arith.constant 1 : index
    %c8_36 = arith.constant 8 : index
    %95 = memref.load %arg2[%c1_35, %c8_36] : memref<4x9xf32, #tpu.memory_space<smem>>
    %96 = vector.broadcast %95 : f32 to vector<14x14xf32>
    %97 = arith.mulf %94, %96 : vector<14x14xf32>
    %98 = arith.addf %93, %97 : vector<14x14xf32>
    %c1_37 = arith.constant 1 : index
    %99 = memref.load %arg3[%c1_37] : memref<4xf32, #tpu.memory_space<smem>>
    %100 = vector.broadcast %99 : f32 to vector<14x14xf32>
    %101 = arith.addf %98, %100 : vector<14x14xf32>
    %c0_38 = arith.constant 0 : index
    %c2_39 = arith.constant 2 : index
    %c0_40 = arith.constant 0 : index
    %c0_41 = arith.constant 0 : index
    %102 = vector.load %arg1[%c0_38, %c2_39, %c0_40, %c0_41] : memref<1x4x16x16xf32, #tpu.memory_space<vmem>>, vector<1x1x16x16xf32>
    %103 = vector.shape_cast %102 : vector<1x1x16x16xf32> to vector<16x16xf32>
    %cst_42 = arith.constant 0.000000e+00 : f32
    %104 = vector.broadcast %cst_42 : f32 to vector<14x14xf32>
    %105 = vector.extract_strided_slice %103 {offsets = [0, 0], sizes = [14, 14], strides = [1, 1]} : vector<16x16xf32> to vector<14x14xf32>
    %c2_43 = arith.constant 2 : index
    %c0_44 = arith.constant 0 : index
    %106 = memref.load %arg2[%c2_43, %c0_44] : memref<4x9xf32, #tpu.memory_space<smem>>
    %107 = vector.broadcast %106 : f32 to vector<14x14xf32>
    %108 = arith.mulf %105, %107 : vector<14x14xf32>
    %109 = arith.addf %104, %108 : vector<14x14xf32>
    %110 = vector.extract_strided_slice %103 {offsets = [0, 1], sizes = [14, 14], strides = [1, 1]} : vector<16x16xf32> to vector<14x14xf32>
    %c2_45 = arith.constant 2 : index
    %c1_46 = arith.constant 1 : index
    %111 = memref.load %arg2[%c2_45, %c1_46] : memref<4x9xf32, #tpu.memory_space<smem>>
    %112 = vector.broadcast %111 : f32 to vector<14x14xf32>
    %113 = arith.mulf %110, %112 : vector<14x14xf32>
    %114 = arith.addf %109, %113 : vector<14x14xf32>
    %115 = vector.extract_strided_slice %103 {offsets = [0, 2], sizes = [14, 14], strides = [1, 1]} : vector<16x16xf32> to vector<14x14xf32>
    %c2_47 = arith.constant 2 : index
    %c2_48 = arith.constant 2 : index
    %116 = memref.load %arg2[%c2_47, %c2_48] : memref<4x9xf32, #tpu.memory_space<smem>>
    %117 = vector.broadcast %116 : f32 to vector<14x14xf32>
    %118 = arith.mulf %115, %117 : vector<14x14xf32>
    %119 = arith.addf %114, %118 : vector<14x14xf32>
    %120 = vector.extract_strided_slice %103 {offsets = [1, 0], sizes = [14, 14], strides = [1, 1]} : vector<16x16xf32> to vector<14x14xf32>
    %c2_49 = arith.constant 2 : index
    %c3_50 = arith.constant 3 : index
    %121 = memref.load %arg2[%c2_49, %c3_50] : memref<4x9xf32, #tpu.memory_space<smem>>
    %122 = vector.broadcast %121 : f32 to vector<14x14xf32>
    %123 = arith.mulf %120, %122 : vector<14x14xf32>
    %124 = arith.addf %119, %123 : vector<14x14xf32>
    %125 = vector.extract_strided_slice %103 {offsets = [1, 1], sizes = [14, 14], strides = [1, 1]} : vector<16x16xf32> to vector<14x14xf32>
    %c2_51 = arith.constant 2 : index
    %c4_52 = arith.constant 4 : index
    %126 = memref.load %arg2[%c2_51, %c4_52] : memref<4x9xf32, #tpu.memory_space<smem>>
    %127 = vector.broadcast %126 : f32 to vector<14x14xf32>
    %128 = arith.mulf %125, %127 : vector<14x14xf32>
    %129 = arith.addf %124, %128 : vector<14x14xf32>
    %130 = vector.extract_strided_slice %103 {offsets = [1, 2], sizes = [14, 14], strides = [1, 1]} : vector<16x16xf32> to vector<14x14xf32>
    %c2_53 = arith.constant 2 : index
    %c5_54 = arith.constant 5 : index
    %131 = memref.load %arg2[%c2_53, %c5_54] : memref<4x9xf32, #tpu.memory_space<smem>>
    %132 = vector.broadcast %131 : f32 to vector<14x14xf32>
    %133 = arith.mulf %130, %132 : vector<14x14xf32>
    %134 = arith.addf %129, %133 : vector<14x14xf32>
    %135 = vector.extract_strided_slice %103 {offsets = [2, 0], sizes = [14, 14], strides = [1, 1]} : vector<16x16xf32> to vector<14x14xf32>
    %c2_55 = arith.constant 2 : index
    %c6_56 = arith.constant 6 : index
    %136 = memref.load %arg2[%c2_55, %c6_56] : memref<4x9xf32, #tpu.memory_space<smem>>
    %137 = vector.broadcast %136 : f32 to vector<14x14xf32>
    %138 = arith.mulf %135, %137 : vector<14x14xf32>
    %139 = arith.addf %134, %138 : vector<14x14xf32>
    %140 = vector.extract_strided_slice %103 {offsets = [2, 1], sizes = [14, 14], strides = [1, 1]} : vector<16x16xf32> to vector<14x14xf32>
    %c2_57 = arith.constant 2 : index
    %c7_58 = arith.constant 7 : index
    %141 = memref.load %arg2[%c2_57, %c7_58] : memref<4x9xf32, #tpu.memory_space<smem>>
    %142 = vector.broadcast %141 : f32 to vector<14x14xf32>
    %143 = arith.mulf %140, %142 : vector<14x14xf32>
    %144 = arith.addf %139, %143 : vector<14x14xf32>
    %145 = vector.extract_strided_slice %103 {offsets = [2, 2], sizes = [14, 14], strides = [1, 1]} : vector<16x16xf32> to vector<14x14xf32>
    %c2_59 = arith.constant 2 : index
    %c8_60 = arith.constant 8 : index
    %146 = memref.load %arg2[%c2_59, %c8_60] : memref<4x9xf32, #tpu.memory_space<smem>>
    %147 = vector.broadcast %146 : f32 to vector<14x14xf32>
    %148 = arith.mulf %145, %147 : vector<14x14xf32>
    %149 = arith.addf %144, %148 : vector<14x14xf32>
    %c2_61 = arith.constant 2 : index
    %150 = memref.load %arg3[%c2_61] : memref<4xf32, #tpu.memory_space<smem>>
    %151 = vector.broadcast %150 : f32 to vector<14x14xf32>
    %152 = arith.addf %149, %151 : vector<14x14xf32>
    %c0_62 = arith.constant 0 : index
    %c3_63 = arith.constant 3 : index
    %c0_64 = arith.constant 0 : index
    %c0_65 = arith.constant 0 : index
    %153 = vector.load %arg1[%c0_62, %c3_63, %c0_64, %c0_65] : memref<1x4x16x16xf32, #tpu.memory_space<vmem>>, vector<1x1x16x16xf32>
    %154 = vector.shape_cast %153 : vector<1x1x16x16xf32> to vector<16x16xf32>
    %cst_66 = arith.constant 0.000000e+00 : f32
    %155 = vector.broadcast %cst_66 : f32 to vector<14x14xf32>
    %156 = vector.extract_strided_slice %154 {offsets = [0, 0], sizes = [14, 14], strides = [1, 1]} : vector<16x16xf32> to vector<14x14xf32>
    %c3_67 = arith.constant 3 : index
    %c0_68 = arith.constant 0 : index
    %157 = memref.load %arg2[%c3_67, %c0_68] : memref<4x9xf32, #tpu.memory_space<smem>>
    %158 = vector.broadcast %157 : f32 to vector<14x14xf32>
    %159 = arith.mulf %156, %158 : vector<14x14xf32>
    %160 = arith.addf %155, %159 : vector<14x14xf32>
    %161 = vector.extract_strided_slice %154 {offsets = [0, 1], sizes = [14, 14], strides = [1, 1]} : vector<16x16xf32> to vector<14x14xf32>
    %c3_69 = arith.constant 3 : index
    %c1_70 = arith.constant 1 : index
    %162 = memref.load %arg2[%c3_69, %c1_70] : memref<4x9xf32, #tpu.memory_space<smem>>
    %163 = vector.broadcast %162 : f32 to vector<14x14xf32>
    %164 = arith.mulf %161, %163 : vector<14x14xf32>
    %165 = arith.addf %160, %164 : vector<14x14xf32>
    %166 = vector.extract_strided_slice %154 {offsets = [0, 2], sizes = [14, 14], strides = [1, 1]} : vector<16x16xf32> to vector<14x14xf32>
    %c3_71 = arith.constant 3 : index
    %c2_72 = arith.constant 2 : index
    %167 = memref.load %arg2[%c3_71, %c2_72] : memref<4x9xf32, #tpu.memory_space<smem>>
    %168 = vector.broadcast %167 : f32 to vector<14x14xf32>
    %169 = arith.mulf %166, %168 : vector<14x14xf32>
    %170 = arith.addf %165, %169 : vector<14x14xf32>
    %171 = vector.extract_strided_slice %154 {offsets = [1, 0], sizes = [14, 14], strides = [1, 1]} : vector<16x16xf32> to vector<14x14xf32>
    %c3_73 = arith.constant 3 : index
    %c3_74 = arith.constant 3 : index
    %172 = memref.load %arg2[%c3_73, %c3_74] : memref<4x9xf32, #tpu.memory_space<smem>>
    %173 = vector.broadcast %172 : f32 to vector<14x14xf32>
    %174 = arith.mulf %171, %173 : vector<14x14xf32>
    %175 = arith.addf %170, %174 : vector<14x14xf32>
    %176 = vector.extract_strided_slice %154 {offsets = [1, 1], sizes = [14, 14], strides = [1, 1]} : vector<16x16xf32> to vector<14x14xf32>
    %c3_75 = arith.constant 3 : index
    %c4_76 = arith.constant 4 : index
    %177 = memref.load %arg2[%c3_75, %c4_76] : memref<4x9xf32, #tpu.memory_space<smem>>
    %178 = vector.broadcast %177 : f32 to vector<14x14xf32>
    %179 = arith.mulf %176, %178 : vector<14x14xf32>
    %180 = arith.addf %175, %179 : vector<14x14xf32>
    %181 = vector.extract_strided_slice %154 {offsets = [1, 2], sizes = [14, 14], strides = [1, 1]} : vector<16x16xf32> to vector<14x14xf32>
    %c3_77 = arith.constant 3 : index
    %c5_78 = arith.constant 5 : index
    %182 = memref.load %arg2[%c3_77, %c5_78] : memref<4x9xf32, #tpu.memory_space<smem>>
    %183 = vector.broadcast %182 : f32 to vector<14x14xf32>
    %184 = arith.mulf %181, %183 : vector<14x14xf32>
    %185 = arith.addf %180, %184 : vector<14x14xf32>
    %186 = vector.extract_strided_slice %154 {offsets = [2, 0], sizes = [14, 14], strides = [1, 1]} : vector<16x16xf32> to vector<14x14xf32>
    %c3_79 = arith.constant 3 : index
    %c6_80 = arith.constant 6 : index
    %187 = memref.load %arg2[%c3_79, %c6_80] : memref<4x9xf32, #tpu.memory_space<smem>>
    %188 = vector.broadcast %187 : f32 to vector<14x14xf32>
    %189 = arith.mulf %186, %188 : vector<14x14xf32>
    %190 = arith.addf %185, %189 : vector<14x14xf32>
    %191 = vector.extract_strided_slice %154 {offsets = [2, 1], sizes = [14, 14], strides = [1, 1]} : vector<16x16xf32> to vector<14x14xf32>
    %c3_81 = arith.constant 3 : index
    %c7_82 = arith.constant 7 : index
    %192 = memref.load %arg2[%c3_81, %c7_82] : memref<4x9xf32, #tpu.memory_space<smem>>
    %193 = vector.broadcast %192 : f32 to vector<14x14xf32>
    %194 = arith.mulf %191, %193 : vector<14x14xf32>
    %195 = arith.addf %190, %194 : vector<14x14xf32>
    %196 = vector.extract_strided_slice %154 {offsets = [2, 2], sizes = [14, 14], strides = [1, 1]} : vector<16x16xf32> to vector<14x14xf32>
    %c3_83 = arith.constant 3 : index
    %c8_84 = arith.constant 8 : index
    %197 = memref.load %arg2[%c3_83, %c8_84] : memref<4x9xf32, #tpu.memory_space<smem>>
    %198 = vector.broadcast %197 : f32 to vector<14x14xf32>
    %199 = arith.mulf %196, %198 : vector<14x14xf32>
    %200 = arith.addf %195, %199 : vector<14x14xf32>
    %c3_85 = arith.constant 3 : index
    %201 = memref.load %arg3[%c3_85] : memref<4xf32, #tpu.memory_space<smem>>
    %202 = vector.broadcast %201 : f32 to vector<14x14xf32>
    %203 = arith.addf %200, %202 : vector<14x14xf32>
    %c0_86 = arith.constant 0 : index
    %c0_87 = arith.constant 0 : index
    %204 = memref.load %arg4[%c0_86, %c0_87] : memref<8x4xf32, #tpu.memory_space<smem>>
    %205 = vector.broadcast %204 : f32 to vector<14x14xf32>
    %206 = arith.mulf %50, %205 : vector<14x14xf32>
    %c0_88 = arith.constant 0 : index
    %c1_89 = arith.constant 1 : index
    %207 = memref.load %arg4[%c0_88, %c1_89] : memref<8x4xf32, #tpu.memory_space<smem>>
    %208 = vector.broadcast %207 : f32 to vector<14x14xf32>
    %209 = arith.mulf %101, %208 : vector<14x14xf32>
    %210 = arith.addf %206, %209 : vector<14x14xf32>
    %c0_90 = arith.constant 0 : index
    %c2_91 = arith.constant 2 : index
    %211 = memref.load %arg4[%c0_90, %c2_91] : memref<8x4xf32, #tpu.memory_space<smem>>
    %212 = vector.broadcast %211 : f32 to vector<14x14xf32>
    %213 = arith.mulf %152, %212 : vector<14x14xf32>
    %214 = arith.addf %210, %213 : vector<14x14xf32>
    %c0_92 = arith.constant 0 : index
    %c3_93 = arith.constant 3 : index
    %215 = memref.load %arg4[%c0_92, %c3_93] : memref<8x4xf32, #tpu.memory_space<smem>>
    %216 = vector.broadcast %215 : f32 to vector<14x14xf32>
    %217 = arith.mulf %203, %216 : vector<14x14xf32>
    %218 = arith.addf %214, %217 : vector<14x14xf32>
    %c0_94 = arith.constant 0 : index
    %219 = memref.load %arg5[%c0_94] : memref<8xf32, #tpu.memory_space<smem>>
    %220 = vector.broadcast %219 : f32 to vector<14x14xf32>
    %221 = arith.addf %218, %220 : vector<14x14xf32>
    %c1_95 = arith.constant 1 : index
    %c0_96 = arith.constant 0 : index
    %222 = memref.load %arg4[%c1_95, %c0_96] : memref<8x4xf32, #tpu.memory_space<smem>>
    %223 = vector.broadcast %222 : f32 to vector<14x14xf32>
    %224 = arith.mulf %50, %223 : vector<14x14xf32>
    %c1_97 = arith.constant 1 : index
    %c1_98 = arith.constant 1 : index
    %225 = memref.load %arg4[%c1_97, %c1_98] : memref<8x4xf32, #tpu.memory_space<smem>>
    %226 = vector.broadcast %225 : f32 to vector<14x14xf32>
    %227 = arith.mulf %101, %226 : vector<14x14xf32>
    %228 = arith.addf %224, %227 : vector<14x14xf32>
    %c1_99 = arith.constant 1 : index
    %c2_100 = arith.constant 2 : index
    %229 = memref.load %arg4[%c1_99, %c2_100] : memref<8x4xf32, #tpu.memory_space<smem>>
    %230 = vector.broadcast %229 : f32 to vector<14x14xf32>
    %231 = arith.mulf %152, %230 : vector<14x14xf32>
    %232 = arith.addf %228, %231 : vector<14x14xf32>
    %c1_101 = arith.constant 1 : index
    %c3_102 = arith.constant 3 : index
    %233 = memref.load %arg4[%c1_101, %c3_102] : memref<8x4xf32, #tpu.memory_space<smem>>
    %234 = vector.broadcast %233 : f32 to vector<14x14xf32>
    %235 = arith.mulf %203, %234 : vector<14x14xf32>
    %236 = arith.addf %232, %235 : vector<14x14xf32>
    %c1_103 = arith.constant 1 : index
    %237 = memref.load %arg5[%c1_103] : memref<8xf32, #tpu.memory_space<smem>>
    %238 = vector.broadcast %237 : f32 to vector<14x14xf32>
    %239 = arith.addf %236, %238 : vector<14x14xf32>
    %c2_104 = arith.constant 2 : index
    %c0_105 = arith.constant 0 : index
    %240 = memref.load %arg4[%c2_104, %c0_105] : memref<8x4xf32, #tpu.memory_space<smem>>
    %241 = vector.broadcast %240 : f32 to vector<14x14xf32>
    %242 = arith.mulf %50, %241 : vector<14x14xf32>
    %c2_106 = arith.constant 2 : index
    %c1_107 = arith.constant 1 : index
    %243 = memref.load %arg4[%c2_106, %c1_107] : memref<8x4xf32, #tpu.memory_space<smem>>
    %244 = vector.broadcast %243 : f32 to vector<14x14xf32>
    %245 = arith.mulf %101, %244 : vector<14x14xf32>
    %246 = arith.addf %242, %245 : vector<14x14xf32>
    %c2_108 = arith.constant 2 : index
    %c2_109 = arith.constant 2 : index
    %247 = memref.load %arg4[%c2_108, %c2_109] : memref<8x4xf32, #tpu.memory_space<smem>>
    %248 = vector.broadcast %247 : f32 to vector<14x14xf32>
    %249 = arith.mulf %152, %248 : vector<14x14xf32>
    %250 = arith.addf %246, %249 : vector<14x14xf32>
    %c2_110 = arith.constant 2 : index
    %c3_111 = arith.constant 3 : index
    %251 = memref.load %arg4[%c2_110, %c3_111] : memref<8x4xf32, #tpu.memory_space<smem>>
    %252 = vector.broadcast %251 : f32 to vector<14x14xf32>
    %253 = arith.mulf %203, %252 : vector<14x14xf32>
    %254 = arith.addf %250, %253 : vector<14x14xf32>
    %c2_112 = arith.constant 2 : index
    %255 = memref.load %arg5[%c2_112] : memref<8xf32, #tpu.memory_space<smem>>
    %256 = vector.broadcast %255 : f32 to vector<14x14xf32>
    %257 = arith.addf %254, %256 : vector<14x14xf32>
    %c3_113 = arith.constant 3 : index
    %c0_114 = arith.constant 0 : index
    %258 = memref.load %arg4[%c3_113, %c0_114] : memref<8x4xf32, #tpu.memory_space<smem>>
    %259 = vector.broadcast %258 : f32 to vector<14x14xf32>
    %260 = arith.mulf %50, %259 : vector<14x14xf32>
    %c3_115 = arith.constant 3 : index
    %c1_116 = arith.constant 1 : index
    %261 = memref.load %arg4[%c3_115, %c1_116] : memref<8x4xf32, #tpu.memory_space<smem>>
    %262 = vector.broadcast %261 : f32 to vector<14x14xf32>
    %263 = arith.mulf %101, %262 : vector<14x14xf32>
    %264 = arith.addf %260, %263 : vector<14x14xf32>
    %c3_117 = arith.constant 3 : index
    %c2_118 = arith.constant 2 : index
    %265 = memref.load %arg4[%c3_117, %c2_118] : memref<8x4xf32, #tpu.memory_space<smem>>
    %266 = vector.broadcast %265 : f32 to vector<14x14xf32>
    %267 = arith.mulf %152, %266 : vector<14x14xf32>
    %268 = arith.addf %264, %267 : vector<14x14xf32>
    %c3_119 = arith.constant 3 : index
    %c3_120 = arith.constant 3 : index
    %269 = memref.load %arg4[%c3_119, %c3_120] : memref<8x4xf32, #tpu.memory_space<smem>>
    %270 = vector.broadcast %269 : f32 to vector<14x14xf32>
    %271 = arith.mulf %203, %270 : vector<14x14xf32>
    %272 = arith.addf %268, %271 : vector<14x14xf32>
    %c3_121 = arith.constant 3 : index
    %273 = memref.load %arg5[%c3_121] : memref<8xf32, #tpu.memory_space<smem>>
    %274 = vector.broadcast %273 : f32 to vector<14x14xf32>
    %275 = arith.addf %272, %274 : vector<14x14xf32>
    %c4_122 = arith.constant 4 : index
    %c0_123 = arith.constant 0 : index
    %276 = memref.load %arg4[%c4_122, %c0_123] : memref<8x4xf32, #tpu.memory_space<smem>>
    %277 = vector.broadcast %276 : f32 to vector<14x14xf32>
    %278 = arith.mulf %50, %277 : vector<14x14xf32>
    %c4_124 = arith.constant 4 : index
    %c1_125 = arith.constant 1 : index
    %279 = memref.load %arg4[%c4_124, %c1_125] : memref<8x4xf32, #tpu.memory_space<smem>>
    %280 = vector.broadcast %279 : f32 to vector<14x14xf32>
    %281 = arith.mulf %101, %280 : vector<14x14xf32>
    %282 = arith.addf %278, %281 : vector<14x14xf32>
    %c4_126 = arith.constant 4 : index
    %c2_127 = arith.constant 2 : index
    %283 = memref.load %arg4[%c4_126, %c2_127] : memref<8x4xf32, #tpu.memory_space<smem>>
    %284 = vector.broadcast %283 : f32 to vector<14x14xf32>
    %285 = arith.mulf %152, %284 : vector<14x14xf32>
    %286 = arith.addf %282, %285 : vector<14x14xf32>
    %c4_128 = arith.constant 4 : index
    %c3_129 = arith.constant 3 : index
    %287 = memref.load %arg4[%c4_128, %c3_129] : memref<8x4xf32, #tpu.memory_space<smem>>
    %288 = vector.broadcast %287 : f32 to vector<14x14xf32>
    %289 = arith.mulf %203, %288 : vector<14x14xf32>
    %290 = arith.addf %286, %289 : vector<14x14xf32>
    %c4_130 = arith.constant 4 : index
    %291 = memref.load %arg5[%c4_130] : memref<8xf32, #tpu.memory_space<smem>>
    %292 = vector.broadcast %291 : f32 to vector<14x14xf32>
    %293 = arith.addf %290, %292 : vector<14x14xf32>
    %c5_131 = arith.constant 5 : index
    %c0_132 = arith.constant 0 : index
    %294 = memref.load %arg4[%c5_131, %c0_132] : memref<8x4xf32, #tpu.memory_space<smem>>
    %295 = vector.broadcast %294 : f32 to vector<14x14xf32>
    %296 = arith.mulf %50, %295 : vector<14x14xf32>
    %c5_133 = arith.constant 5 : index
    %c1_134 = arith.constant 1 : index
    %297 = memref.load %arg4[%c5_133, %c1_134] : memref<8x4xf32, #tpu.memory_space<smem>>
    %298 = vector.broadcast %297 : f32 to vector<14x14xf32>
    %299 = arith.mulf %101, %298 : vector<14x14xf32>
    %300 = arith.addf %296, %299 : vector<14x14xf32>
    %c5_135 = arith.constant 5 : index
    %c2_136 = arith.constant 2 : index
    %301 = memref.load %arg4[%c5_135, %c2_136] : memref<8x4xf32, #tpu.memory_space<smem>>
    %302 = vector.broadcast %301 : f32 to vector<14x14xf32>
    %303 = arith.mulf %152, %302 : vector<14x14xf32>
    %304 = arith.addf %300, %303 : vector<14x14xf32>
    %c5_137 = arith.constant 5 : index
    %c3_138 = arith.constant 3 : index
    %305 = memref.load %arg4[%c5_137, %c3_138] : memref<8x4xf32, #tpu.memory_space<smem>>
    %306 = vector.broadcast %305 : f32 to vector<14x14xf32>
    %307 = arith.mulf %203, %306 : vector<14x14xf32>
    %308 = arith.addf %304, %307 : vector<14x14xf32>
    %c5_139 = arith.constant 5 : index
    %309 = memref.load %arg5[%c5_139] : memref<8xf32, #tpu.memory_space<smem>>
    %310 = vector.broadcast %309 : f32 to vector<14x14xf32>
    %311 = arith.addf %308, %310 : vector<14x14xf32>
    %c6_140 = arith.constant 6 : index
    %c0_141 = arith.constant 0 : index
    %312 = memref.load %arg4[%c6_140, %c0_141] : memref<8x4xf32, #tpu.memory_space<smem>>
    %313 = vector.broadcast %312 : f32 to vector<14x14xf32>
    %314 = arith.mulf %50, %313 : vector<14x14xf32>
    %c6_142 = arith.constant 6 : index
    %c1_143 = arith.constant 1 : index
    %315 = memref.load %arg4[%c6_142, %c1_143] : memref<8x4xf32, #tpu.memory_space<smem>>
    %316 = vector.broadcast %315 : f32 to vector<14x14xf32>
    %317 = arith.mulf %101, %316 : vector<14x14xf32>
    %318 = arith.addf %314, %317 : vector<14x14xf32>
    %c6_144 = arith.constant 6 : index
    %c2_145 = arith.constant 2 : index
    %319 = memref.load %arg4[%c6_144, %c2_145] : memref<8x4xf32, #tpu.memory_space<smem>>
    %320 = vector.broadcast %319 : f32 to vector<14x14xf32>
    %321 = arith.mulf %152, %320 : vector<14x14xf32>
    %322 = arith.addf %318, %321 : vector<14x14xf32>
    %c6_146 = arith.constant 6 : index
    %c3_147 = arith.constant 3 : index
    %323 = memref.load %arg4[%c6_146, %c3_147] : memref<8x4xf32, #tpu.memory_space<smem>>
    %324 = vector.broadcast %323 : f32 to vector<14x14xf32>
    %325 = arith.mulf %203, %324 : vector<14x14xf32>
    %326 = arith.addf %322, %325 : vector<14x14xf32>
    %c6_148 = arith.constant 6 : index
    %327 = memref.load %arg5[%c6_148] : memref<8xf32, #tpu.memory_space<smem>>
    %328 = vector.broadcast %327 : f32 to vector<14x14xf32>
    %329 = arith.addf %326, %328 : vector<14x14xf32>
    %c7_149 = arith.constant 7 : index
    %c0_150 = arith.constant 0 : index
    %330 = memref.load %arg4[%c7_149, %c0_150] : memref<8x4xf32, #tpu.memory_space<smem>>
    %331 = vector.broadcast %330 : f32 to vector<14x14xf32>
    %332 = arith.mulf %50, %331 : vector<14x14xf32>
    %c7_151 = arith.constant 7 : index
    %c1_152 = arith.constant 1 : index
    %333 = memref.load %arg4[%c7_151, %c1_152] : memref<8x4xf32, #tpu.memory_space<smem>>
    %334 = vector.broadcast %333 : f32 to vector<14x14xf32>
    %335 = arith.mulf %101, %334 : vector<14x14xf32>
    %336 = arith.addf %332, %335 : vector<14x14xf32>
    %c7_153 = arith.constant 7 : index
    %c2_154 = arith.constant 2 : index
    %337 = memref.load %arg4[%c7_153, %c2_154] : memref<8x4xf32, #tpu.memory_space<smem>>
    %338 = vector.broadcast %337 : f32 to vector<14x14xf32>
    %339 = arith.mulf %152, %338 : vector<14x14xf32>
    %340 = arith.addf %336, %339 : vector<14x14xf32>
    %c7_155 = arith.constant 7 : index
    %c3_156 = arith.constant 3 : index
    %341 = memref.load %arg4[%c7_155, %c3_156] : memref<8x4xf32, #tpu.memory_space<smem>>
    %342 = vector.broadcast %341 : f32 to vector<14x14xf32>
    %343 = arith.mulf %203, %342 : vector<14x14xf32>
    %344 = arith.addf %340, %343 : vector<14x14xf32>
    %c7_157 = arith.constant 7 : index
    %345 = memref.load %arg5[%c7_157] : memref<8xf32, #tpu.memory_space<smem>>
    %346 = vector.broadcast %345 : f32 to vector<14x14xf32>
    %347 = arith.addf %344, %346 : vector<14x14xf32>
    %c0_158 = arith.constant 0 : index
    %348 = memref.load %arg6[%c0_158] : memref<8xf32, #tpu.memory_space<smem>>
    %349 = vector.broadcast %348 : f32 to vector<14x14xf32>
    %350 = arith.mulf %221, %349 : vector<14x14xf32>
    %c0_159 = arith.constant 0 : index
    %351 = memref.load %arg7[%c0_159] : memref<8xf32, #tpu.memory_space<smem>>
    %352 = vector.broadcast %351 : f32 to vector<14x14xf32>
    %353 = arith.addf %350, %352 : vector<14x14xf32>
    %cst_160 = arith.constant 0.000000e+00 : f32
    %354 = vector.broadcast %cst_160 : f32 to vector<14x14xf32>
    %355 = arith.maximumf %353, %354 : vector<14x14xf32>
    %c0_161 = arith.constant 0 : index
    %c0_162 = arith.constant 0 : index
    %c0_163 = arith.constant 0 : index
    %c0_164 = arith.constant 0 : index
    %356 = vector.load %arg8[%c0_161, %c0_162, %c0_163, %c0_164] : memref<1x8x14x14xf32, #tpu.memory_space<vmem>>, vector<1x1x14x14xf32>
    %357 = vector.shape_cast %356 : vector<1x1x14x14xf32> to vector<14x14xf32>
    %358 = vector.shape_cast %355 : vector<14x14xf32> to vector<1x1x14x14xf32>
    tpu.vector_store %arg8[%c0_161, %c0_162, %c0_163, %c0_164], %358 {strides = array<i32>} : memref<1x8x14x14xf32, #tpu.memory_space<vmem>>, vector<1x1x14x14xf32>,
    %c1_165 = arith.constant 1 : index
    %359 = memref.load %arg6[%c1_165] : memref<8xf32, #tpu.memory_space<smem>>
    %360 = vector.broadcast %359 : f32 to vector<14x14xf32>
    %361 = arith.mulf %239, %360 : vector<14x14xf32>
    %c1_166 = arith.constant 1 : index
    %362 = memref.load %arg7[%c1_166] : memref<8xf32, #tpu.memory_space<smem>>
    %363 = vector.broadcast %362 : f32 to vector<14x14xf32>
    %364 = arith.addf %361, %363 : vector<14x14xf32>
    %cst_167 = arith.constant 0.000000e+00 : f32
    %365 = vector.broadcast %cst_167 : f32 to vector<14x14xf32>
    %366 = arith.maximumf %364, %365 : vector<14x14xf32>
    %c0_168 = arith.constant 0 : index
    %c1_169 = arith.constant 1 : index
    %c0_170 = arith.constant 0 : index
    %c0_171 = arith.constant 0 : index
    %367 = vector.load %arg8[%c0_168, %c1_169, %c0_170, %c0_171] : memref<1x8x14x14xf32, #tpu.memory_space<vmem>>, vector<1x1x14x14xf32>
    %368 = vector.shape_cast %367 : vector<1x1x14x14xf32> to vector<14x14xf32>
    %369 = vector.shape_cast %366 : vector<14x14xf32> to vector<1x1x14x14xf32>
    tpu.vector_store %arg8[%c0_168, %c1_169, %c0_170, %c0_171], %369 {strides = array<i32>} : memref<1x8x14x14xf32, #tpu.memory_space<vmem>>, vector<1x1x14x14xf32>,
    %c2_172 = arith.constant 2 : index
    %370 = memref.load %arg6[%c2_172] : memref<8xf32, #tpu.memory_space<smem>>
    %371 = vector.broadcast %370 : f32 to vector<14x14xf32>
    %372 = arith.mulf %257, %371 : vector<14x14xf32>
    %c2_173 = arith.constant 2 : index
    %373 = memref.load %arg7[%c2_173] : memref<8xf32, #tpu.memory_space<smem>>
    %374 = vector.broadcast %373 : f32 to vector<14x14xf32>
    %375 = arith.addf %372, %374 : vector<14x14xf32>
    %cst_174 = arith.constant 0.000000e+00 : f32
    %376 = vector.broadcast %cst_174 : f32 to vector<14x14xf32>
    %377 = arith.maximumf %375, %376 : vector<14x14xf32>
    %c0_175 = arith.constant 0 : index
    %c2_176 = arith.constant 2 : index
    %c0_177 = arith.constant 0 : index
    %c0_178 = arith.constant 0 : index
    %378 = vector.load %arg8[%c0_175, %c2_176, %c0_177, %c0_178] : memref<1x8x14x14xf32, #tpu.memory_space<vmem>>, vector<1x1x14x14xf32>
    %379 = vector.shape_cast %378 : vector<1x1x14x14xf32> to vector<14x14xf32>
    %380 = vector.shape_cast %377 : vector<14x14xf32> to vector<1x1x14x14xf32>
    tpu.vector_store %arg8[%c0_175, %c2_176, %c0_177, %c0_178], %380 {strides = array<i32>} : memref<1x8x14x14xf32, #tpu.memory_space<vmem>>, vector<1x1x14x14xf32>,
    %c3_179 = arith.constant 3 : index
    %381 = memref.load %arg6[%c3_179] : memref<8xf32, #tpu.memory_space<smem>>
    %382 = vector.broadcast %381 : f32 to vector<14x14xf32>
    %383 = arith.mulf %275, %382 : vector<14x14xf32>
    %c3_180 = arith.constant 3 : index
    %384 = memref.load %arg7[%c3_180] : memref<8xf32, #tpu.memory_space<smem>>
    %385 = vector.broadcast %384 : f32 to vector<14x14xf32>
    %386 = arith.addf %383, %385 : vector<14x14xf32>
    %cst_181 = arith.constant 0.000000e+00 : f32
    %387 = vector.broadcast %cst_181 : f32 to vector<14x14xf32>
    %388 = arith.maximumf %386, %387 : vector<14x14xf32>
    %c0_182 = arith.constant 0 : index
    %c3_183 = arith.constant 3 : index
    %c0_184 = arith.constant 0 : index
    %c0_185 = arith.constant 0 : index
    %389 = vector.load %arg8[%c0_182, %c3_183, %c0_184, %c0_185] : memref<1x8x14x14xf32, #tpu.memory_space<vmem>>, vector<1x1x14x14xf32>
    %390 = vector.shape_cast %389 : vector<1x1x14x14xf32> to vector<14x14xf32>
    %391 = vector.shape_cast %388 : vector<14x14xf32> to vector<1x1x14x14xf32>
    tpu.vector_store %arg8[%c0_182, %c3_183, %c0_184, %c0_185], %391 {strides = array<i32>} : memref<1x8x14x14xf32, #tpu.memory_space<vmem>>, vector<1x1x14x14xf32>,
    %c4_186 = arith.constant 4 : index
    %392 = memref.load %arg6[%c4_186] : memref<8xf32, #tpu.memory_space<smem>>
    %393 = vector.broadcast %392 : f32 to vector<14x14xf32>
    %394 = arith.mulf %293, %393 : vector<14x14xf32>
    %c4_187 = arith.constant 4 : index
    %395 = memref.load %arg7[%c4_187] : memref<8xf32, #tpu.memory_space<smem>>
    %396 = vector.broadcast %395 : f32 to vector<14x14xf32>
    %397 = arith.addf %394, %396 : vector<14x14xf32>
    %cst_188 = arith.constant 0.000000e+00 : f32
    %398 = vector.broadcast %cst_188 : f32 to vector<14x14xf32>
    %399 = arith.maximumf %397, %398 : vector<14x14xf32>
    %c0_189 = arith.constant 0 : index
    %c4_190 = arith.constant 4 : index
    %c0_191 = arith.constant 0 : index
    %c0_192 = arith.constant 0 : index
    %400 = vector.load %arg8[%c0_189, %c4_190, %c0_191, %c0_192] : memref<1x8x14x14xf32, #tpu.memory_space<vmem>>, vector<1x1x14x14xf32>
    %401 = vector.shape_cast %400 : vector<1x1x14x14xf32> to vector<14x14xf32>
    %402 = vector.shape_cast %399 : vector<14x14xf32> to vector<1x1x14x14xf32>
    tpu.vector_store %arg8[%c0_189, %c4_190, %c0_191, %c0_192], %402 {strides = array<i32>} : memref<1x8x14x14xf32, #tpu.memory_space<vmem>>, vector<1x1x14x14xf32>,
    %c5_193 = arith.constant 5 : index
    %403 = memref.load %arg6[%c5_193] : memref<8xf32, #tpu.memory_space<smem>>
    %404 = vector.broadcast %403 : f32 to vector<14x14xf32>
    %405 = arith.mulf %311, %404 : vector<14x14xf32>
    %c5_194 = arith.constant 5 : index
    %406 = memref.load %arg7[%c5_194] : memref<8xf32, #tpu.memory_space<smem>>
    %407 = vector.broadcast %406 : f32 to vector<14x14xf32>
    %408 = arith.addf %405, %407 : vector<14x14xf32>
    %cst_195 = arith.constant 0.000000e+00 : f32
    %409 = vector.broadcast %cst_195 : f32 to vector<14x14xf32>
    %410 = arith.maximumf %408, %409 : vector<14x14xf32>
    %c0_196 = arith.constant 0 : index
    %c5_197 = arith.constant 5 : index
    %c0_198 = arith.constant 0 : index
    %c0_199 = arith.constant 0 : index
    %411 = vector.load %arg8[%c0_196, %c5_197, %c0_198, %c0_199] : memref<1x8x14x14xf32, #tpu.memory_space<vmem>>, vector<1x1x14x14xf32>
    %412 = vector.shape_cast %411 : vector<1x1x14x14xf32> to vector<14x14xf32>
    %413 = vector.shape_cast %410 : vector<14x14xf32> to vector<1x1x14x14xf32>
    tpu.vector_store %arg8[%c0_196, %c5_197, %c0_198, %c0_199], %413 {strides = array<i32>} : memref<1x8x14x14xf32, #tpu.memory_space<vmem>>, vector<1x1x14x14xf32>,
    %c6_200 = arith.constant 6 : index
    %414 = memref.load %arg6[%c6_200] : memref<8xf32, #tpu.memory_space<smem>>
    %415 = vector.broadcast %414 : f32 to vector<14x14xf32>
    %416 = arith.mulf %329, %415 : vector<14x14xf32>
    %c6_201 = arith.constant 6 : index
    %417 = memref.load %arg7[%c6_201] : memref<8xf32, #tpu.memory_space<smem>>
    %418 = vector.broadcast %417 : f32 to vector<14x14xf32>
    %419 = arith.addf %416, %418 : vector<14x14xf32>
    %cst_202 = arith.constant 0.000000e+00 : f32
    %420 = vector.broadcast %cst_202 : f32 to vector<14x14xf32>
    %421 = arith.maximumf %419, %420 : vector<14x14xf32>
    %c0_203 = arith.constant 0 : index
    %c6_204 = arith.constant 6 : index
    %c0_205 = arith.constant 0 : index
    %c0_206 = arith.constant 0 : index
    %422 = vector.load %arg8[%c0_203, %c6_204, %c0_205, %c0_206] : memref<1x8x14x14xf32, #tpu.memory_space<vmem>>, vector<1x1x14x14xf32>
    %423 = vector.shape_cast %422 : vector<1x1x14x14xf32> to vector<14x14xf32>
    %424 = vector.shape_cast %421 : vector<14x14xf32> to vector<1x1x14x14xf32>
    tpu.vector_store %arg8[%c0_203, %c6_204, %c0_205, %c0_206], %424 {strides = array<i32>} : memref<1x8x14x14xf32, #tpu.memory_space<vmem>>, vector<1x1x14x14xf32>,
    %c7_207 = arith.constant 7 : index
    %425 = memref.load %arg6[%c7_207] : memref<8xf32, #tpu.memory_space<smem>>
    %426 = vector.broadcast %425 : f32 to vector<14x14xf32>
    %427 = arith.mulf %347, %426 : vector<14x14xf32>
    %c7_208 = arith.constant 7 : index
    %428 = memref.load %arg7[%c7_208] : memref<8xf32, #tpu.memory_space<smem>>
    %429 = vector.broadcast %428 : f32 to vector<14x14xf32>
    %430 = arith.addf %427, %429 : vector<14x14xf32>
    %cst_209 = arith.constant 0.000000e+00 : f32
    %431 = vector.broadcast %cst_209 : f32 to vector<14x14xf32>
    %432 = arith.maximumf %430, %431 : vector<14x14xf32>
    %c0_210 = arith.constant 0 : index
    %c7_211 = arith.constant 7 : index
    %c0_212 = arith.constant 0 : index
    %c0_213 = arith.constant 0 : index
    %433 = vector.load %arg8[%c0_210, %c7_211, %c0_212, %c0_213] : memref<1x8x14x14xf32, #tpu.memory_space<vmem>>, vector<1x1x14x14xf32>
    %434 = vector.shape_cast %433 : vector<1x1x14x14xf32> to vector<14x14xf32>
    %435 = vector.shape_cast %432 : vector<14x14xf32> to vector<1x1x14x14xf32>
    tpu.vector_store %arg8[%c0_210, %c7_211, %c0_212, %c0_213], %435 {strides = array<i32>} : memref<1x8x14x14xf32, #tpu.memory_space<vmem>>, vector<1x1x14x14xf32>,
    return
  }
  func.func @transform_0(%arg0: i32) -> (i32, i32, i32, i32) {
    %c0_i32 = arith.constant 0 : i32
    %c0_i32_0 = arith.constant 0 : i32
    %c0_i32_1 = arith.constant 0 : i32
    %c0_i32_2 = arith.constant 0 : i32
    return %arg0, %c0_i32, %c0_i32_0, %c0_i32_1 : i32, i32, i32, i32
  }
  func.func @transform_1(%arg0: i32) -> (i32, i32) {
    %c0_i32 = arith.constant 0 : i32
    %c0_i32_0 = arith.constant 0 : i32
    %c0_i32_1 = arith.constant 0 : i32
    return %c0_i32, %c0_i32_0 : i32, i32
  }
  func.func @transform_2(%arg0: i32) -> i32 {
    %c0_i32 = arith.constant 0 : i32
    %c0_i32_0 = arith.constant 0 : i32
    return %c0_i32 : i32
  }
  func.func @transform_3(%arg0: i32) -> (i32, i32) {
    %c0_i32 = arith.constant 0 : i32
    %c0_i32_0 = arith.constant 0 : i32
    %c0_i32_1 = arith.constant 0 : i32
    return %c0_i32, %c0_i32_0 : i32, i32
  }
  func.func @transform_4(%arg0: i32) -> i32 {
    %c0_i32 = arith.constant 0 : i32
    %c0_i32_0 = arith.constant 0 : i32
    return %c0_i32 : i32
  }
  func.func @transform_5(%arg0: i32) -> i32 {
    %c0_i32 = arith.constant 0 : i32
    %c0_i32_0 = arith.constant 0 : i32
    return %c0_i32 : i32
  }
  func.func @transform_6(%arg0: i32) -> i32 {
    %c0_i32 = arith.constant 0 : i32
    %c0_i32_0 = arith.constant 0 : i32
    return %c0_i32 : i32
  }
  func.func @transform_7(%arg0: i32) -> (i32, i32, i32, i32) {
    %c0_i32 = arith.constant 0 : i32
    %c0_i32_0 = arith.constant 0 : i32
    %c0_i32_1 = arith.constant 0 : i32
    %c0_i32_2 = arith.constant 0 : i32
    return %arg0, %c0_i32, %c0_i32_0, %c0_i32_1 : i32, i32, i32, i32
  }
}

module attributes {stable_mosaic.version = 11 : i64} {
  func.func @stats_kernel(%arg0: i32, %arg1: memref<1x4x16x16xf32, #tpu.memory_space<vmem>>, %arg2: memref<4x9xf32, #tpu.memory_space<smem>>, %arg3: memref<4xf32, #tpu.memory_space<smem>>, %arg4: memref<8x4xf32, #tpu.memory_space<smem>>, %arg5: memref<8xf32, #tpu.memory_space<smem>>, %arg6: memref<1x8x14xf32, #tpu.memory_space<vmem>>, %arg7: memref<1x8x14xf32, #tpu.memory_space<vmem>>) attributes {dimension_semantics = [#tpu.dimension_semantics<parallel>], iteration_bounds = array<i64: 2>, scalar_prefetch = 0 : i64, scratch_operands = 0 : i64, tpu.core_type = #tpu.core_type<tc>, window_params = [{transform_indices = @transform_0, window_bounds = array<i64: 1, 4, 16, 16>}, {transform_indices = @transform_1, window_bounds = array<i64: 4, 9>}, {transform_indices = @transform_2, window_bounds = array<i64: 4>}, {transform_indices = @transform_3, window_bounds = array<i64: 8, 4>}, {transform_indices = @transform_4, window_bounds = array<i64: 8>}, {transform_indices = @transform_5, window_bounds = array<i64: 1, 8, 14>}, {transform_indices = @transform_6, window_bounds = array<i64: 1, 8, 14>}]} {
    %c0 = arith.constant 0 : index
    %c0_0 = arith.constant 0 : index
    %c0_1 = arith.constant 0 : index
    %c0_2 = arith.constant 0 : index
    %0 = vector.load %arg1[%c0, %c0_0, %c0_1, %c0_2] : memref<1x4x16x16xf32, #tpu.memory_space<vmem>>, vector<1x1x16x16xf32>
    %1 = vector.shape_cast %0 : vector<1x1x16x16xf32> to vector<16x16xf32>
    %cst = arith.constant 0.000000e+00 : f32
    %2 = vector.broadcast %cst : f32 to vector<14x14xf32>
    %3 = vector.extract_strided_slice %1 {offsets = [0, 0], sizes = [14, 14], strides = [1, 1]} : vector<16x16xf32> to vector<14x14xf32>
    %c0_3 = arith.constant 0 : index
    %c0_4 = arith.constant 0 : index
    %4 = memref.load %arg2[%c0_3, %c0_4] : memref<4x9xf32, #tpu.memory_space<smem>>
    %5 = vector.broadcast %4 : f32 to vector<14x14xf32>
    %6 = arith.mulf %3, %5 : vector<14x14xf32>
    %7 = arith.addf %2, %6 : vector<14x14xf32>
    %8 = vector.extract_strided_slice %1 {offsets = [0, 1], sizes = [14, 14], strides = [1, 1]} : vector<16x16xf32> to vector<14x14xf32>
    %c0_5 = arith.constant 0 : index
    %c1 = arith.constant 1 : index
    %9 = memref.load %arg2[%c0_5, %c1] : memref<4x9xf32, #tpu.memory_space<smem>>
    %10 = vector.broadcast %9 : f32 to vector<14x14xf32>
    %11 = arith.mulf %8, %10 : vector<14x14xf32>
    %12 = arith.addf %7, %11 : vector<14x14xf32>
    %13 = vector.extract_strided_slice %1 {offsets = [0, 2], sizes = [14, 14], strides = [1, 1]} : vector<16x16xf32> to vector<14x14xf32>
    %c0_6 = arith.constant 0 : index
    %c2 = arith.constant 2 : index
    %14 = memref.load %arg2[%c0_6, %c2] : memref<4x9xf32, #tpu.memory_space<smem>>
    %15 = vector.broadcast %14 : f32 to vector<14x14xf32>
    %16 = arith.mulf %13, %15 : vector<14x14xf32>
    %17 = arith.addf %12, %16 : vector<14x14xf32>
    %18 = vector.extract_strided_slice %1 {offsets = [1, 0], sizes = [14, 14], strides = [1, 1]} : vector<16x16xf32> to vector<14x14xf32>
    %c0_7 = arith.constant 0 : index
    %c3 = arith.constant 3 : index
    %19 = memref.load %arg2[%c0_7, %c3] : memref<4x9xf32, #tpu.memory_space<smem>>
    %20 = vector.broadcast %19 : f32 to vector<14x14xf32>
    %21 = arith.mulf %18, %20 : vector<14x14xf32>
    %22 = arith.addf %17, %21 : vector<14x14xf32>
    %23 = vector.extract_strided_slice %1 {offsets = [1, 1], sizes = [14, 14], strides = [1, 1]} : vector<16x16xf32> to vector<14x14xf32>
    %c0_8 = arith.constant 0 : index
    %c4 = arith.constant 4 : index
    %24 = memref.load %arg2[%c0_8, %c4] : memref<4x9xf32, #tpu.memory_space<smem>>
    %25 = vector.broadcast %24 : f32 to vector<14x14xf32>
    %26 = arith.mulf %23, %25 : vector<14x14xf32>
    %27 = arith.addf %22, %26 : vector<14x14xf32>
    %28 = vector.extract_strided_slice %1 {offsets = [1, 2], sizes = [14, 14], strides = [1, 1]} : vector<16x16xf32> to vector<14x14xf32>
    %c0_9 = arith.constant 0 : index
    %c5 = arith.constant 5 : index
    %29 = memref.load %arg2[%c0_9, %c5] : memref<4x9xf32, #tpu.memory_space<smem>>
    %30 = vector.broadcast %29 : f32 to vector<14x14xf32>
    %31 = arith.mulf %28, %30 : vector<14x14xf32>
    %32 = arith.addf %27, %31 : vector<14x14xf32>
    %33 = vector.extract_strided_slice %1 {offsets = [2, 0], sizes = [14, 14], strides = [1, 1]} : vector<16x16xf32> to vector<14x14xf32>
    %c0_10 = arith.constant 0 : index
    %c6 = arith.constant 6 : index
    %34 = memref.load %arg2[%c0_10, %c6] : memref<4x9xf32, #tpu.memory_space<smem>>
    %35 = vector.broadcast %34 : f32 to vector<14x14xf32>
    %36 = arith.mulf %33, %35 : vector<14x14xf32>
    %37 = arith.addf %32, %36 : vector<14x14xf32>
    %38 = vector.extract_strided_slice %1 {offsets = [2, 1], sizes = [14, 14], strides = [1, 1]} : vector<16x16xf32> to vector<14x14xf32>
    %c0_11 = arith.constant 0 : index
    %c7 = arith.constant 7 : index
    %39 = memref.load %arg2[%c0_11, %c7] : memref<4x9xf32, #tpu.memory_space<smem>>
    %40 = vector.broadcast %39 : f32 to vector<14x14xf32>
    %41 = arith.mulf %38, %40 : vector<14x14xf32>
    %42 = arith.addf %37, %41 : vector<14x14xf32>
    %43 = vector.extract_strided_slice %1 {offsets = [2, 2], sizes = [14, 14], strides = [1, 1]} : vector<16x16xf32> to vector<14x14xf32>
    %c0_12 = arith.constant 0 : index
    %c8 = arith.constant 8 : index
    %44 = memref.load %arg2[%c0_12, %c8] : memref<4x9xf32, #tpu.memory_space<smem>>
    %45 = vector.broadcast %44 : f32 to vector<14x14xf32>
    %46 = arith.mulf %43, %45 : vector<14x14xf32>
    %47 = arith.addf %42, %46 : vector<14x14xf32>
    %c0_13 = arith.constant 0 : index
    %48 = memref.load %arg3[%c0_13] : memref<4xf32, #tpu.memory_space<smem>>
    %49 = vector.broadcast %48 : f32 to vector<14x14xf32>
    %50 = arith.addf %47, %49 : vector<14x14xf32>
    %c0_14 = arith.constant 0 : index
    %c1_15 = arith.constant 1 : index
    %c0_16 = arith.constant 0 : index
    %c0_17 = arith.constant 0 : index
    %51 = vector.load %arg1[%c0_14, %c1_15, %c0_16, %c0_17] : memref<1x4x16x16xf32, #tpu.memory_space<vmem>>, vector<1x1x16x16xf32>
    %52 = vector.shape_cast %51 : vector<1x1x16x16xf32> to vector<16x16xf32>
    %cst_18 = arith.constant 0.000000e+00 : f32
    %53 = vector.broadcast %cst_18 : f32 to vector<14x14xf32>
    %54 = vector.extract_strided_slice %52 {offsets = [0, 0], sizes = [14, 14], strides = [1, 1]} : vector<16x16xf32> to vector<14x14xf32>
    %c1_19 = arith.constant 1 : index
    %c0_20 = arith.constant 0 : index
    %55 = memref.load %arg2[%c1_19, %c0_20] : memref<4x9xf32, #tpu.memory_space<smem>>
    %56 = vector.broadcast %55 : f32 to vector<14x14xf32>
    %57 = arith.mulf %54, %56 : vector<14x14xf32>
    %58 = arith.addf %53, %57 : vector<14x14xf32>
    %59 = vector.extract_strided_slice %52 {offsets = [0, 1], sizes = [14, 14], strides = [1, 1]} : vector<16x16xf32> to vector<14x14xf32>
    %c1_21 = arith.constant 1 : index
    %c1_22 = arith.constant 1 : index
    %60 = memref.load %arg2[%c1_21, %c1_22] : memref<4x9xf32, #tpu.memory_space<smem>>
    %61 = vector.broadcast %60 : f32 to vector<14x14xf32>
    %62 = arith.mulf %59, %61 : vector<14x14xf32>
    %63 = arith.addf %58, %62 : vector<14x14xf32>
    %64 = vector.extract_strided_slice %52 {offsets = [0, 2], sizes = [14, 14], strides = [1, 1]} : vector<16x16xf32> to vector<14x14xf32>
    %c1_23 = arith.constant 1 : index
    %c2_24 = arith.constant 2 : index
    %65 = memref.load %arg2[%c1_23, %c2_24] : memref<4x9xf32, #tpu.memory_space<smem>>
    %66 = vector.broadcast %65 : f32 to vector<14x14xf32>
    %67 = arith.mulf %64, %66 : vector<14x14xf32>
    %68 = arith.addf %63, %67 : vector<14x14xf32>
    %69 = vector.extract_strided_slice %52 {offsets = [1, 0], sizes = [14, 14], strides = [1, 1]} : vector<16x16xf32> to vector<14x14xf32>
    %c1_25 = arith.constant 1 : index
    %c3_26 = arith.constant 3 : index
    %70 = memref.load %arg2[%c1_25, %c3_26] : memref<4x9xf32, #tpu.memory_space<smem>>
    %71 = vector.broadcast %70 : f32 to vector<14x14xf32>
    %72 = arith.mulf %69, %71 : vector<14x14xf32>
    %73 = arith.addf %68, %72 : vector<14x14xf32>
    %74 = vector.extract_strided_slice %52 {offsets = [1, 1], sizes = [14, 14], strides = [1, 1]} : vector<16x16xf32> to vector<14x14xf32>
    %c1_27 = arith.constant 1 : index
    %c4_28 = arith.constant 4 : index
    %75 = memref.load %arg2[%c1_27, %c4_28] : memref<4x9xf32, #tpu.memory_space<smem>>
    %76 = vector.broadcast %75 : f32 to vector<14x14xf32>
    %77 = arith.mulf %74, %76 : vector<14x14xf32>
    %78 = arith.addf %73, %77 : vector<14x14xf32>
    %79 = vector.extract_strided_slice %52 {offsets = [1, 2], sizes = [14, 14], strides = [1, 1]} : vector<16x16xf32> to vector<14x14xf32>
    %c1_29 = arith.constant 1 : index
    %c5_30 = arith.constant 5 : index
    %80 = memref.load %arg2[%c1_29, %c5_30] : memref<4x9xf32, #tpu.memory_space<smem>>
    %81 = vector.broadcast %80 : f32 to vector<14x14xf32>
    %82 = arith.mulf %79, %81 : vector<14x14xf32>
    %83 = arith.addf %78, %82 : vector<14x14xf32>
    %84 = vector.extract_strided_slice %52 {offsets = [2, 0], sizes = [14, 14], strides = [1, 1]} : vector<16x16xf32> to vector<14x14xf32>
    %c1_31 = arith.constant 1 : index
    %c6_32 = arith.constant 6 : index
    %85 = memref.load %arg2[%c1_31, %c6_32] : memref<4x9xf32, #tpu.memory_space<smem>>
    %86 = vector.broadcast %85 : f32 to vector<14x14xf32>
    %87 = arith.mulf %84, %86 : vector<14x14xf32>
    %88 = arith.addf %83, %87 : vector<14x14xf32>
    %89 = vector.extract_strided_slice %52 {offsets = [2, 1], sizes = [14, 14], strides = [1, 1]} : vector<16x16xf32> to vector<14x14xf32>
    %c1_33 = arith.constant 1 : index
    %c7_34 = arith.constant 7 : index
    %90 = memref.load %arg2[%c1_33, %c7_34] : memref<4x9xf32, #tpu.memory_space<smem>>
    %91 = vector.broadcast %90 : f32 to vector<14x14xf32>
    %92 = arith.mulf %89, %91 : vector<14x14xf32>
    %93 = arith.addf %88, %92 : vector<14x14xf32>
    %94 = vector.extract_strided_slice %52 {offsets = [2, 2], sizes = [14, 14], strides = [1, 1]} : vector<16x16xf32> to vector<14x14xf32>
    %c1_35 = arith.constant 1 : index
    %c8_36 = arith.constant 8 : index
    %95 = memref.load %arg2[%c1_35, %c8_36] : memref<4x9xf32, #tpu.memory_space<smem>>
    %96 = vector.broadcast %95 : f32 to vector<14x14xf32>
    %97 = arith.mulf %94, %96 : vector<14x14xf32>
    %98 = arith.addf %93, %97 : vector<14x14xf32>
    %c1_37 = arith.constant 1 : index
    %99 = memref.load %arg3[%c1_37] : memref<4xf32, #tpu.memory_space<smem>>
    %100 = vector.broadcast %99 : f32 to vector<14x14xf32>
    %101 = arith.addf %98, %100 : vector<14x14xf32>
    %c0_38 = arith.constant 0 : index
    %c2_39 = arith.constant 2 : index
    %c0_40 = arith.constant 0 : index
    %c0_41 = arith.constant 0 : index
    %102 = vector.load %arg1[%c0_38, %c2_39, %c0_40, %c0_41] : memref<1x4x16x16xf32, #tpu.memory_space<vmem>>, vector<1x1x16x16xf32>
    %103 = vector.shape_cast %102 : vector<1x1x16x16xf32> to vector<16x16xf32>
    %cst_42 = arith.constant 0.000000e+00 : f32
    %104 = vector.broadcast %cst_42 : f32 to vector<14x14xf32>
    %105 = vector.extract_strided_slice %103 {offsets = [0, 0], sizes = [14, 14], strides = [1, 1]} : vector<16x16xf32> to vector<14x14xf32>
    %c2_43 = arith.constant 2 : index
    %c0_44 = arith.constant 0 : index
    %106 = memref.load %arg2[%c2_43, %c0_44] : memref<4x9xf32, #tpu.memory_space<smem>>
    %107 = vector.broadcast %106 : f32 to vector<14x14xf32>
    %108 = arith.mulf %105, %107 : vector<14x14xf32>
    %109 = arith.addf %104, %108 : vector<14x14xf32>
    %110 = vector.extract_strided_slice %103 {offsets = [0, 1], sizes = [14, 14], strides = [1, 1]} : vector<16x16xf32> to vector<14x14xf32>
    %c2_45 = arith.constant 2 : index
    %c1_46 = arith.constant 1 : index
    %111 = memref.load %arg2[%c2_45, %c1_46] : memref<4x9xf32, #tpu.memory_space<smem>>
    %112 = vector.broadcast %111 : f32 to vector<14x14xf32>
    %113 = arith.mulf %110, %112 : vector<14x14xf32>
    %114 = arith.addf %109, %113 : vector<14x14xf32>
    %115 = vector.extract_strided_slice %103 {offsets = [0, 2], sizes = [14, 14], strides = [1, 1]} : vector<16x16xf32> to vector<14x14xf32>
    %c2_47 = arith.constant 2 : index
    %c2_48 = arith.constant 2 : index
    %116 = memref.load %arg2[%c2_47, %c2_48] : memref<4x9xf32, #tpu.memory_space<smem>>
    %117 = vector.broadcast %116 : f32 to vector<14x14xf32>
    %118 = arith.mulf %115, %117 : vector<14x14xf32>
    %119 = arith.addf %114, %118 : vector<14x14xf32>
    %120 = vector.extract_strided_slice %103 {offsets = [1, 0], sizes = [14, 14], strides = [1, 1]} : vector<16x16xf32> to vector<14x14xf32>
    %c2_49 = arith.constant 2 : index
    %c3_50 = arith.constant 3 : index
    %121 = memref.load %arg2[%c2_49, %c3_50] : memref<4x9xf32, #tpu.memory_space<smem>>
    %122 = vector.broadcast %121 : f32 to vector<14x14xf32>
    %123 = arith.mulf %120, %122 : vector<14x14xf32>
    %124 = arith.addf %119, %123 : vector<14x14xf32>
    %125 = vector.extract_strided_slice %103 {offsets = [1, 1], sizes = [14, 14], strides = [1, 1]} : vector<16x16xf32> to vector<14x14xf32>
    %c2_51 = arith.constant 2 : index
    %c4_52 = arith.constant 4 : index
    %126 = memref.load %arg2[%c2_51, %c4_52] : memref<4x9xf32, #tpu.memory_space<smem>>
    %127 = vector.broadcast %126 : f32 to vector<14x14xf32>
    %128 = arith.mulf %125, %127 : vector<14x14xf32>
    %129 = arith.addf %124, %128 : vector<14x14xf32>
    %130 = vector.extract_strided_slice %103 {offsets = [1, 2], sizes = [14, 14], strides = [1, 1]} : vector<16x16xf32> to vector<14x14xf32>
    %c2_53 = arith.constant 2 : index
    %c5_54 = arith.constant 5 : index
    %131 = memref.load %arg2[%c2_53, %c5_54] : memref<4x9xf32, #tpu.memory_space<smem>>
    %132 = vector.broadcast %131 : f32 to vector<14x14xf32>
    %133 = arith.mulf %130, %132 : vector<14x14xf32>
    %134 = arith.addf %129, %133 : vector<14x14xf32>
    %135 = vector.extract_strided_slice %103 {offsets = [2, 0], sizes = [14, 14], strides = [1, 1]} : vector<16x16xf32> to vector<14x14xf32>
    %c2_55 = arith.constant 2 : index
    %c6_56 = arith.constant 6 : index
    %136 = memref.load %arg2[%c2_55, %c6_56] : memref<4x9xf32, #tpu.memory_space<smem>>
    %137 = vector.broadcast %136 : f32 to vector<14x14xf32>
    %138 = arith.mulf %135, %137 : vector<14x14xf32>
    %139 = arith.addf %134, %138 : vector<14x14xf32>
    %140 = vector.extract_strided_slice %103 {offsets = [2, 1], sizes = [14, 14], strides = [1, 1]} : vector<16x16xf32> to vector<14x14xf32>
    %c2_57 = arith.constant 2 : index
    %c7_58 = arith.constant 7 : index
    %141 = memref.load %arg2[%c2_57, %c7_58] : memref<4x9xf32, #tpu.memory_space<smem>>
    %142 = vector.broadcast %141 : f32 to vector<14x14xf32>
    %143 = arith.mulf %140, %142 : vector<14x14xf32>
    %144 = arith.addf %139, %143 : vector<14x14xf32>
    %145 = vector.extract_strided_slice %103 {offsets = [2, 2], sizes = [14, 14], strides = [1, 1]} : vector<16x16xf32> to vector<14x14xf32>
    %c2_59 = arith.constant 2 : index
    %c8_60 = arith.constant 8 : index
    %146 = memref.load %arg2[%c2_59, %c8_60] : memref<4x9xf32, #tpu.memory_space<smem>>
    %147 = vector.broadcast %146 : f32 to vector<14x14xf32>
    %148 = arith.mulf %145, %147 : vector<14x14xf32>
    %149 = arith.addf %144, %148 : vector<14x14xf32>
    %c2_61 = arith.constant 2 : index
    %150 = memref.load %arg3[%c2_61] : memref<4xf32, #tpu.memory_space<smem>>
    %151 = vector.broadcast %150 : f32 to vector<14x14xf32>
    %152 = arith.addf %149, %151 : vector<14x14xf32>
    %c0_62 = arith.constant 0 : index
    %c3_63 = arith.constant 3 : index
    %c0_64 = arith.constant 0 : index
    %c0_65 = arith.constant 0 : index
    %153 = vector.load %arg1[%c0_62, %c3_63, %c0_64, %c0_65] : memref<1x4x16x16xf32, #tpu.memory_space<vmem>>, vector<1x1x16x16xf32>
    %154 = vector.shape_cast %153 : vector<1x1x16x16xf32> to vector<16x16xf32>
    %cst_66 = arith.constant 0.000000e+00 : f32
    %155 = vector.broadcast %cst_66 : f32 to vector<14x14xf32>
    %156 = vector.extract_strided_slice %154 {offsets = [0, 0], sizes = [14, 14], strides = [1, 1]} : vector<16x16xf32> to vector<14x14xf32>
    %c3_67 = arith.constant 3 : index
    %c0_68 = arith.constant 0 : index
    %157 = memref.load %arg2[%c3_67, %c0_68] : memref<4x9xf32, #tpu.memory_space<smem>>
    %158 = vector.broadcast %157 : f32 to vector<14x14xf32>
    %159 = arith.mulf %156, %158 : vector<14x14xf32>
    %160 = arith.addf %155, %159 : vector<14x14xf32>
    %161 = vector.extract_strided_slice %154 {offsets = [0, 1], sizes = [14, 14], strides = [1, 1]} : vector<16x16xf32> to vector<14x14xf32>
    %c3_69 = arith.constant 3 : index
    %c1_70 = arith.constant 1 : index
    %162 = memref.load %arg2[%c3_69, %c1_70] : memref<4x9xf32, #tpu.memory_space<smem>>
    %163 = vector.broadcast %162 : f32 to vector<14x14xf32>
    %164 = arith.mulf %161, %163 : vector<14x14xf32>
    %165 = arith.addf %160, %164 : vector<14x14xf32>
    %166 = vector.extract_strided_slice %154 {offsets = [0, 2], sizes = [14, 14], strides = [1, 1]} : vector<16x16xf32> to vector<14x14xf32>
    %c3_71 = arith.constant 3 : index
    %c2_72 = arith.constant 2 : index
    %167 = memref.load %arg2[%c3_71, %c2_72] : memref<4x9xf32, #tpu.memory_space<smem>>
    %168 = vector.broadcast %167 : f32 to vector<14x14xf32>
    %169 = arith.mulf %166, %168 : vector<14x14xf32>
    %170 = arith.addf %165, %169 : vector<14x14xf32>
    %171 = vector.extract_strided_slice %154 {offsets = [1, 0], sizes = [14, 14], strides = [1, 1]} : vector<16x16xf32> to vector<14x14xf32>
    %c3_73 = arith.constant 3 : index
    %c3_74 = arith.constant 3 : index
    %172 = memref.load %arg2[%c3_73, %c3_74] : memref<4x9xf32, #tpu.memory_space<smem>>
    %173 = vector.broadcast %172 : f32 to vector<14x14xf32>
    %174 = arith.mulf %171, %173 : vector<14x14xf32>
    %175 = arith.addf %170, %174 : vector<14x14xf32>
    %176 = vector.extract_strided_slice %154 {offsets = [1, 1], sizes = [14, 14], strides = [1, 1]} : vector<16x16xf32> to vector<14x14xf32>
    %c3_75 = arith.constant 3 : index
    %c4_76 = arith.constant 4 : index
    %177 = memref.load %arg2[%c3_75, %c4_76] : memref<4x9xf32, #tpu.memory_space<smem>>
    %178 = vector.broadcast %177 : f32 to vector<14x14xf32>
    %179 = arith.mulf %176, %178 : vector<14x14xf32>
    %180 = arith.addf %175, %179 : vector<14x14xf32>
    %181 = vector.extract_strided_slice %154 {offsets = [1, 2], sizes = [14, 14], strides = [1, 1]} : vector<16x16xf32> to vector<14x14xf32>
    %c3_77 = arith.constant 3 : index
    %c5_78 = arith.constant 5 : index
    %182 = memref.load %arg2[%c3_77, %c5_78] : memref<4x9xf32, #tpu.memory_space<smem>>
    %183 = vector.broadcast %182 : f32 to vector<14x14xf32>
    %184 = arith.mulf %181, %183 : vector<14x14xf32>
    %185 = arith.addf %180, %184 : vector<14x14xf32>
    %186 = vector.extract_strided_slice %154 {offsets = [2, 0], sizes = [14, 14], strides = [1, 1]} : vector<16x16xf32> to vector<14x14xf32>
    %c3_79 = arith.constant 3 : index
    %c6_80 = arith.constant 6 : index
    %187 = memref.load %arg2[%c3_79, %c6_80] : memref<4x9xf32, #tpu.memory_space<smem>>
    %188 = vector.broadcast %187 : f32 to vector<14x14xf32>
    %189 = arith.mulf %186, %188 : vector<14x14xf32>
    %190 = arith.addf %185, %189 : vector<14x14xf32>
    %191 = vector.extract_strided_slice %154 {offsets = [2, 1], sizes = [14, 14], strides = [1, 1]} : vector<16x16xf32> to vector<14x14xf32>
    %c3_81 = arith.constant 3 : index
    %c7_82 = arith.constant 7 : index
    %192 = memref.load %arg2[%c3_81, %c7_82] : memref<4x9xf32, #tpu.memory_space<smem>>
    %193 = vector.broadcast %192 : f32 to vector<14x14xf32>
    %194 = arith.mulf %191, %193 : vector<14x14xf32>
    %195 = arith.addf %190, %194 : vector<14x14xf32>
    %196 = vector.extract_strided_slice %154 {offsets = [2, 2], sizes = [14, 14], strides = [1, 1]} : vector<16x16xf32> to vector<14x14xf32>
    %c3_83 = arith.constant 3 : index
    %c8_84 = arith.constant 8 : index
    %197 = memref.load %arg2[%c3_83, %c8_84] : memref<4x9xf32, #tpu.memory_space<smem>>
    %198 = vector.broadcast %197 : f32 to vector<14x14xf32>
    %199 = arith.mulf %196, %198 : vector<14x14xf32>
    %200 = arith.addf %195, %199 : vector<14x14xf32>
    %c3_85 = arith.constant 3 : index
    %201 = memref.load %arg3[%c3_85] : memref<4xf32, #tpu.memory_space<smem>>
    %202 = vector.broadcast %201 : f32 to vector<14x14xf32>
    %203 = arith.addf %200, %202 : vector<14x14xf32>
    %c0_86 = arith.constant 0 : index
    %c0_87 = arith.constant 0 : index
    %204 = memref.load %arg4[%c0_86, %c0_87] : memref<8x4xf32, #tpu.memory_space<smem>>
    %205 = vector.broadcast %204 : f32 to vector<14x14xf32>
    %206 = arith.mulf %50, %205 : vector<14x14xf32>
    %c0_88 = arith.constant 0 : index
    %c1_89 = arith.constant 1 : index
    %207 = memref.load %arg4[%c0_88, %c1_89] : memref<8x4xf32, #tpu.memory_space<smem>>
    %208 = vector.broadcast %207 : f32 to vector<14x14xf32>
    %209 = arith.mulf %101, %208 : vector<14x14xf32>
    %210 = arith.addf %206, %209 : vector<14x14xf32>
    %c0_90 = arith.constant 0 : index
    %c2_91 = arith.constant 2 : index
    %211 = memref.load %arg4[%c0_90, %c2_91] : memref<8x4xf32, #tpu.memory_space<smem>>
    %212 = vector.broadcast %211 : f32 to vector<14x14xf32>
    %213 = arith.mulf %152, %212 : vector<14x14xf32>
    %214 = arith.addf %210, %213 : vector<14x14xf32>
    %c0_92 = arith.constant 0 : index
    %c3_93 = arith.constant 3 : index
    %215 = memref.load %arg4[%c0_92, %c3_93] : memref<8x4xf32, #tpu.memory_space<smem>>
    %216 = vector.broadcast %215 : f32 to vector<14x14xf32>
    %217 = arith.mulf %203, %216 : vector<14x14xf32>
    %218 = arith.addf %214, %217 : vector<14x14xf32>
    %c0_94 = arith.constant 0 : index
    %219 = memref.load %arg5[%c0_94] : memref<8xf32, #tpu.memory_space<smem>>
    %220 = vector.broadcast %219 : f32 to vector<14x14xf32>
    %221 = arith.addf %218, %220 : vector<14x14xf32>
    %c1_95 = arith.constant 1 : index
    %c0_96 = arith.constant 0 : index
    %222 = memref.load %arg4[%c1_95, %c0_96] : memref<8x4xf32, #tpu.memory_space<smem>>
    %223 = vector.broadcast %222 : f32 to vector<14x14xf32>
    %224 = arith.mulf %50, %223 : vector<14x14xf32>
    %c1_97 = arith.constant 1 : index
    %c1_98 = arith.constant 1 : index
    %225 = memref.load %arg4[%c1_97, %c1_98] : memref<8x4xf32, #tpu.memory_space<smem>>
    %226 = vector.broadcast %225 : f32 to vector<14x14xf32>
    %227 = arith.mulf %101, %226 : vector<14x14xf32>
    %228 = arith.addf %224, %227 : vector<14x14xf32>
    %c1_99 = arith.constant 1 : index
    %c2_100 = arith.constant 2 : index
    %229 = memref.load %arg4[%c1_99, %c2_100] : memref<8x4xf32, #tpu.memory_space<smem>>
    %230 = vector.broadcast %229 : f32 to vector<14x14xf32>
    %231 = arith.mulf %152, %230 : vector<14x14xf32>
    %232 = arith.addf %228, %231 : vector<14x14xf32>
    %c1_101 = arith.constant 1 : index
    %c3_102 = arith.constant 3 : index
    %233 = memref.load %arg4[%c1_101, %c3_102] : memref<8x4xf32, #tpu.memory_space<smem>>
    %234 = vector.broadcast %233 : f32 to vector<14x14xf32>
    %235 = arith.mulf %203, %234 : vector<14x14xf32>
    %236 = arith.addf %232, %235 : vector<14x14xf32>
    %c1_103 = arith.constant 1 : index
    %237 = memref.load %arg5[%c1_103] : memref<8xf32, #tpu.memory_space<smem>>
    %238 = vector.broadcast %237 : f32 to vector<14x14xf32>
    %239 = arith.addf %236, %238 : vector<14x14xf32>
    %c2_104 = arith.constant 2 : index
    %c0_105 = arith.constant 0 : index
    %240 = memref.load %arg4[%c2_104, %c0_105] : memref<8x4xf32, #tpu.memory_space<smem>>
    %241 = vector.broadcast %240 : f32 to vector<14x14xf32>
    %242 = arith.mulf %50, %241 : vector<14x14xf32>
    %c2_106 = arith.constant 2 : index
    %c1_107 = arith.constant 1 : index
    %243 = memref.load %arg4[%c2_106, %c1_107] : memref<8x4xf32, #tpu.memory_space<smem>>
    %244 = vector.broadcast %243 : f32 to vector<14x14xf32>
    %245 = arith.mulf %101, %244 : vector<14x14xf32>
    %246 = arith.addf %242, %245 : vector<14x14xf32>
    %c2_108 = arith.constant 2 : index
    %c2_109 = arith.constant 2 : index
    %247 = memref.load %arg4[%c2_108, %c2_109] : memref<8x4xf32, #tpu.memory_space<smem>>
    %248 = vector.broadcast %247 : f32 to vector<14x14xf32>
    %249 = arith.mulf %152, %248 : vector<14x14xf32>
    %250 = arith.addf %246, %249 : vector<14x14xf32>
    %c2_110 = arith.constant 2 : index
    %c3_111 = arith.constant 3 : index
    %251 = memref.load %arg4[%c2_110, %c3_111] : memref<8x4xf32, #tpu.memory_space<smem>>
    %252 = vector.broadcast %251 : f32 to vector<14x14xf32>
    %253 = arith.mulf %203, %252 : vector<14x14xf32>
    %254 = arith.addf %250, %253 : vector<14x14xf32>
    %c2_112 = arith.constant 2 : index
    %255 = memref.load %arg5[%c2_112] : memref<8xf32, #tpu.memory_space<smem>>
    %256 = vector.broadcast %255 : f32 to vector<14x14xf32>
    %257 = arith.addf %254, %256 : vector<14x14xf32>
    %c3_113 = arith.constant 3 : index
    %c0_114 = arith.constant 0 : index
    %258 = memref.load %arg4[%c3_113, %c0_114] : memref<8x4xf32, #tpu.memory_space<smem>>
    %259 = vector.broadcast %258 : f32 to vector<14x14xf32>
    %260 = arith.mulf %50, %259 : vector<14x14xf32>
    %c3_115 = arith.constant 3 : index
    %c1_116 = arith.constant 1 : index
    %261 = memref.load %arg4[%c3_115, %c1_116] : memref<8x4xf32, #tpu.memory_space<smem>>
    %262 = vector.broadcast %261 : f32 to vector<14x14xf32>
    %263 = arith.mulf %101, %262 : vector<14x14xf32>
    %264 = arith.addf %260, %263 : vector<14x14xf32>
    %c3_117 = arith.constant 3 : index
    %c2_118 = arith.constant 2 : index
    %265 = memref.load %arg4[%c3_117, %c2_118] : memref<8x4xf32, #tpu.memory_space<smem>>
    %266 = vector.broadcast %265 : f32 to vector<14x14xf32>
    %267 = arith.mulf %152, %266 : vector<14x14xf32>
    %268 = arith.addf %264, %267 : vector<14x14xf32>
    %c3_119 = arith.constant 3 : index
    %c3_120 = arith.constant 3 : index
    %269 = memref.load %arg4[%c3_119, %c3_120] : memref<8x4xf32, #tpu.memory_space<smem>>
    %270 = vector.broadcast %269 : f32 to vector<14x14xf32>
    %271 = arith.mulf %203, %270 : vector<14x14xf32>
    %272 = arith.addf %268, %271 : vector<14x14xf32>
    %c3_121 = arith.constant 3 : index
    %273 = memref.load %arg5[%c3_121] : memref<8xf32, #tpu.memory_space<smem>>
    %274 = vector.broadcast %273 : f32 to vector<14x14xf32>
    %275 = arith.addf %272, %274 : vector<14x14xf32>
    %c4_122 = arith.constant 4 : index
    %c0_123 = arith.constant 0 : index
    %276 = memref.load %arg4[%c4_122, %c0_123] : memref<8x4xf32, #tpu.memory_space<smem>>
    %277 = vector.broadcast %276 : f32 to vector<14x14xf32>
    %278 = arith.mulf %50, %277 : vector<14x14xf32>
    %c4_124 = arith.constant 4 : index
    %c1_125 = arith.constant 1 : index
    %279 = memref.load %arg4[%c4_124, %c1_125] : memref<8x4xf32, #tpu.memory_space<smem>>
    %280 = vector.broadcast %279 : f32 to vector<14x14xf32>
    %281 = arith.mulf %101, %280 : vector<14x14xf32>
    %282 = arith.addf %278, %281 : vector<14x14xf32>
    %c4_126 = arith.constant 4 : index
    %c2_127 = arith.constant 2 : index
    %283 = memref.load %arg4[%c4_126, %c2_127] : memref<8x4xf32, #tpu.memory_space<smem>>
    %284 = vector.broadcast %283 : f32 to vector<14x14xf32>
    %285 = arith.mulf %152, %284 : vector<14x14xf32>
    %286 = arith.addf %282, %285 : vector<14x14xf32>
    %c4_128 = arith.constant 4 : index
    %c3_129 = arith.constant 3 : index
    %287 = memref.load %arg4[%c4_128, %c3_129] : memref<8x4xf32, #tpu.memory_space<smem>>
    %288 = vector.broadcast %287 : f32 to vector<14x14xf32>
    %289 = arith.mulf %203, %288 : vector<14x14xf32>
    %290 = arith.addf %286, %289 : vector<14x14xf32>
    %c4_130 = arith.constant 4 : index
    %291 = memref.load %arg5[%c4_130] : memref<8xf32, #tpu.memory_space<smem>>
    %292 = vector.broadcast %291 : f32 to vector<14x14xf32>
    %293 = arith.addf %290, %292 : vector<14x14xf32>
    %c5_131 = arith.constant 5 : index
    %c0_132 = arith.constant 0 : index
    %294 = memref.load %arg4[%c5_131, %c0_132] : memref<8x4xf32, #tpu.memory_space<smem>>
    %295 = vector.broadcast %294 : f32 to vector<14x14xf32>
    %296 = arith.mulf %50, %295 : vector<14x14xf32>
    %c5_133 = arith.constant 5 : index
    %c1_134 = arith.constant 1 : index
    %297 = memref.load %arg4[%c5_133, %c1_134] : memref<8x4xf32, #tpu.memory_space<smem>>
    %298 = vector.broadcast %297 : f32 to vector<14x14xf32>
    %299 = arith.mulf %101, %298 : vector<14x14xf32>
    %300 = arith.addf %296, %299 : vector<14x14xf32>
    %c5_135 = arith.constant 5 : index
    %c2_136 = arith.constant 2 : index
    %301 = memref.load %arg4[%c5_135, %c2_136] : memref<8x4xf32, #tpu.memory_space<smem>>
    %302 = vector.broadcast %301 : f32 to vector<14x14xf32>
    %303 = arith.mulf %152, %302 : vector<14x14xf32>
    %304 = arith.addf %300, %303 : vector<14x14xf32>
    %c5_137 = arith.constant 5 : index
    %c3_138 = arith.constant 3 : index
    %305 = memref.load %arg4[%c5_137, %c3_138] : memref<8x4xf32, #tpu.memory_space<smem>>
    %306 = vector.broadcast %305 : f32 to vector<14x14xf32>
    %307 = arith.mulf %203, %306 : vector<14x14xf32>
    %308 = arith.addf %304, %307 : vector<14x14xf32>
    %c5_139 = arith.constant 5 : index
    %309 = memref.load %arg5[%c5_139] : memref<8xf32, #tpu.memory_space<smem>>
    %310 = vector.broadcast %309 : f32 to vector<14x14xf32>
    %311 = arith.addf %308, %310 : vector<14x14xf32>
    %c6_140 = arith.constant 6 : index
    %c0_141 = arith.constant 0 : index
    %312 = memref.load %arg4[%c6_140, %c0_141] : memref<8x4xf32, #tpu.memory_space<smem>>
    %313 = vector.broadcast %312 : f32 to vector<14x14xf32>
    %314 = arith.mulf %50, %313 : vector<14x14xf32>
    %c6_142 = arith.constant 6 : index
    %c1_143 = arith.constant 1 : index
    %315 = memref.load %arg4[%c6_142, %c1_143] : memref<8x4xf32, #tpu.memory_space<smem>>
    %316 = vector.broadcast %315 : f32 to vector<14x14xf32>
    %317 = arith.mulf %101, %316 : vector<14x14xf32>
    %318 = arith.addf %314, %317 : vector<14x14xf32>
    %c6_144 = arith.constant 6 : index
    %c2_145 = arith.constant 2 : index
    %319 = memref.load %arg4[%c6_144, %c2_145] : memref<8x4xf32, #tpu.memory_space<smem>>
    %320 = vector.broadcast %319 : f32 to vector<14x14xf32>
    %321 = arith.mulf %152, %320 : vector<14x14xf32>
    %322 = arith.addf %318, %321 : vector<14x14xf32>
    %c6_146 = arith.constant 6 : index
    %c3_147 = arith.constant 3 : index
    %323 = memref.load %arg4[%c6_146, %c3_147] : memref<8x4xf32, #tpu.memory_space<smem>>
    %324 = vector.broadcast %323 : f32 to vector<14x14xf32>
    %325 = arith.mulf %203, %324 : vector<14x14xf32>
    %326 = arith.addf %322, %325 : vector<14x14xf32>
    %c6_148 = arith.constant 6 : index
    %327 = memref.load %arg5[%c6_148] : memref<8xf32, #tpu.memory_space<smem>>
    %328 = vector.broadcast %327 : f32 to vector<14x14xf32>
    %329 = arith.addf %326, %328 : vector<14x14xf32>
    %c7_149 = arith.constant 7 : index
    %c0_150 = arith.constant 0 : index
    %330 = memref.load %arg4[%c7_149, %c0_150] : memref<8x4xf32, #tpu.memory_space<smem>>
    %331 = vector.broadcast %330 : f32 to vector<14x14xf32>
    %332 = arith.mulf %50, %331 : vector<14x14xf32>
    %c7_151 = arith.constant 7 : index
    %c1_152 = arith.constant 1 : index
    %333 = memref.load %arg4[%c7_151, %c1_152] : memref<8x4xf32, #tpu.memory_space<smem>>
    %334 = vector.broadcast %333 : f32 to vector<14x14xf32>
    %335 = arith.mulf %101, %334 : vector<14x14xf32>
    %336 = arith.addf %332, %335 : vector<14x14xf32>
    %c7_153 = arith.constant 7 : index
    %c2_154 = arith.constant 2 : index
    %337 = memref.load %arg4[%c7_153, %c2_154] : memref<8x4xf32, #tpu.memory_space<smem>>
    %338 = vector.broadcast %337 : f32 to vector<14x14xf32>
    %339 = arith.mulf %152, %338 : vector<14x14xf32>
    %340 = arith.addf %336, %339 : vector<14x14xf32>
    %c7_155 = arith.constant 7 : index
    %c3_156 = arith.constant 3 : index
    %341 = memref.load %arg4[%c7_155, %c3_156] : memref<8x4xf32, #tpu.memory_space<smem>>
    %342 = vector.broadcast %341 : f32 to vector<14x14xf32>
    %343 = arith.mulf %203, %342 : vector<14x14xf32>
    %344 = arith.addf %340, %343 : vector<14x14xf32>
    %c7_157 = arith.constant 7 : index
    %345 = memref.load %arg5[%c7_157] : memref<8xf32, #tpu.memory_space<smem>>
    %346 = vector.broadcast %345 : f32 to vector<14x14xf32>
    %347 = arith.addf %344, %346 : vector<14x14xf32>
    %cst_158 = arith.constant dense<0.000000e+00> : vector<14xf32>
    %348 = vector.multi_reduction <add>, %221, %cst_158 [0] : vector<14x14xf32> to vector<14xf32>
    %349 = vector.shape_cast %348 : vector<14xf32> to vector<1x14xf32>
    %cst_159 = arith.constant dense<0.000000e+00> : vector<1xf32>
    %350 = vector.multi_reduction <add>, %349, %cst_159 [1] : vector<1x14xf32> to vector<1xf32>
    %351 = vector.shape_cast %350 : vector<1xf32> to vector<1x1xf32>
    %cst_160 = arith.constant 0.00510204071 : f32
    %352 = vector.broadcast %cst_160 : f32 to vector<1x1xf32>
    %353 = arith.mulf %351, %352 : vector<1x1xf32>
    %354 = vector.broadcast %353 : vector<1x1xf32> to vector<14x14xf32>
    %355 = arith.subf %221, %354 : vector<14x14xf32>
    %c0_161 = arith.constant 0 : index
    %c0_162 = arith.constant 0 : index
    %c0_163 = arith.constant 0 : index
    %356 = vector.load %arg6[%c0_161, %c0_162, %c0_163] : memref<1x8x14xf32, #tpu.memory_space<vmem>>, vector<1x1x14xf32>
    %357 = vector.shape_cast %356 : vector<1x1x14xf32> to vector<1x14xf32>
    %358 = vector.shape_cast %349 : vector<1x14xf32> to vector<1x1x14xf32>
    tpu.vector_store %arg6[%c0_161, %c0_162, %c0_163], %358 {strides = array<i32>} : memref<1x8x14xf32, #tpu.memory_space<vmem>>, vector<1x1x14xf32>,
    %359 = arith.mulf %355, %355 : vector<14x14xf32>
    %cst_164 = arith.constant dense<0.000000e+00> : vector<14xf32>
    %360 = vector.multi_reduction <add>, %359, %cst_164 [0] : vector<14x14xf32> to vector<14xf32>
    %361 = vector.shape_cast %360 : vector<14xf32> to vector<1x14xf32>
    %c0_165 = arith.constant 0 : index
    %c0_166 = arith.constant 0 : index
    %c0_167 = arith.constant 0 : index
    %362 = vector.load %arg7[%c0_165, %c0_166, %c0_167] : memref<1x8x14xf32, #tpu.memory_space<vmem>>, vector<1x1x14xf32>
    %363 = vector.shape_cast %362 : vector<1x1x14xf32> to vector<1x14xf32>
    %364 = vector.shape_cast %361 : vector<1x14xf32> to vector<1x1x14xf32>
    tpu.vector_store %arg7[%c0_165, %c0_166, %c0_167], %364 {strides = array<i32>} : memref<1x8x14xf32, #tpu.memory_space<vmem>>, vector<1x1x14xf32>,
    %cst_168 = arith.constant dense<0.000000e+00> : vector<14xf32>
    %365 = vector.multi_reduction <add>, %239, %cst_168 [0] : vector<14x14xf32> to vector<14xf32>
    %366 = vector.shape_cast %365 : vector<14xf32> to vector<1x14xf32>
    %cst_169 = arith.constant dense<0.000000e+00> : vector<1xf32>
    %367 = vector.multi_reduction <add>, %366, %cst_169 [1] : vector<1x14xf32> to vector<1xf32>
    %368 = vector.shape_cast %367 : vector<1xf32> to vector<1x1xf32>
    %cst_170 = arith.constant 0.00510204071 : f32
    %369 = vector.broadcast %cst_170 : f32 to vector<1x1xf32>
    %370 = arith.mulf %368, %369 : vector<1x1xf32>
    %371 = vector.broadcast %370 : vector<1x1xf32> to vector<14x14xf32>
    %372 = arith.subf %239, %371 : vector<14x14xf32>
    %c0_171 = arith.constant 0 : index
    %c1_172 = arith.constant 1 : index
    %c0_173 = arith.constant 0 : index
    %373 = vector.load %arg6[%c0_171, %c1_172, %c0_173] : memref<1x8x14xf32, #tpu.memory_space<vmem>>, vector<1x1x14xf32>
    %374 = vector.shape_cast %373 : vector<1x1x14xf32> to vector<1x14xf32>
    %375 = vector.shape_cast %366 : vector<1x14xf32> to vector<1x1x14xf32>
    tpu.vector_store %arg6[%c0_171, %c1_172, %c0_173], %375 {strides = array<i32>} : memref<1x8x14xf32, #tpu.memory_space<vmem>>, vector<1x1x14xf32>,
    %376 = arith.mulf %372, %372 : vector<14x14xf32>
    %cst_174 = arith.constant dense<0.000000e+00> : vector<14xf32>
    %377 = vector.multi_reduction <add>, %376, %cst_174 [0] : vector<14x14xf32> to vector<14xf32>
    %378 = vector.shape_cast %377 : vector<14xf32> to vector<1x14xf32>
    %c0_175 = arith.constant 0 : index
    %c1_176 = arith.constant 1 : index
    %c0_177 = arith.constant 0 : index
    %379 = vector.load %arg7[%c0_175, %c1_176, %c0_177] : memref<1x8x14xf32, #tpu.memory_space<vmem>>, vector<1x1x14xf32>
    %380 = vector.shape_cast %379 : vector<1x1x14xf32> to vector<1x14xf32>
    %381 = vector.shape_cast %378 : vector<1x14xf32> to vector<1x1x14xf32>
    tpu.vector_store %arg7[%c0_175, %c1_176, %c0_177], %381 {strides = array<i32>} : memref<1x8x14xf32, #tpu.memory_space<vmem>>, vector<1x1x14xf32>,
    %cst_178 = arith.constant dense<0.000000e+00> : vector<14xf32>
    %382 = vector.multi_reduction <add>, %257, %cst_178 [0] : vector<14x14xf32> to vector<14xf32>
    %383 = vector.shape_cast %382 : vector<14xf32> to vector<1x14xf32>
    %cst_179 = arith.constant dense<0.000000e+00> : vector<1xf32>
    %384 = vector.multi_reduction <add>, %383, %cst_179 [1] : vector<1x14xf32> to vector<1xf32>
    %385 = vector.shape_cast %384 : vector<1xf32> to vector<1x1xf32>
    %cst_180 = arith.constant 0.00510204071 : f32
    %386 = vector.broadcast %cst_180 : f32 to vector<1x1xf32>
    %387 = arith.mulf %385, %386 : vector<1x1xf32>
    %388 = vector.broadcast %387 : vector<1x1xf32> to vector<14x14xf32>
    %389 = arith.subf %257, %388 : vector<14x14xf32>
    %c0_181 = arith.constant 0 : index
    %c2_182 = arith.constant 2 : index
    %c0_183 = arith.constant 0 : index
    %390 = vector.load %arg6[%c0_181, %c2_182, %c0_183] : memref<1x8x14xf32, #tpu.memory_space<vmem>>, vector<1x1x14xf32>
    %391 = vector.shape_cast %390 : vector<1x1x14xf32> to vector<1x14xf32>
    %392 = vector.shape_cast %383 : vector<1x14xf32> to vector<1x1x14xf32>
    tpu.vector_store %arg6[%c0_181, %c2_182, %c0_183], %392 {strides = array<i32>} : memref<1x8x14xf32, #tpu.memory_space<vmem>>, vector<1x1x14xf32>,
    %393 = arith.mulf %389, %389 : vector<14x14xf32>
    %cst_184 = arith.constant dense<0.000000e+00> : vector<14xf32>
    %394 = vector.multi_reduction <add>, %393, %cst_184 [0] : vector<14x14xf32> to vector<14xf32>
    %395 = vector.shape_cast %394 : vector<14xf32> to vector<1x14xf32>
    %c0_185 = arith.constant 0 : index
    %c2_186 = arith.constant 2 : index
    %c0_187 = arith.constant 0 : index
    %396 = vector.load %arg7[%c0_185, %c2_186, %c0_187] : memref<1x8x14xf32, #tpu.memory_space<vmem>>, vector<1x1x14xf32>
    %397 = vector.shape_cast %396 : vector<1x1x14xf32> to vector<1x14xf32>
    %398 = vector.shape_cast %395 : vector<1x14xf32> to vector<1x1x14xf32>
    tpu.vector_store %arg7[%c0_185, %c2_186, %c0_187], %398 {strides = array<i32>} : memref<1x8x14xf32, #tpu.memory_space<vmem>>, vector<1x1x14xf32>,
    %cst_188 = arith.constant dense<0.000000e+00> : vector<14xf32>
    %399 = vector.multi_reduction <add>, %275, %cst_188 [0] : vector<14x14xf32> to vector<14xf32>
    %400 = vector.shape_cast %399 : vector<14xf32> to vector<1x14xf32>
    %cst_189 = arith.constant dense<0.000000e+00> : vector<1xf32>
    %401 = vector.multi_reduction <add>, %400, %cst_189 [1] : vector<1x14xf32> to vector<1xf32>
    %402 = vector.shape_cast %401 : vector<1xf32> to vector<1x1xf32>
    %cst_190 = arith.constant 0.00510204071 : f32
    %403 = vector.broadcast %cst_190 : f32 to vector<1x1xf32>
    %404 = arith.mulf %402, %403 : vector<1x1xf32>
    %405 = vector.broadcast %404 : vector<1x1xf32> to vector<14x14xf32>
    %406 = arith.subf %275, %405 : vector<14x14xf32>
    %c0_191 = arith.constant 0 : index
    %c3_192 = arith.constant 3 : index
    %c0_193 = arith.constant 0 : index
    %407 = vector.load %arg6[%c0_191, %c3_192, %c0_193] : memref<1x8x14xf32, #tpu.memory_space<vmem>>, vector<1x1x14xf32>
    %408 = vector.shape_cast %407 : vector<1x1x14xf32> to vector<1x14xf32>
    %409 = vector.shape_cast %400 : vector<1x14xf32> to vector<1x1x14xf32>
    tpu.vector_store %arg6[%c0_191, %c3_192, %c0_193], %409 {strides = array<i32>} : memref<1x8x14xf32, #tpu.memory_space<vmem>>, vector<1x1x14xf32>,
    %410 = arith.mulf %406, %406 : vector<14x14xf32>
    %cst_194 = arith.constant dense<0.000000e+00> : vector<14xf32>
    %411 = vector.multi_reduction <add>, %410, %cst_194 [0] : vector<14x14xf32> to vector<14xf32>
    %412 = vector.shape_cast %411 : vector<14xf32> to vector<1x14xf32>
    %c0_195 = arith.constant 0 : index
    %c3_196 = arith.constant 3 : index
    %c0_197 = arith.constant 0 : index
    %413 = vector.load %arg7[%c0_195, %c3_196, %c0_197] : memref<1x8x14xf32, #tpu.memory_space<vmem>>, vector<1x1x14xf32>
    %414 = vector.shape_cast %413 : vector<1x1x14xf32> to vector<1x14xf32>
    %415 = vector.shape_cast %412 : vector<1x14xf32> to vector<1x1x14xf32>
    tpu.vector_store %arg7[%c0_195, %c3_196, %c0_197], %415 {strides = array<i32>} : memref<1x8x14xf32, #tpu.memory_space<vmem>>, vector<1x1x14xf32>,
    %cst_198 = arith.constant dense<0.000000e+00> : vector<14xf32>
    %416 = vector.multi_reduction <add>, %293, %cst_198 [0] : vector<14x14xf32> to vector<14xf32>
    %417 = vector.shape_cast %416 : vector<14xf32> to vector<1x14xf32>
    %cst_199 = arith.constant dense<0.000000e+00> : vector<1xf32>
    %418 = vector.multi_reduction <add>, %417, %cst_199 [1] : vector<1x14xf32> to vector<1xf32>
    %419 = vector.shape_cast %418 : vector<1xf32> to vector<1x1xf32>
    %cst_200 = arith.constant 0.00510204071 : f32
    %420 = vector.broadcast %cst_200 : f32 to vector<1x1xf32>
    %421 = arith.mulf %419, %420 : vector<1x1xf32>
    %422 = vector.broadcast %421 : vector<1x1xf32> to vector<14x14xf32>
    %423 = arith.subf %293, %422 : vector<14x14xf32>
    %c0_201 = arith.constant 0 : index
    %c4_202 = arith.constant 4 : index
    %c0_203 = arith.constant 0 : index
    %424 = vector.load %arg6[%c0_201, %c4_202, %c0_203] : memref<1x8x14xf32, #tpu.memory_space<vmem>>, vector<1x1x14xf32>
    %425 = vector.shape_cast %424 : vector<1x1x14xf32> to vector<1x14xf32>
    %426 = vector.shape_cast %417 : vector<1x14xf32> to vector<1x1x14xf32>
    tpu.vector_store %arg6[%c0_201, %c4_202, %c0_203], %426 {strides = array<i32>} : memref<1x8x14xf32, #tpu.memory_space<vmem>>, vector<1x1x14xf32>,
    %427 = arith.mulf %423, %423 : vector<14x14xf32>
    %cst_204 = arith.constant dense<0.000000e+00> : vector<14xf32>
    %428 = vector.multi_reduction <add>, %427, %cst_204 [0] : vector<14x14xf32> to vector<14xf32>
    %429 = vector.shape_cast %428 : vector<14xf32> to vector<1x14xf32>
    %c0_205 = arith.constant 0 : index
    %c4_206 = arith.constant 4 : index
    %c0_207 = arith.constant 0 : index
    %430 = vector.load %arg7[%c0_205, %c4_206, %c0_207] : memref<1x8x14xf32, #tpu.memory_space<vmem>>, vector<1x1x14xf32>
    %431 = vector.shape_cast %430 : vector<1x1x14xf32> to vector<1x14xf32>
    %432 = vector.shape_cast %429 : vector<1x14xf32> to vector<1x1x14xf32>
    tpu.vector_store %arg7[%c0_205, %c4_206, %c0_207], %432 {strides = array<i32>} : memref<1x8x14xf32, #tpu.memory_space<vmem>>, vector<1x1x14xf32>,
    %cst_208 = arith.constant dense<0.000000e+00> : vector<14xf32>
    %433 = vector.multi_reduction <add>, %311, %cst_208 [0] : vector<14x14xf32> to vector<14xf32>
    %434 = vector.shape_cast %433 : vector<14xf32> to vector<1x14xf32>
    %cst_209 = arith.constant dense<0.000000e+00> : vector<1xf32>
    %435 = vector.multi_reduction <add>, %434, %cst_209 [1] : vector<1x14xf32> to vector<1xf32>
    %436 = vector.shape_cast %435 : vector<1xf32> to vector<1x1xf32>
    %cst_210 = arith.constant 0.00510204071 : f32
    %437 = vector.broadcast %cst_210 : f32 to vector<1x1xf32>
    %438 = arith.mulf %436, %437 : vector<1x1xf32>
    %439 = vector.broadcast %438 : vector<1x1xf32> to vector<14x14xf32>
    %440 = arith.subf %311, %439 : vector<14x14xf32>
    %c0_211 = arith.constant 0 : index
    %c5_212 = arith.constant 5 : index
    %c0_213 = arith.constant 0 : index
    %441 = vector.load %arg6[%c0_211, %c5_212, %c0_213] : memref<1x8x14xf32, #tpu.memory_space<vmem>>, vector<1x1x14xf32>
    %442 = vector.shape_cast %441 : vector<1x1x14xf32> to vector<1x14xf32>
    %443 = vector.shape_cast %434 : vector<1x14xf32> to vector<1x1x14xf32>
    tpu.vector_store %arg6[%c0_211, %c5_212, %c0_213], %443 {strides = array<i32>} : memref<1x8x14xf32, #tpu.memory_space<vmem>>, vector<1x1x14xf32>,
    %444 = arith.mulf %440, %440 : vector<14x14xf32>
    %cst_214 = arith.constant dense<0.000000e+00> : vector<14xf32>
    %445 = vector.multi_reduction <add>, %444, %cst_214 [0] : vector<14x14xf32> to vector<14xf32>
    %446 = vector.shape_cast %445 : vector<14xf32> to vector<1x14xf32>
    %c0_215 = arith.constant 0 : index
    %c5_216 = arith.constant 5 : index
    %c0_217 = arith.constant 0 : index
    %447 = vector.load %arg7[%c0_215, %c5_216, %c0_217] : memref<1x8x14xf32, #tpu.memory_space<vmem>>, vector<1x1x14xf32>
    %448 = vector.shape_cast %447 : vector<1x1x14xf32> to vector<1x14xf32>
    %449 = vector.shape_cast %446 : vector<1x14xf32> to vector<1x1x14xf32>
    tpu.vector_store %arg7[%c0_215, %c5_216, %c0_217], %449 {strides = array<i32>} : memref<1x8x14xf32, #tpu.memory_space<vmem>>, vector<1x1x14xf32>,
    %cst_218 = arith.constant dense<0.000000e+00> : vector<14xf32>
    %450 = vector.multi_reduction <add>, %329, %cst_218 [0] : vector<14x14xf32> to vector<14xf32>
    %451 = vector.shape_cast %450 : vector<14xf32> to vector<1x14xf32>
    %cst_219 = arith.constant dense<0.000000e+00> : vector<1xf32>
    %452 = vector.multi_reduction <add>, %451, %cst_219 [1] : vector<1x14xf32> to vector<1xf32>
    %453 = vector.shape_cast %452 : vector<1xf32> to vector<1x1xf32>
    %cst_220 = arith.constant 0.00510204071 : f32
    %454 = vector.broadcast %cst_220 : f32 to vector<1x1xf32>
    %455 = arith.mulf %453, %454 : vector<1x1xf32>
    %456 = vector.broadcast %455 : vector<1x1xf32> to vector<14x14xf32>
    %457 = arith.subf %329, %456 : vector<14x14xf32>
    %c0_221 = arith.constant 0 : index
    %c6_222 = arith.constant 6 : index
    %c0_223 = arith.constant 0 : index
    %458 = vector.load %arg6[%c0_221, %c6_222, %c0_223] : memref<1x8x14xf32, #tpu.memory_space<vmem>>, vector<1x1x14xf32>
    %459 = vector.shape_cast %458 : vector<1x1x14xf32> to vector<1x14xf32>
    %460 = vector.shape_cast %451 : vector<1x14xf32> to vector<1x1x14xf32>
    tpu.vector_store %arg6[%c0_221, %c6_222, %c0_223], %460 {strides = array<i32>} : memref<1x8x14xf32, #tpu.memory_space<vmem>>, vector<1x1x14xf32>,
    %461 = arith.mulf %457, %457 : vector<14x14xf32>
    %cst_224 = arith.constant dense<0.000000e+00> : vector<14xf32>
    %462 = vector.multi_reduction <add>, %461, %cst_224 [0] : vector<14x14xf32> to vector<14xf32>
    %463 = vector.shape_cast %462 : vector<14xf32> to vector<1x14xf32>
    %c0_225 = arith.constant 0 : index
    %c6_226 = arith.constant 6 : index
    %c0_227 = arith.constant 0 : index
    %464 = vector.load %arg7[%c0_225, %c6_226, %c0_227] : memref<1x8x14xf32, #tpu.memory_space<vmem>>, vector<1x1x14xf32>
    %465 = vector.shape_cast %464 : vector<1x1x14xf32> to vector<1x14xf32>
    %466 = vector.shape_cast %463 : vector<1x14xf32> to vector<1x1x14xf32>
    tpu.vector_store %arg7[%c0_225, %c6_226, %c0_227], %466 {strides = array<i32>} : memref<1x8x14xf32, #tpu.memory_space<vmem>>, vector<1x1x14xf32>,
    %cst_228 = arith.constant dense<0.000000e+00> : vector<14xf32>
    %467 = vector.multi_reduction <add>, %347, %cst_228 [0] : vector<14x14xf32> to vector<14xf32>
    %468 = vector.shape_cast %467 : vector<14xf32> to vector<1x14xf32>
    %cst_229 = arith.constant dense<0.000000e+00> : vector<1xf32>
    %469 = vector.multi_reduction <add>, %468, %cst_229 [1] : vector<1x14xf32> to vector<1xf32>
    %470 = vector.shape_cast %469 : vector<1xf32> to vector<1x1xf32>
    %cst_230 = arith.constant 0.00510204071 : f32
    %471 = vector.broadcast %cst_230 : f32 to vector<1x1xf32>
    %472 = arith.mulf %470, %471 : vector<1x1xf32>
    %473 = vector.broadcast %472 : vector<1x1xf32> to vector<14x14xf32>
    %474 = arith.subf %347, %473 : vector<14x14xf32>
    %c0_231 = arith.constant 0 : index
    %c7_232 = arith.constant 7 : index
    %c0_233 = arith.constant 0 : index
    %475 = vector.load %arg6[%c0_231, %c7_232, %c0_233] : memref<1x8x14xf32, #tpu.memory_space<vmem>>, vector<1x1x14xf32>
    %476 = vector.shape_cast %475 : vector<1x1x14xf32> to vector<1x14xf32>
    %477 = vector.shape_cast %468 : vector<1x14xf32> to vector<1x1x14xf32>
    tpu.vector_store %arg6[%c0_231, %c7_232, %c0_233], %477 {strides = array<i32>} : memref<1x8x14xf32, #tpu.memory_space<vmem>>, vector<1x1x14xf32>,
    %478 = arith.mulf %474, %474 : vector<14x14xf32>
    %cst_234 = arith.constant dense<0.000000e+00> : vector<14xf32>
    %479 = vector.multi_reduction <add>, %478, %cst_234 [0] : vector<14x14xf32> to vector<14xf32>
    %480 = vector.shape_cast %479 : vector<14xf32> to vector<1x14xf32>
    %c0_235 = arith.constant 0 : index
    %c7_236 = arith.constant 7 : index
    %c0_237 = arith.constant 0 : index
    %481 = vector.load %arg7[%c0_235, %c7_236, %c0_237] : memref<1x8x14xf32, #tpu.memory_space<vmem>>, vector<1x1x14xf32>
    %482 = vector.shape_cast %481 : vector<1x1x14xf32> to vector<1x14xf32>
    %483 = vector.shape_cast %480 : vector<1x14xf32> to vector<1x1x14xf32>
    tpu.vector_store %arg7[%c0_235, %c7_236, %c0_237], %483 {strides = array<i32>} : memref<1x8x14xf32, #tpu.memory_space<vmem>>, vector<1x1x14xf32>,
    return
  }
  func.func @transform_0(%arg0: i32) -> (i32, i32, i32, i32) {
    %c0_i32 = arith.constant 0 : i32
    %c0_i32_0 = arith.constant 0 : i32
    %c0_i32_1 = arith.constant 0 : i32
    %c0_i32_2 = arith.constant 0 : i32
    return %arg0, %c0_i32, %c0_i32_0, %c0_i32_1 : i32, i32, i32, i32
  }
  func.func @transform_1(%arg0: i32) -> (i32, i32) {
    %c0_i32 = arith.constant 0 : i32
    %c0_i32_0 = arith.constant 0 : i32
    %c0_i32_1 = arith.constant 0 : i32
    return %c0_i32, %c0_i32_0 : i32, i32
  }
  func.func @transform_2(%arg0: i32) -> i32 {
    %c0_i32 = arith.constant 0 : i32
    %c0_i32_0 = arith.constant 0 : i32
    return %c0_i32 : i32
  }
  func.func @transform_3(%arg0: i32) -> (i32, i32) {
    %c0_i32 = arith.constant 0 : i32
    %c0_i32_0 = arith.constant 0 : i32
    %c0_i32_1 = arith.constant 0 : i32
    return %c0_i32, %c0_i32_0 : i32, i32
  }
  func.func @transform_4(%arg0: i32) -> i32 {
    %c0_i32 = arith.constant 0 : i32
    %c0_i32_0 = arith.constant 0 : i32
    return %c0_i32 : i32
  }
  func.func @transform_5(%arg0: i32) -> (i32, i32, i32) {
    %c0_i32 = arith.constant 0 : i32
    %c0_i32_0 = arith.constant 0 : i32
    %c0_i32_1 = arith.constant 0 : i32
    return %arg0, %c0_i32, %c0_i32_0 : i32, i32, i32
  }
  func.func @transform_6(%arg0: i32) -> (i32, i32, i32) {
    %c0_i32 = arith.constant 0 : i32
    %c0_i32_0 = arith.constant 0 : i32
    %c0_i32_1 = arith.constant 0 : i32
    return %arg0, %c0_i32, %c0_i32_0 : i32, i32, i32
  }
}

</mosaic_0001>

<bundles_post_ra>
// kernel: dsconv2d.3
= control target key start
LH: loop header
LB: loop body
LE: loop exit
PB: predicated region body
PF: predicated region fallthrough
CT: control target
= control target key end

     0   :  { %s2711_s0 = inlined_call_operand.vmem [shape: f32[2,4,16,16], index: 0, kind: input, shape index: {}]   ;;  %s2712_s1 = inlined_call_operand.vmem [shape: f32[4,9], index: 1, kind: input, shape index: {}]   ;;  %s2713_s2 = inlined_call_operand.vmem [shape: f32[4], index: 2, kind: input, shape index: {}]   ;;  %s2714_s3 = inlined_call_operand.vmem [shape: f32[8,4], index: 3, kind: input, shape index: {}]   ;;  %s2715_s4 = inlined_call_operand.vmem [shape: f32[8], index: 4, kind: input, shape index: {}]   ;;  %s2716_s5 = inlined_call_operand.vmem [shape: f32[8], index: 5, kind: input, shape index: {}]   ;;  %s2717_s6 = inlined_call_operand.vmem [shape: f32[8], index: 6, kind: input, shape index: {}]   ;;  %s2718_s7 = inlined_call_operand.vmem [shape: f32[2,8,14,14], index: 7, kind: output, shape index: {}]  }
   0x1   :  { %2782 = sst [smem:[#allocation46_spill]] %s2711_s0 }
   0x2   :  { %2783 = sst [smem:[#allocation47_spill]] %s2712_s1 }
   0x3   :  { %2784 = sst [smem:[#allocation48_spill]] %s2713_s2 }
   0x4   :  { %2785 = sst [smem:[#allocation49_spill]] %s2714_s3 }
   0x5   :  { %2786 = sst [smem:[#allocation50_spill]] %s2715_s4 }
   0x6   :  { %2787 = sst [smem:[#allocation51_spill]] %s2716_s5 }
   0x7   :  { %2788 = sst [smem:[#allocation52_spill]] %s2717_s6 }
   0x8   :  { %2789 = sst [smem:[#allocation53_spill]] %s2718_s7 }
   0x9   :  { %12 = vsyncpa [#allocation3], 0 }
   0xa   :  { %13 = vsyncpa [#allocation5], 0 }
   0xb   :  { %14 = vsyncpa [#allocation8], 0 }
   0xc   :  { %15 = vsyncpa [#allocation11], 0  ;;  %s1693_s24 = smov 0  }
   0xd LB: > { %2790 = sst [smem:[#allocation16_spill]] %s1643_s24  ;;  %s1702_s28 = sadd.s32 4294967295, %s1643_s24   ;;  %s1643_s24 = sphi %s1693_s24, %s21_s24  }
   0xe   : > { %s2791_s2 = sld [smem:[#allocation48_spill]]  ;;  %p1327_p0 = scmp.ge.s32.totalorder %s1643_s24, 1 }
   0xf   : > { %p204_p1 = scmp.lt.s32.totalorder %s1643_s24, 3  ;;  %p2719_p2 = scmp.eq.s32.totalorder %s1702_s28, 0 }
  0x10   : > { %s2793_s4 = sld [smem:[#allocation50_spill]] }
  0x11   : > { %p1707_p3 = pnand %p1327_p0, %p204_p1  ;;  %s2794_s1 = sld [smem:[#allocation47_spill]] }
  0x12   : > { %s2796_s3 = sld [smem:[#allocation49_spill]] }
  0x13   : > { %p1484_p4 = pneg %p1707_p3  ;;  %s2797_s5 = sld [smem:[#allocation51_spill]] }
  0x14   : > { %s228_s27 = sshll.u32 %s2791_s2, 4  ;;  %s229_s27 = int_to_ptr.vmem [resolvable:$true] %s228_s27 }
  0x15   : > { %p1725_p5 = pnand %p2719_p2, %p1484_p4  ;;  %s1531_s20 = scalar_lea.vmem %s229_s27, 16 }
  0x16   : > { %s250_s9 = sshll.u32 %s2793_s4, 4  ;;  %p1532_p6 = scmp.ne.s32.totalorder %s229_s27, %s1531_s20  ;;  %s1714_s9 = int_to_ptr.vmem [resolvable:$true] %s250_s9 }
  0x17   : > { %s217_s12 = sshll.u32 %s2794_s1, 4  ;;  %p1739_p7 = pneg %p1725_p5  ;;  %s1721_s12 = int_to_ptr.vmem [resolvable:$true] %s217_s12 }
  0x18   : > { %s239_s16 = sshll.u32 %s2796_s3, 4  ;;  %p1539_p10 = scmp.lt.s32.totalorder %s229_s27, %s229_s27  ;;  %s1732_s16 = int_to_ptr.vmem [resolvable:$true] %s239_s16 }
  0x19   : > { %s261_s19 = sshll.u32 %s2797_s5, 4  ;;  %p1534_p8 = pnand %p1739_p7, %p1532_p6  ;;  %s262_s19 = int_to_ptr.vmem [resolvable:$true] %s261_s19 }
  0x1a   : > { %p1540_p11 = scmp.lt.s32.totalorder %s1531_s20, %s1531_s20 }
  0x1b   : > { %p1535_p9 = pneg %p1534_p8 }
  0x1c   : > { %p1541_p12 = por %p1540_p11, %p1539_p10 }
  0x1e   : > { %p1542_p13 = pnand %p1541_p12, %p1535_p9 }
  0x20   : > { %1545 = shalt.err (!%p1542_p13)
}
  0x21   : > { %s1645_s22 = smov [#allocation4]   ;;  %s1546_s23 = scalar_lea.vmem %s1714_s9, 16 }
  0x22   : > { %1490 = dma.vmem_to_smem (!%p1725_p5), %s229_s27, 16, %s1645_s22, [#allocation5]  }
  0x23   : > { %p1547_p0 = scmp.ne.s32.totalorder %s1714_s9, %s1546_s23  ;;  %p1554_p6 = scmp.lt.s32.totalorder %s1714_s9, %s1714_s9 }
  0x24   : > { %p1555_p8 = scmp.lt.s32.totalorder %s1546_s23, %s1546_s23 }
  0x25   : > { %p1549_p1 = pnand %p1547_p0, %p1739_p7 }
  0x26   : > { %p1556_p2 = por %p1555_p8, %p1554_p6 }
  0x27   : > { %p1550_p4 = pneg %p1549_p1 }
  0x29   : > { %p1557_p10 = pnand %p1556_p2, %p1550_p4 }
  0x2b   : > { %1560 = shalt.err (!%p1557_p10)
}
  0x2c   : > { %s1646_s25 = smov [#allocation7]   ;;  %s1561_s26 = scalar_lea.vmem %s1721_s12, 64 }
  0x2d   : > { %1496 = dma.vmem_to_smem (!%p1725_p5), %s1714_s9, 16, %s1646_s25, [#allocation8]  }
  0x2e   : > { %p1562_p9 = scmp.ne.s32.totalorder %s1721_s12, %s1561_s26  ;;  %p1569_p13 = scmp.lt.s32.totalorder %s1721_s12, %s1721_s12 }
  0x2f   : > { %p1570_p0 = scmp.lt.s32.totalorder %s1561_s26, %s1561_s26 }
  0x30   : > { %p1564_p11 = pnand %p1562_p9, %p1739_p7 }
  0x31   : > { %p1571_p1 = por %p1570_p0, %p1569_p13 }
  0x32   : > { %p1565_p12 = pneg %p1564_p11 }
  0x34   : > { %p1572_p2 = pnand %p1571_p1, %p1565_p12 }
  0x36   : > { %1575 = shalt.err (!%p1572_p2)
}
  0x37   : > { %s1647_s27 = smov [#allocation2]   ;;  %s1576_s30 = scalar_lea.vmem %s1732_s16, 128 }
  0x38   : > { %1487 = dma.vmem_to_smem (!%p1725_p5), %s1721_s12, 64, %s1647_s27, [#allocation3]  }
  0x39   : > { %p1577_p4 = scmp.ne.s32.totalorder %s1732_s16, %s1576_s30  ;;  %p1584_p10 = scmp.lt.s32.totalorder %s1732_s16, %s1732_s16 }
  0x3a   : > { %p1585_p9 = scmp.lt.s32.totalorder %s1576_s30, %s1576_s30 }
  0x3b   : > { %p1579_p6 = pnand %p1577_p4, %p1739_p7 }
  0x3c   : > { %p1586_p11 = por %p1585_p9, %p1584_p10 }
  0x3d   : > { %p1580_p8 = pneg %p1579_p6 }
  0x3f   : > { %p1587_p12 = pnand %p1586_p11, %p1580_p8 }
  0x41   : > { %1590 = shalt.err (!%p1587_p12)
}
  0x42   : > { %s1648_s8 = smov [#allocation6]   ;;  %s1591_s11 = scalar_lea.vmem %s262_s19, 16 }
  0x43   : > { %1493 = dma.vmem_to_smem (!%p1725_p5), %s1732_s16, 128, %s1648_s8, [#allocation5]  }
  0x44   : > { %p1592_p13 = scmp.ne.s32.totalorder %s262_s19, %s1591_s11  ;;  %p1599_p2 = scmp.lt.s32.totalorder %s262_s19, %s262_s19 }
  0x45   : > { %p1600_p4 = scmp.lt.s32.totalorder %s1591_s11, %s1591_s11 }
  0x46   : > { %p1594_p0 = pnand %p1592_p13, %p1739_p7 }
  0x47   : > { %p1601_p6 = por %p1600_p4, %p1599_p2 }
  0x48   : > { %p1595_p1 = pneg %p1594_p0 }
  0x4a   : > { %p1602_p8 = pnand %p1601_p6, %p1595_p1 }
  0x4c   : > { %1605 = shalt.err (!%p1602_p8)
}
  0x4d   : > { %s1649_s12 = smov [#allocation9]   ;;  %s2799_s6 = sld [smem:[#allocation52_spill]] }
  0x4e   : > { %1499 = dma.vmem_to_smem (!%p1725_p5), %s262_s19, 16, %s1649_s12, [#allocation8]  }
  0x53   : > { %s272_s16 = sshll.u32 %s2799_s6, 4  ;;  %s273_s16 = int_to_ptr.vmem [resolvable:$true] %s272_s16 }
  0x54   : > { %s1606_s17 = scalar_lea.vmem %s273_s16, 16  ;;  %p1614_p12 = scmp.lt.s32.totalorder %s273_s16, %s273_s16 }
  0x55   : > { %p1607_p10 = scmp.ne.s32.totalorder %s273_s16, %s1606_s17  ;;  %p1615_p13 = scmp.lt.s32.totalorder %s1606_s17, %s1606_s17 }
  0x57   : > { %p1609_p9 = pnand %p1607_p10, %p1739_p7  ;;  %p1616_p0 = por %p1615_p13, %p1614_p12 }
  0x59   : > { %p1610_p11 = pneg %p1609_p9 }
  0x5b   : > { %p1617_p1 = pnand %p1616_p0, %p1610_p11 }
  0x5d   : > { %1620 = shalt.err (!%p1617_p1)
}
  0x5e   : > { %s1650_s18 = smov [#allocation10]   ;;  %293 = sbr.rel (%p1707_p3) target bundleno = 380 (0x17c), region = 48 }
  0x5f   : > { %1502 = dma.vmem_to_smem (!%p1725_p5), %s273_s16, 16, %s1650_s18, [#allocation11]  }
  0x63   : > { %p2800_p2 = scmp.eq.s32.totalorder %s1702_s28, 0 }
  0x65   : > { %1626 = dma.done.wait (%p2800_p2), [#allocation3], 64   ;;  %p2801_p4 = pmov %p2800_p2 }
  0x66   : > { %p2802_p7 = pmov %p2800_p2 }
  0x67   : > { %1628 = vsyncadd (%p2801_p4), [#allocation3], 4294967232 }
  0x68   : > { %1630 = dma.done.wait (%p2802_p7), [#allocation5], 144   ;;  %p2803_p6 = pmov %p2800_p2 }
  0x69   : > { %p2804_p8 = pmov %p2800_p2 }
  0x6a   : > { %1632 = vsyncadd (%p2803_p6), [#allocation5], 4294967152 }
  0x6b   : > { %1634 = dma.done.wait (%p2804_p8), [#allocation8], 32   ;;  %p2805_p5 = pmov %p2800_p2 }
  0x6c   : > { %p2806_p3 = pmov %p2800_p2 }
  0x6d   : > { %1636 = vsyncadd (%p2805_p5), [#allocation8], 4294967264 }
  0x6e   : > { %1638 = dma.done.wait (%p2806_p3), [#allocation11], 16   ;;  %p2807_p10 = pmov %p2800_p2 }
  0x70   : > { %1640 = vsyncadd (%p2807_p10), [#allocation11], 4294967280 }
  0x71   : > { %319 = sfence }
  0x72   : > { %p346_p9 = scmp.lt.s32.totalorder %s1702_s28, 1  ;;  %s1357_s29 = sld [smem:[#allocation2 + $0x81]]  ;;  %vm398_vm0 = vcmask 1046528   ;;  %vm446_vm1 = vcmask 1045504   ;;  %vm1117_vm2 = vcmask 111616   ;;  %vm1115_vm3 = vcmask 113664  }
  0x73   : > { %s1346_s13 = sld [smem:[#allocation2 + $0x1]]  ;;  %s1651_s26 = smov 127  }
  0x74   : > { %s2917_s28 = smov (!%p346_p9, %s1702_s28), 1  ;;  %s2809_s0 = sld [smem:[#allocation46_spill]] }
  0x75   : > { %2808 = sst [smem:[#allocation17_spill]] %s2917_s28  ;;  %s1458_s19 = sshll.u32 %s2917_s28, 6 }
  0x76   : > { %s1347_s23 = sld [smem:[#allocation2 + $0x2]]  ;;  %s1652_s8 = smov 126  }
  0x77   : > { %s1358_s25 = sld [smem:[#allocation2 + $0x82]] }
  0x78   : > { %v502_v2 = vstv %s1357_s29  ;;  %s1369_s27 = sld [smem:[#allocation2 + $0x101]] }
  0x79   : > { %v365_v6 = vstv %s1346_s13  ;;  %s1370_s30 = sld [smem:[#allocation2 + $0x102]] }
  0x7a   : > { %s1815_s22 = scalar_lea.vmem %s2809_s0, %s1458_s19  ;;  %s1349_s9 = sld [smem:[#allocation2 + $0x4]] }
  0x7b   : > { %v1818_v0 = vld [vmem:[%s1815_s22 + $0x10] sm:$0xff]  ;;  %v1821_v1 = vld [vmem:[%s1815_s22 + $0x18] sm:$0xff]  ;;  %v1824_v3 = vld [vmem:[%s1815_s22] sm:$0xff]  ;;  %s1844_s10 = sld [smem:[#allocation2 + $0x181]] }
  0x7c   : > { %v503_v4 = vmul.f32 %v1818_v0, %v502_v2  ;;  %v1828_v5 = vld [vmem:[%s1815_s22 + $0x8] sm:$0xff]  ;;  %v504_v7 = vmul.f32 %v1821_v1, %v502_v2  ;;  %v366_v8 = vmul.f32 %v365_v6, %v1824_v3  ;;  %v379_v10 = vstv %s1347_s23  ;;  %s1360_s11 = sld [smem:[#allocation2 + $0x84]]  ;;  %v1849_v18 = vld [vmem:[%s1815_s22 + $0x20] sm:$0xff]  ;;  %v1864_v24 = vld [vmem:[%s1815_s22 + $0x38] sm:$0xff] }
  0x7d   : > { %v367_v9 = vmul.f32 %v365_v6, %v1828_v5  ;;  %v381_v11 = vmul.f32 %v379_v10, %v1828_v5  ;;  %v516_v12 = vstv %s1358_s25  ;;  %v380_v13 = vmul.f32 %v379_v10, %v1824_v3  ;;  %v1842_v15 = vld [vmem:[%s1815_s22 + $0x28] sm:$0xff]  ;;  %s1853_s12 = sld [smem:[#allocation2 + $0x8]]  ;;  %v1872_v28 = vld [vmem:[%s1815_s22 + $0x30] sm:$0xff] }
  0x7e   : > { %507 = vrot.lane.b32.xlu1 %v503_v4, %s1651_s26  ;;  %370 = vrot.lane.b32.xlu0 %v366_v8, %s1651_s26  ;;  %v518_v14 = vmul.f32 %v1821_v1, %v516_v12  ;;  %v637_v16 = vstv %s1369_s27  ;;  %v517_v17 = vmul.f32 %v1818_v0, %v516_v12  ;;  %s1857_s14 = sld [smem:[#allocation2 + $0x88]] }
  0x7f   : > { %v639_v19 = vmul.f32 %v1842_v15, %v637_v16  ;;  %v651_v20 = vstv %s1370_s30  ;;  %v638_v21 = vmul.f32 %v1849_v18, %v637_v16  ;;  %s1861_s15 = sld [smem:[#allocation2 + $0x5]] }
  0x80   : > { %v653_v22 = vmul.f32 %v1842_v15, %v651_v20  ;;  %v407_v23 = vstv %s1349_s9  ;;  %s1867_s16 = sld [smem:[#allocation2 + $0x108]]  ;;  %v652_v26 = vmul.f32 %v1849_v18, %v651_v20 }
  0x81   : > { %v772_v25 = vstv %s1844_s10  ;;  %v409_v29 = vmul.f32 %v407_v23, %v1828_v5  ;;  %v408_v30 = vmul.f32 %v407_v23, %v1824_v3  ;;  %s1876_s17 = sld [smem:[#allocation2 + $0x85]] }
  0x82   : > { %509 = vrot.lane.b32.xlu1 %v504_v7, %s1651_s26  ;;  %372 = vrot.lane.b32.xlu0 %v367_v9, %s1651_s26  ;;  %v543_v27 = vstv %s1360_s11  ;;  %v774_v31 = vmul.f32 %v1864_v24, %v772_v25  ;;  %s1882_s18 = sld [smem:[#allocation2 + $0x182]]  ;;  %v773_v34 = vmul.f32 %v1872_v28, %v772_v25 }
  0x83   : > { %v544_v32 = vmul.f32 %v1818_v0, %v543_v27  ;;  %v545_v33 = vmul.f32 %v1821_v1, %v543_v27  ;;  %v472_v35 = vstv %s1853_s12  ;;  %v413_v37 = vrot.slane %v409_v29, 1  ;;  %s1888_s29 = sld [smem:[#allocation2 + $0x104]] }
  0x84   : > { %v607_v36 = vstv %s1857_s14  ;;  %v412_v38 = vrot.slane %v408_v30, 1  ;;  %s1891_s13 = sld [smem:[#allocation2 + $0x105]]  ;;  %v1894_v39 = vmul.f32 %v472_v35, %v1828_v5  ;;  %v473_v40 = vmul.f32 %v472_v35, %v1824_v3 }
  0x85   : > { %v608_v41 = vmul.f32 %v1818_v0, %v607_v36  ;;  %v1899_v42 = vmul.f32 %v1821_v1, %v607_v36  ;;  %v549_v43 = vrot.slane %v545_v33, 1  ;;  %v548_v44 = vrot.slane %v544_v32, 1  ;;  %s1906_s19 = sld [smem:[#allocation2 + $0x3]] }
  0x86   : > { %386 = vrot.lane.b32.xlu1 %v381_v11, %s1652_s8  ;;  %384 = vrot.lane.b32.xlu0 %v380_v13, %s1652_s8  ;;  %v424_v45 = vstv %s1861_s15  ;;  %v742_v46 = vstv %s1867_s16  ;;  %v478_v47 = vrot.slane %v1894_v39, 2  ;;  %v477_v48 = vrot.slane %v473_v40, 2  ;;  %s1914_s20 = sld [smem:[#allocation2 + $0x83]] }
  0x87   : > { %v613_v49 = vrot.slane %v1899_v42, 2  ;;  %v612_v50 = vrot.slane %v608_v41, 2  ;;  %v414_v51 = vsel %vm398_vm0, %v412_v38, %v413_v37  ;;  %v560_v52 = vstv %s1876_s17  ;;  %s1927_s21 = sld [smem:[#allocation2 + $0x103]] }
  0x88   : > { %v743_v53 = vmul.f32 %v1849_v18, %v742_v46  ;;  %v1912_v54 = vmul.f32 %v1842_v15, %v742_v46  ;;  %v1920_v55 = vsel %vm446_vm1, %v477_v48, %v478_v47  ;;  %v786_v57 = vstv %s1882_s18  ;;  %s1935_s22 = sld [smem:[#allocation2 + $0x6]] }
  0x89   : > { %v1925_v56 = vsel %vm446_vm1, %v612_v50, %v613_v49  ;;  %v426_v60 = vmul.f32 %v424_v45, %v1828_v5  ;;  %v425_v61 = vmul.f32 %v424_v45, %v1824_v3  ;;  %v561_v62 = vmul.f32 %v1818_v0, %v560_v52  ;;  %s1948_s23 = sld [smem:[#allocation2 + $0x184]] }
  0x8a   : > { %523 = vrot.lane.b32.xlu1 %v518_v14, %s1652_s8  ;;  %521 = vrot.lane.b32.xlu0 %v517_v17, %s1652_s8  ;;  %v748_v58 = vrot.slane %v1912_v54, 2  ;;  %v747_v59 = vrot.slane %v743_v53, 2  ;;  %v550_v63 = vsel %vm398_vm0, %v548_v44, %v549_v43  ;;  %v562_v2 = vmul.f32 %v1821_v1, %v560_v52  ;;  %s1952_s25 = sld [smem:[#allocation2 + $0x86]] }
  0x8b   : > { %v788_v6 = vmul.f32 %v1864_v24, %v786_v57  ;;  %v678_v7 = vstv %s1888_s29  ;;  %v695_v8 = vstv %s1891_s13  ;;  %v787_v9 = vmul.f32 %v1872_v28, %v786_v57  ;;  %s1963_s27 = sld [smem:[#allocation2 + $0x7]] }
  0x8c   : > { %v1942_v4 = vsel %vm446_vm1, %v747_v59, %v748_v58  ;;  %v430_v10 = vrot.slane %v426_v60, 1  ;;  %v429_v11 = vrot.slane %v425_v61, 1  ;;  %v565_v12 = vrot.slane %v561_v62, 1  ;;  %s1983_s30 = sld [smem:[#allocation2 + $0x106]] }
  0x8d   : > { %v566_v13 = vrot.slane %v562_v2, 1  ;;  %v679_v14 = vmul.f32 %v1849_v18, %v678_v7  ;;  %v680_v16 = vmul.f32 %v1842_v15, %v678_v7  ;;  %v1957_v17 = vmul.f32 %v1849_v18, %v695_v8  ;;  %s2019_s9 = sld [smem:[#allocation2 + $0x87]] }
  0x8e   : > { %644 = vrot.lane.b32.xlu1 %v639_v19, %s1651_s26  ;;  %642 = vrot.lane.b32.xlu0 %v638_v21, %s1651_s26  ;;  %v1961_v19 = vmul.f32 %v1842_v15, %v695_v8  ;;  %v393_v20 = vstv %s1906_s19  ;;  %v530_v21 = vstv %s1914_s20  ;;  %v431_v29 = vsel %vm398_vm0, %v429_v11, %v430_v10  ;;  %s1385_s10 = sld [smem:[#allocation2 + $0x185]] }
  0x8f   : > { %v1969_v23 = vmul.f32 %v393_v20, %v1828_v5  ;;  %v394_v25 = vmul.f32 %v393_v20, %v1824_v3  ;;  %v1974_v27 = vmul.f32 %v1821_v1, %v530_v21  ;;  %v441_v32 = vstv %s1935_s22  ;;  %s1375_s11 = sld [smem:[#allocation2 + $0x107]] }
  0x90   : > { %v813_v38 = vstv %s1948_s23  ;;  %v2001_v45 = vmul.f32 %v441_v32, %v1828_v5  ;;  %v442_v46 = vmul.f32 %v441_v32, %v1824_v3  ;;  %v567_v48 = vsel %vm398_vm0, %v565_v12, %v566_v13  ;;  %s1387_s12 = sld [smem:[#allocation2 + $0x187]] }
  0x91   : > { %v400_v33 = vrot.slane %v1969_v23, 1  ;;  %v536_v36 = vrot.slane %v1974_v27, 1  ;;  %v684_v50 = vrot.slane %v680_v16, 1  ;;  %v577_v52 = vstv %s1952_s25  ;;  %s1388_s14 = sld [smem:[#allocation2 + $0x188]] }
  0x92   : > { %658 = vrot.lane.b32.xlu1 %v653_v22, %s1652_s8  ;;  %656 = vrot.lane.b32.xlu0 %v652_v26, %s1652_s8  ;;  %v665_v22 = vstv %s1927_s21  ;;  %v531_v26 = vmul.f32 %v1818_v0, %v530_v21  ;;  %v448_v53 = vrot.slane %v2001_v45, 2  ;;  %v447_v57 = vrot.slane %v442_v46, 2  ;;  %s1356_s15 = sld [smem:[#allocation2 + $0x80]] }
  0x93   : > { %v666_v30 = vmul.f32 %v1849_v18, %v665_v22  ;;  %v578_v59 = vmul.f32 %v1818_v0, %v577_v52  ;;  %v2015_v60 = vmul.f32 %v1821_v1, %v577_v52  ;;  %v455_v61 = vstv %s1963_s27  ;;  %s358_s16 = sld [smem:[#allocation2]] }
  0x94   : > { %v535_v35 = vrot.slane %v531_v26, 1  ;;  %v712_v62 = vstv %s1983_s30  ;;  %v701_v8 = vrot.slane %v1961_v19, 1  ;;  %v457_v19 = vmul.f32 %v455_v61, %v1828_v5  ;;  %s2125_s17 = sld [smem:[#allocation2 + $0x183]] }
  0x95   : > { %v670_v40 = vrot.slane %v666_v30, 1  ;;  %v582_v2 = vrot.slane %v578_v59, 2  ;;  %v713_v7 = vmul.f32 %v1849_v18, %v712_v62  ;;  %v2034_v11 = vmul.f32 %v1842_v15, %v712_v62  ;;  %s2129_s18 = sld [smem:[#allocation4]] }
  0x96   : > { %779 = vrot.lane.b32.xlu1 %v774_v31, %s1651_s26  ;;  %777 = vrot.lane.b32.xlu0 %v773_v34, %s1651_s26  ;;  %v1980_v31 = vmul.f32 %v1842_v15, %v665_v22  ;;  %v399_v34 = vrot.slane %v394_v25, 1  ;;  %v1998_v44 = vsel %vm398_vm0, %v535_v35, %v536_v36  ;;  %v456_v26 = vmul.f32 %v455_v61, %v1824_v3  ;;  %s2132_s29 = sld [smem:[#allocation6]] }
  0x97   : > { %v717_v16 = vrot.slane %v713_v7, 2  ;;  %v461_v30 = vrot.slane %v457_v19, 2  ;;  %v830_v32 = vstv %s1385_s10  ;;  %s2136_s13 = sld [smem:[#allocation6 + $0x80]] }
  0x98   : > { %v671_v41 = vrot.slane %v1980_v31, 1  ;;  %v460_v35 = vrot.slane %v456_v26, 2  ;;  %v832_v52 = vmul.f32 %v1864_v24, %v830_v32  ;;  %v496_v54 = vstv %s1356_s15  ;;  %s2138_s19 = sld [smem:[#allocation6 + $0x100]] }
  0x99   : > { %s2140_s20 = sld [smem:[#allocation6 + $0x180]] }
  0x9a   : > { %417 = vrot.lane.b32.xlu1 %v413_v37, %s1651_s26  ;;  %415 = vrot.lane.b32.xlu0 %v414_v51, %s1651_s26  ;;  %v683_v37 = vrot.slane %v679_v14, 1  ;;  %v2009_v51 = vsel %vm398_vm0, %v670_v40, %v671_v41  ;;  %v831_v40 = vmul.f32 %v1872_v28, %v830_v32  ;;  %v462_v46 = vsel %vm446_vm1, %v460_v35, %v461_v30  ;;  %s2142_s21 = sld [smem:[#allocation6 + $0x200]] }
  0x9b   : > { %v836_v59 = vrot.slane %v832_v52, 1  ;;  %v498_v32 = vmul.f32 %v1821_v1, %v496_v54  ;;  %2810 = sst [smem:[#allocation18_spill]] %s2129_s18 }
  0x9c   : > { %v685_v12 = vsel %vm398_vm0, %v683_v37, %v684_v50  ;;  %v835_v61 = vrot.slane %v831_v40, 1  ;;  %s2144_s22 = sld [smem:[#allocation6 + $0x280]] }
  0x9d   : > { %s2146_s23 = sld [smem:[#allocation6 + $0x300]] }
  0x9e   : > { %553 = vrot.lane.b32.xlu1 %v549_v43, %s1651_s26  ;;  %551 = vrot.lane.b32.xlu0 %v550_v63, %s1651_s26  ;;  %v1993_v43 = vsel %vm398_vm0, %v399_v34, %v400_v33  ;;  %v2025_v63 = vsel %vm446_vm1, %v447_v57, %v448_v53  ;;  %v837_v62 = vsel %vm398_vm0, %v835_v61, %v836_v59  ;;  %2811 = sst [smem:[#allocation19_spill]] %s2138_s19 }
  0x9f   : > { %s2148_s25 = sld [smem:[#allocation6 + $0x380]] }
  0xa0   : > { %s2150_s27 = sld [smem:[#allocation4 + $0x1]] }
  0xa1   : > { %s2152_s30 = sld [smem:[#allocation6 + $0x1]] }
  0xa2   : > { %793 = vrot.lane.b32.xlu1 %v788_v6, %s1652_s8  ;;  %791 = vrot.lane.b32.xlu0 %v787_v9, %s1652_s8  ;;  %v583_v6 = vrot.slane %v2015_v60, 2  ;;  %v700_v9 = vrot.slane %v1957_v17, 1  ;;  %v718_v17 = vrot.slane %v2034_v11, 2  ;;  %2812 = sst [smem:[#allocation20_spill]] %s2144_s22 }
  0xa3   : > { %2813 = sst [smem:[#allocation21_spill]] %s2146_s23 }
  0xa4   : > { %v2041_v14 = vsel %vm446_vm1, %v582_v2, %v583_v6  ;;  %v2050_v20 = vsel %vm446_vm1, %v717_v16, %v718_v17  ;;  %v702_v21 = vsel %vm398_vm0, %v700_v9, %v701_v8  ;;  %v725_v2 = vstv %s1375_s11  ;;  %s2158_s10 = sld [smem:[#allocation6 + $0x101]] }
  0xa5   : > { %v726_v7 = vmul.f32 %v1849_v18, %v725_v2  ;;  %2814 = sst [smem:[#allocation22_spill]] %s2148_s25 }
  0xa6   : > { %434 = vrot.lane.b32.xlu1 %v430_v10, %s1652_s8  ;;  %432 = vrot.lane.b32.xlu0 %v431_v29, %s1652_s8  ;;  %v814_v10 = vmul.f32 %v1872_v28, %v813_v38  ;;  %v590_v29 = vstv %s2019_s9  ;;  %2815 = sst [smem:[#allocation23_spill]] %s2150_s27 }
  0xa7   : > { %v591_v37 = vmul.f32 %v1818_v0, %v590_v29  ;;  %2816 = sst [smem:[#allocation24_spill]] %s2152_s30 }
  0xa8   : > { %v818_v25 = vrot.slane %v814_v10, 1  ;;  %v730_v10 = vrot.slane %v726_v7, 2  ;;  %s2154_s9 = sld [smem:[#allocation6 + $0x81]] }
  0xa9   : > { %s2160_s11 = sld [smem:[#allocation6 + $0x181]] }
  0xaa   : > { %570 = vrot.lane.b32.xlu1 %v566_v13, %s1652_s8  ;;  %568 = vrot.lane.b32.xlu0 %v567_v48, %s1652_s8  ;;  %v815_v13 = vmul.f32 %v1864_v24, %v813_v38  ;;  %v592_v38 = vmul.f32 %v1821_v1, %v590_v29  ;;  %s2168_s15 = sld [smem:[#allocation6 + $0x301]] }
  0xab   : > { %s2172_s0 = sld [smem:[#allocation2 + $0x186]] }
  0xac   : > { %v819_v22 = vrot.slane %v815_v13, 1  ;;  %v596_v48 = vrot.slane %v592_v38, 2  ;;  %s2178_s1 = sld [smem:[#allocation4 + $0x2]] }
  0xad   : > { %s2180_s2 = sld [smem:[#allocation6 + $0x2]] }
  0xae   : > { %688 = vrot.lane.b32.xlu1 %v684_v50, %s1651_s26  ;;  %686 = vrot.lane.b32.xlu0 %v685_v12, %s1651_s26  ;;  %v820_v34 = vsel %vm398_vm0, %v818_v25, %v819_v22  ;;  %v595_v50 = vrot.slane %v591_v37, 2  ;;  %v860_v12 = vstv %s1387_s12  ;;  %2817 = sst [smem:[#allocation25_spill]] %s2154_s9 }
  0xaf   : > { %v861_v16 = vmul.f32 %v1872_v28, %v860_v12  ;;  %v862_v39 = vmul.f32 %v1864_v24, %v860_v12  ;;  %2818 = sst [smem:[#allocation26_spill]] %s2160_s11 }
  0xb0   : > { %v597_v57 = vsel %vm446_vm1, %v595_v50, %v596_v48  ;;  %s2164_s12 = sld [smem:[#allocation6 + $0x201]] }
  0xb1   : > { %v865_v19 = vrot.slane %v861_v16, 2  ;;  %2820 = sst [smem:[#allocation28_spill]] %s2168_s15 }
  0xb2   : > { %705 = vrot.lane.b32.xlu1 %v701_v8, %s1652_s8  ;;  %703 = vrot.lane.b32.xlu0 %v702_v21, %s1652_s8  ;;  %v727_v8 = vmul.f32 %v1842_v15, %v725_v2  ;;  %2822 = sst [smem:[#allocation30_spill]] %s2178_s1 }
  0xb3   : > { %2823 = sst [smem:[#allocation31_spill]] %s2180_s2 }
  0xb4   : > { %v731_v9 = vrot.slane %v727_v8, 2  ;;  %s2185_s3 = sld [smem:[#allocation6 + $0x82]] }
  0xb5   : > { %s2187_s4 = sld [smem:[#allocation6 + $0x102]] }
  0xb6   : > { %823 = vrot.lane.b32.xlu1 %v819_v22, %s1651_s26  ;;  %821 = vrot.lane.b32.xlu0 %v820_v34, %s1651_s26  ;;  %v732_v13 = vsel %vm446_vm1, %v730_v10, %v731_v9  ;;  %2819 = sst [smem:[#allocation27_spill]] %s2164_s12 }
  0xb7   : > { %s2193_s5 = sld [smem:[#allocation6 + $0x182]] }
  0xb8   : > { %s2197_s6 = sld [smem:[#allocation6 + $0x202]] }
  0xb9   : > { %s2203_s24 = sld [smem:[#allocation6 + $0x282]] }
  0xba   : > { %465 = vrot.lane.b32.xlu1 %v461_v30, %s1651_s26  ;;  %463 = vrot.lane.b32.xlu0 %v462_v46, %s1651_s26  ;;  %s2205_s7 = sld [smem:[#allocation6 + $0x302]] }
  0xbb   : > { %s2207_s28 = sld [smem:[#allocation6 + $0x382]] }
  0xbd   : > { %2824 = sst [smem:[#allocation32_spill]] %s2193_s5 }
  0xbe   : > { %600 = vrot.lane.b32.xlu1 %v596_v48, %s1651_s26  ;;  %598 = vrot.lane.b32.xlu0 %v597_v57, %s1651_s26  ;;  %2825 = sst [smem:[#allocation33_spill]] %s2197_s6 }
  0xbf   : > { %2826 = sst [smem:[#allocation34_spill]] %s2203_s24 }
  0xc0   : > { %2827 = sst [smem:[#allocation35_spill]] %s2205_s7 }
  0xc1   : > { %2828 = sst [smem:[#allocation36_spill]] %s2207_s28 }
  0xc2   : > { %840 = vrot.lane.b32.xlu1 %v836_v59, %s1652_s8  ;;  %838 = vrot.lane.b32.xlu0 %v837_v62, %s1652_s8  ;;  %s2215_s6 = sld [smem:[#allocation4 + $0x3]] }
  0xc3   : > { %s2220_s24 = sld [smem:[#allocation7]] }
  0xc4   : > { %s2222_s28 = sld [smem:[#allocation6 + $0x83]] }
  0xc5   : > { %s2227_s7 = sld [smem:[#allocation7 + $0x1]] }
  0xc6   : > { %482 = vrot.lane.b32.xlu1 %v478_v47, %s1652_s8  ;;  %480 = vrot.lane.b32.xlu0 %v1920_v55, %s1652_s8  ;;  %v877_v47 = vstv %s1388_s14  ;;  %v866_v55 = vrot.slane %v862_v39, 2  ;;  %s2166_s14 = sld [smem:[#allocation6 + $0x281]] }
  0xc7   : > { %v878_v42 = vmul.f32 %v1872_v28, %v877_v47 }
  0xc9   : > { %v882_v22 = vrot.slane %v878_v42, 2  ;;  %2829 = sst [smem:[#allocation37_spill]] %s2220_s24 }
  0xca   : > { %617 = vrot.lane.b32.xlu1 %v613_v49, %s1652_s8  ;;  %615 = vrot.lane.b32.xlu0 %v1925_v56, %s1652_s8  ;;  %v879_v49 = vmul.f32 %v1864_v24, %v877_v47  ;;  %v867_v56 = vsel %vm446_vm1, %v865_v19, %v866_v55  ;;  %2830 = sst [smem:[#allocation38_spill]] %s2222_s28 }
  0xcb   : > { %2831 = sst [smem:[#allocation39_spill]] %s2227_s7 }
  0xcc   : > { %v883_v21 = vrot.slane %v879_v49, 2  ;;  %s2236_s28 = sld [smem:[#allocation7 + $0x2]] }
  0xcd   : > { %s2242_s7 = sld [smem:[#allocation6 + $0x183]] }
  0xce   : > { %735 = vrot.lane.b32.xlu1 %v731_v9, %s1651_s26  ;;  %733 = vrot.lane.b32.xlu0 %v732_v13, %s1651_s26  ;;  %v884_v25 = vsel %vm446_vm1, %v882_v22, %v883_v21  ;;  %s2442_s24 = sld [smem:[#allocation9 + $0x5]] }
  0xd2   : > { %752 = vrot.lane.b32.xlu1 %v748_v58, %s1652_s8  ;;  %750 = vrot.lane.b32.xlu0 %v1942_v4, %s1652_s8  ;;  %v359_v58 = vstv %s358_s16  ;;  %v497_v4 = vmul.f32 %v1818_v0, %v496_v54  ;;  %s2170_s16 = sld [smem:[#allocation6 + $0x381]] }
  0xd3   : > { %v360_v26 = vmul.f32 %v359_v58, %v1824_v3  ;;  %v361_v37 = vmul.f32 %v359_v58, %v1828_v5  ;;  %2832 = sst [smem:[#allocation40_spill]] %s2236_s28 }
  0xd4   : > { %2833 = sst [smem:[#allocation41_spill]] %s2242_s7 }
  0xd5   : > { %s2408_s28 = sld [smem:[#allocation9 + $0x3]] }
  0xd6   : > { %870 = vrot.lane.b32.xlu1 %v866_v55, %s1651_s26  ;;  %868 = vrot.lane.b32.xlu0 %v867_v56, %s1651_s26  ;;  %s2107_s26 = sld [smem:[#allocation2 + $0x100]] }
  0xd8   : > { %2821 = sst [smem:[#allocation29_spill]] %s2170_s16 }
  0xda   : > { %887 = vrot.lane.b32.xlu1 %v883_v21, %s1652_s8  ;;  %885 = vrot.lane.b32.xlu0 %v884_v25, %s1652_s8  ;;  %s2123_s8 = sld [smem:[#allocation2 + $0x180]] }
  0xdb   : > { %2862 = sst [smem:[#allocation20_spill]] %s2408_s28 }
  0xdc   : > { %v631_v62 = vstv %s2107_s26  ;;  %s2258_s26 = sld [smem:[#allocation6 + $0x203]] }
  0xdd   : > { %v632_v9 = vmul.f32 %v1849_v18, %v631_v62 }
  0xf0   : > { %v508_v29 = vpop.permute.xlu1 %507  ;;  %v371_v34 = vpop.permute.xlu0 %370 }
  0xf1   : > { %v513_v30 = vadd.f32 %v508_v29, %v497_v4  ;;  %v376_v35 = vadd.f32 %v371_v34, %v360_v26  ;;  %v800_v34 = vstv %s2125_s17  ;;  %s2217_s17 = sld [smem:[#allocation6 + $0x3]] }
  0xf4   : > { %v510_v38 = vpop.permute.xlu1 %509  ;;  %v373_v46 = vpop.permute.xlu0 %372 }
  0xf5   : > { %v514_v40 = vadd.f32 %v510_v38, %v498_v32  ;;  %v377_v48 = vadd.f32 %v373_v46, %v361_v37  ;;  %v2213_v37 = vmul.f32 %v1864_v24, %v800_v34 }
  0xf8   : > { %v387_v50 = vpop.permute.xlu1 %386  ;;  %v385_v52 = vpop.permute.xlu0 %384 }
  0xf9   : > { %v391_v0 = vadd.f32 %v387_v50, %v377_v48  ;;  %v390_v3 = vadd.f32 %v385_v52, %v376_v35  ;;  %v806_v50 = vrot.slane %v2213_v37, 1 }
  0xfb   : > { %v405_v57 = vadd.f32 %v400_v33, %v391_v0  ;;  %v404_v61 = vadd.f32 %v1993_v43, %v390_v3 }
  0xfc   : > { %v524_v1 = vpop.permute.xlu1 %523  ;;  %v522_v5 = vpop.permute.xlu0 %521 }
  0xfd   : > { %v528_v59 = vadd.f32 %v524_v1, %v514_v40  ;;  %v527_v2 = vadd.f32 %v522_v5, %v513_v30 }
  0xff   : > { %v541_v7 = vadd.f32 %v536_v36, %v528_v59  ;;  %v540_v10 = vadd.f32 %v1998_v44, %v527_v2  ;;  %v633_v59 = vmul.f32 %v1842_v15, %v631_v62  ;;  %v489_v2 = vstv %s2129_s18  ;;  %s2264_s18 = sld [smem:[#allocation7 + $0x4]] }
 0x100   : > { %v2115_v8 = vpop.permute.xlu1 %644  ;;  %v643_v12 = vpop.permute.xlu0 %642  ;;  %v898_v62 = vstv %s2132_s29  ;;  %s2470_s29 = sld [smem:[#allocation9 + $0x7]] }
 0x101   : > { %v648_v33 = vadd.f32 %v643_v12, %v632_v9  ;;  %v950_v12 = vstv %s2138_s19  ;;  %s2270_s19 = sld [smem:[#allocation6 + $0x283]] }
 0x104   : > { %v2121_v23 = vpop.permute.xlu1 %658  ;;  %v657_v13 = vpop.permute.xlu0 %656 }
 0x105   : > { %v662_v43 = vadd.f32 %v657_v13, %v648_v33  ;;  %v976_v13 = vstv %s2140_s20  ;;  %2835 = sst [smem:[#allocation43_spill]] %s2264_s18 }
 0x106   : > { %s2398_s20 = sld [smem:[#allocation10 + $0x2]] }
 0x107   : > { %v675_v27 = vadd.f32 %v2009_v51, %v662_v43  ;;  %v1002_v43 = vstv %s2142_s21  ;;  %s2420_s18 = sld [smem:[#allocation9 + $0x4]] }
 0x108   : > { %v2127_v16 = vpop.permute.xlu1 %779  ;;  %v2134_v18 = vpop.permute.xlu0 %777  ;;  %s2422_s21 = sld [smem:[#allocation10 + $0x4]] }
 0x10c   : > { %v418_v36 = vpop.permute.xlu1 %417  ;;  %v416_v44 = vpop.permute.xlu0 %415 }
 0x10d   : > { %v422_v19 = vadd.f32 %v418_v36, %v405_v57  ;;  %v421_v49 = vadd.f32 %v416_v44, %v404_v61  ;;  %v847_v57 = vstv %s2172_s0  ;;  %s2252_s0 = sld [smem:[#allocation7 + $0x3]]  ;;  %v1080_v36 = vstv %s2148_s25 }
 0x10e   : > { %v2250_v9 = vmul.f32 %v1864_v24, %v847_v57  ;;  %v902_v44 = vstv %s2152_s30  ;;  %s2283_s30 = sld [smem:[#allocation6 + $0x303]] }
 0x10f   : > { %s2839_s25 = sld [smem:[#allocation35_spill]] }
 0x110   : > { %v554_v39 = vpop.permute.xlu1 %553  ;;  %v552_v51 = vpop.permute.xlu0 %551 }
 0x111   : > { %v558_v22 = vadd.f32 %v554_v39, %v541_v7  ;;  %v557_v4 = vadd.f32 %v552_v51, %v540_v10  ;;  %v848_v7 = vmul.f32 %v1872_v28, %v847_v57  ;;  %v924_v10 = vstv %s2136_s13  ;;  %s2391_s13 = sld [smem:[#allocation9 + $0x2]] }
 0x112   : > { %v649_v39 = vadd.f32 %v2115_v8, %v633_v59 }
 0x113   : > { %2834 = sst [smem:[#allocation42_spill]] %s2252_s0 }
 0x114   : > { %v2156_v47 = vpop.permute.xlu1 %793  ;;  %v2162_v55 = vpop.permute.xlu0 %791  ;;  %v663_v8 = vadd.f32 %v2121_v23, %v649_v39  ;;  %s2455_s0 = sld [smem:[#allocation9 + $0x6]] }
 0x117   : > { %2861 = sst [smem:[#allocation19_spill]] %s2391_s13 }
 0x118   : > { %v435_v42 = vpop.permute.xlu1 %434  ;;  %v433_v21 = vpop.permute.xlu0 %432 }
 0x119   : > { %v439_v56 = vadd.f32 %v435_v42, %v422_v19  ;;  %v438_v25 = vadd.f32 %v433_v21, %v421_v49  ;;  %v928_v19 = vstv %s2154_s9  ;;  %v852_v42 = vrot.slane %v848_v7, 2  ;;  %s2837_s9 = sld [smem:[#allocation33_spill]] }
 0x11a   : > { %v853_v49 = vrot.slane %v2250_v9, 2  ;;  %v980_v21 = vstv %s2160_s11  ;;  %s2841_s11 = sld [smem:[#allocation36_spill]] }
 0x11b   : > { %v2176_v54 = vadd.f32 %v448_v53, %v439_v56  ;;  %v2183_v29 = vadd.f32 %v2025_v63, %v438_v25  ;;  %v954_v56 = vstv %s2158_s10 }
 0x11c   : > { %v571_v58 = vpop.permute.xlu1 %570  ;;  %v569_v30 = vpop.permute.xlu0 %568 }
 0x11d   : > { %v575_v26 = vadd.f32 %v571_v58, %v558_v22  ;;  %v574_v32 = vadd.f32 %v569_v30, %v557_v4  ;;  %v1006_v22 = vstv %s2164_s12  ;;  %v1032_v58 = vstv %s2166_s14  ;;  %s2294_s12 = sld [smem:[#allocation6 + $0x383]] }
 0x11e   : > { %v1058_v4 = vstv %s2168_s15  ;;  %s2307_s15 = sld [smem:[#allocation9]] }
 0x11f   : > { %v2191_v45 = vadd.f32 %v583_v6, %v575_v26  ;;  %v2201_v63 = vadd.f32 %v2041_v14, %v574_v32  ;;  %v801_v6 = vmul.f32 %v1872_v28, %v800_v34  ;;  %v766_v14 = vstv %s2123_s8  ;;  %s2234_s8 = sld [smem:[#allocation6 + $0x103]] }
 0x120   : > { %v2195_v53 = vpop.permute.xlu1 %688  ;;  %v687_v35 = vpop.permute.xlu0 %686  ;;  %v767_v52 = vmul.f32 %v1872_v28, %v766_v14  ;;  %v768_v61 = vmul.f32 %v1864_v24, %v766_v14  ;;  %v1028_v28 = vstv %s2144_s22  ;;  %v1084_v26 = vstv %s2170_s16  ;;  %s2289_s22 = sld [smem:[#allocation7 + $0x6]] }
 0x121   : > { %v692_v38 = vadd.f32 %v687_v35, %v675_v27  ;;  %v805_v48 = vrot.slane %v801_v6, 1  ;;  %v1054_v27 = vstv %s2146_s23  ;;  %s2277_s23 = sld [smem:[#allocation7 + $0x5]]  ;;  %v759_v32 = vstv %s2178_s1 }
 0x122   : > { %v783_v15 = vadd.f32 %v2134_v18, %v767_v52  ;;  %v624_v18 = vstv %s2150_s27  ;;  %s2838_s27 = sld [smem:[#allocation34_spill]]  ;;  %v908_v34 = vstv %s2180_s2  ;;  %v934_v35 = vstv %s2185_s3 }
 0x123   : > { %2842 = sst [smem:[#allocation34_spill]] %s2294_s12  ;;  %v960_v6 = vstv %s2187_s4  ;;  %v854_v14 = vsel %vm446_vm1, %v852_v42, %v853_v49  ;;  %v676_v52 = vadd.f32 %v671_v41, %v663_v8  ;;  %v1090_v59 = vstv %s2841_s11 }
 0x124   : > { %v2209_v60 = vpop.permute.xlu1 %705  ;;  %v704_v40 = vpop.permute.xlu0 %703  ;;  %v797_v24 = vadd.f32 %v2162_v55, %v783_v15  ;;  %v784_v55 = vadd.f32 %v2127_v16, %v768_v61  ;;  %s2302_s16 = sld [smem:[#allocation7 + $0x7]]  ;;  %v894_v61 = vstv %s2215_s6 }
 0x125   : > { %v709_v46 = vadd.f32 %v704_v40, %v692_v38  ;;  %v986_v38 = vstv %s2193_s5  ;;  %v1012_v40 = vstv %s2837_s9  ;;  %s2844_s1 = sld [smem:[#allocation38_spill]]  ;;  %v693_v31 = vadd.f32 %v2195_v53, %v676_v52 }
 0x126   : > { %2840 = sst [smem:[#allocation33_spill]] %s2289_s22  ;;  %v798_v16 = vadd.f32 %v2156_v47, %v784_v55  ;;  %v966_v55 = vstv %s2234_s8 }
 0x127   : > { %v2231_v3 = vadd.f32 %v2050_v20, %v709_v46  ;;  %v807_v20 = vsel %vm398_vm0, %v805_v48, %v806_v50  ;;  %2836 = sst [smem:[#allocation44_spill]] %s2277_s23  ;;  %v1064_v48 = vstv %s2839_s25  ;;  %v710_v8 = vadd.f32 %v2209_v60, %v693_v31 }
 0x128   : > { %v2225_v0 = vpop.permute.xlu1 %823  ;;  %v822_v1 = vpop.permute.xlu0 %821  ;;  %v810_v30 = vadd.f32 %v807_v20, %v797_v24  ;;  %v1038_v46 = vstv %s2838_s27  ;;  %2846 = sst [smem:[#allocation38_spill]] %s2307_s15  ;;  %v914_v20 = vstv %s2217_s17 }
 0x129   : > { %s2314_s5 = sld [smem:[#allocation10]] }
 0x12a   : > { %2843 = sst [smem:[#allocation36_spill]] %s2302_s16  ;;  %v827_v47 = vadd.f32 %v822_v1, %v810_v30  ;;  %v811_v1 = vadd.f32 %v806_v50, %v798_v16  ;;  %v992_v30 = vstv %s2242_s7 }
 0x12b   : > { %v940_v39 = vstv %s2844_s1  ;;  %s2371_s25 = sld [smem:[#allocation9 + $0x1]] }
 0x12c   : > { %v466_v5 = vpop.permute.xlu1 %465  ;;  %v464_v33 = vpop.permute.xlu0 %463  ;;  %v828_v37 = vadd.f32 %v2225_v0, %v811_v1  ;;  %s2381_s23 = sld [smem:[#allocation10 + $0x1]] }
 0x12d   : > { %v470_v7 = vadd.f32 %v466_v5, %v2176_v54  ;;  %v469_v50 = vadd.f32 %v464_v33, %v2183_v29  ;;  %s2448_s15 = sld [smem:[#allocation10 + $0x5]] }
 0x12e   : > { %s2460_s2 = sld [smem:[#allocation10 + $0x6]] }
 0x12f   : > { %2847 = sst [smem:[#allocation45_spill]] %s2314_s5 }
 0x130   : > { %v2273_v51 = vpop.permute.xlu1 %600  ;;  %v599_v25 = vpop.permute.xlu0 %598  ;;  %s2418_s5 = sld [smem:[#allocation10 + $0x3]] }
 0x131   : > { %2854 = sst [smem:[#allocation18_spill]] %s2371_s25 }
 0x132   : > { %s2480_s22 = sld [smem:[#allocation10 + $0x7]] }
 0x133   : > { %s2868_s3 = sld [smem:[#allocation37_spill]] }
 0x134   : > { %v841_v23 = vpop.permute.xlu1 %840  ;;  %v839_v57 = vpop.permute.xlu0 %838  ;;  %s2869_s4 = sld [smem:[#allocation39_spill]] }
 0x135   : > { %v844_v15 = vadd.f32 %v839_v57, %v827_v47  ;;  %v845_v52 = vadd.f32 %v841_v23, %v828_v37  ;;  %v604_v37 = vadd.f32 %v599_v25, %v2201_v63  ;;  %s2870_s27 = sld [smem:[#allocation40_spill]] }
 0x136   : > { %2863 = sst [smem:[#allocation21_spill]] %s2418_s5 }
 0x137   : > { %v2326_v5 = vadd.f32 %v854_v14, %v844_v15  ;;  %v605_v15 = vadd.f32 %v2273_v51, %v2191_v45  ;;  %v2355_v63 = vadd.f32 %v853_v49, %v845_v52  ;;  %s2872_s9 = sld [smem:[#allocation42_spill]] }
 0x138   : > { %v483_v41 = vpop.permute.xlu1 %482  ;;  %v481_v53 = vpop.permute.xlu0 %480  ;;  %s2874_s11 = sld [smem:[#allocation43_spill]] }
 0x139   : > { %v487_v54 = vadd.f32 %v483_v41, %v470_v7  ;;  %v486_v57 = vadd.f32 %v481_v53, %v469_v50  ;;  %s2876_s6 = sld [smem:[#allocation44_spill]] }
 0x13a   : > { %s2878_s10 = sld [smem:[#allocation33_spill]] }
 0x13b   : > { %v491_v0 = vadd.f32 %v489_v2, %v487_v54  ;;  %v723_v54 = vadd.f32 %v718_v17, %v710_v8  ;;  %v490_v45 = vadd.f32 %v489_v2, %v486_v57  ;;  %s2879_s14 = sld [smem:[#allocation36_spill]] }
 0x13c   : > { %v618_v33 = vpop.permute.xlu1 %617  ;;  %v616_v50 = vpop.permute.xlu0 %615  ;;  %s2880_s16 = sld [smem:[#allocation17_spill]] }
 0x13d   : > { %v900_v14 = vmul.f32 %v898_v62, %v491_v0  ;;  %v622_v51 = vadd.f32 %v618_v33, %v605_v15  ;;  %v926_v25 = vmul.f32 %v924_v10, %v491_v0  ;;  %v952_v11 = vmul.f32 %v950_v12, %v491_v0  ;;  %s2881_s7 = sld [smem:[#allocation38_spill]] }
 0x13e   : > { %v978_v17 = vmul.f32 %v976_v13, %v491_v0  ;;  %v621_v8 = vadd.f32 %v616_v50, %v604_v37  ;;  %v1004_v2 = vmul.f32 %v1002_v43, %v491_v0  ;;  %v1030_v57 = vmul.f32 %v1028_v28, %v491_v0 }
 0x13f   : > { %v1056_v9 = vmul.f32 %v1054_v27, %v491_v0  ;;  %v1082_v49 = vmul.f32 %v1080_v36, %v491_v0  ;;  %v899_v52 = vmul.f32 %v898_v62, %v490_v45  ;;  %v925_v33 = vmul.f32 %v924_v10, %v490_v45 }
 0x140   : > { %v736_v60 = vpop.permute.xlu1 %735  ;;  %v951_v15 = vmul.f32 %v950_v12, %v490_v45  ;;  %v977_v37 = vmul.f32 %v976_v13, %v490_v45  ;;  %v734_v50 = vpop.permute.xlu0 %733  ;;  %v1003_v53 = vmul.f32 %v1002_v43, %v490_v45  ;;  %v1029_v0 = vmul.f32 %v1028_v28, %v490_v45 }
 0x141   : > { %v1055_v62 = vmul.f32 %v1054_v27, %v490_v45  ;;  %v626_v10 = vadd.f32 %v624_v18, %v622_v51  ;;  %v1081_v12 = vmul.f32 %v1080_v36, %v490_v45  ;;  %v625_v13 = vadd.f32 %v624_v18, %v621_v8 }
 0x142   : > { %v740_v41 = vadd.f32 %v736_v60, %v723_v54  ;;  %v739_v23 = vadd.f32 %v734_v50, %v2231_v3 }
 0x143   : > { %v904_v28 = vmul.f32 %v902_v44, %v626_v10  ;;  %v930_v27 = vmul.f32 %v928_v19, %v626_v10  ;;  %v956_v47 = vmul.f32 %v954_v56, %v626_v10  ;;  %v982_v51 = vmul.f32 %v980_v21, %v626_v10 }
 0x144   : > { %v753_v43 = vpop.permute.xlu1 %752  ;;  %v1008_v36 = vmul.f32 %v1006_v22, %v626_v10  ;;  %v1034_v18 = vmul.f32 %v1032_v58, %v626_v10  ;;  %v1060_v3 = vmul.f32 %v1058_v4, %v626_v10  ;;  %v1086_v60 = vmul.f32 %v1084_v26, %v626_v10  ;;  %v751_v54 = vpop.permute.xlu0 %750 }
 0x145   : > { %v906_v45 = vadd.f32 %v904_v28, %v900_v14  ;;  %v932_v8 = vadd.f32 %v930_v27, %v926_v25  ;;  %v958_v50 = vadd.f32 %v956_v47, %v952_v11  ;;  %v984_v16 = vadd.f32 %v982_v51, %v978_v17 }
 0x146   : > { %v1010_v42 = vadd.f32 %v1008_v36, %v1004_v2  ;;  %v1036_v24 = vadd.f32 %v1034_v18, %v1030_v57  ;;  %v1062_v31 = vadd.f32 %v1060_v3, %v1056_v9  ;;  %v1088_v7 = vadd.f32 %v1086_v60, %v1082_v49 }
 0x147   : > { %v903_v1 = vmul.f32 %v902_v44, %v625_v13  ;;  %v929_v29 = vmul.f32 %v928_v19, %v625_v13  ;;  %v955_v14 = vmul.f32 %v954_v56, %v625_v13  ;;  %v981_v25 = vmul.f32 %v980_v21, %v625_v13 }
 0x148   : > { %v871_v10 = vpop.permute.xlu1 %870  ;;  %v1007_v47 = vmul.f32 %v1006_v22, %v625_v13  ;;  %v1033_v11 = vmul.f32 %v1032_v58, %v625_v13  ;;  %v1059_v17 = vmul.f32 %v1058_v4, %v625_v13  ;;  %v1085_v2 = vmul.f32 %v1084_v26, %v625_v13  ;;  %v869_v57 = vpop.permute.xlu0 %868 }
 0x149   : > { %v905_v9 = vadd.f32 %v903_v1, %v899_v52  ;;  %v931_v44 = vadd.f32 %v929_v29, %v925_v33  ;;  %v957_v19 = vadd.f32 %v955_v14, %v951_v15  ;;  %v983_v49 = vadd.f32 %v981_v25, %v977_v37 }
 0x14a   : > { %v1009_v56 = vadd.f32 %v1007_v47, %v1003_v53  ;;  %v1035_v21 = vadd.f32 %v1033_v11, %v1029_v0  ;;  %v1061_v28 = vadd.f32 %v1059_v17, %v1055_v62  ;;  %v1087_v22 = vadd.f32 %v1085_v2, %v1081_v12 }
 0x14b   : > { %v757_v58 = vadd.f32 %v753_v43, %v740_v41  ;;  %v756_v27 = vadd.f32 %v751_v54, %v739_v23  ;;  %v1120_v4 = vstv %s2371_s25  ;;  %v1124_v26 = vstv %s2381_s23 }
 0x14c   : > { %v888_v29 = vpop.permute.xlu1 %887  ;;  %v875_v1 = vadd.f32 %v871_v10, %v2355_v63  ;;  %v874_v53 = vadd.f32 %v869_v57, %v2326_v5  ;;  %v1133_v52 = vstv %s2391_s13  ;;  %v1137_v33 = vstv %s2398_s20  ;;  %v886_v23 = vpop.permute.xlu0 %885  ;;  %s2895_s13 = sld [smem:[#allocation34_spill]] }
 0x14d   : > { %v761_v41 = vadd.f32 %v759_v32, %v757_v58  ;;  %v1146_v15 = vstv %s2408_s28  ;;  %v1150_v37 = vstv %s2418_s5  ;;  %v1159_v63 = vstv %s2420_s18  ;;  %s2893_s28 = sld [smem:[#allocation53_spill]] }
 0x14e   : > { %v760_v5 = vadd.f32 %v759_v32, %v756_v27  ;;  %v1163_v0 = vstv %s2422_s21  ;;  %v892_v62 = vadd.f32 %v888_v29, %v875_v1  ;;  %v891_v12 = vadd.f32 %v886_v23, %v874_v53 }
 0x14f   : > { %v910_v13 = vmul.f32 %v908_v34, %v761_v41  ;;  %v936_v43 = vmul.f32 %v934_v35, %v761_v41  ;;  %v962_v51 = vmul.f32 %v960_v6, %v761_v41  ;;  %v988_v36 = vmul.f32 %v986_v38, %v761_v41 }
 0x150   : > { %v1014_v32 = vmul.f32 %v1012_v40, %v761_v41  ;;  %v1040_v18 = vmul.f32 %v1038_v46, %v761_v41  ;;  %v1066_v3 = vmul.f32 %v1064_v48, %v761_v41  ;;  %v1092_v60 = vmul.f32 %v1090_v59, %v761_v41 }
 0x151   : > { %v912_v54 = vadd.f32 %v910_v13, %v906_v45  ;;  %v938_v10 = vadd.f32 %v936_v43, %v932_v8  ;;  %v964_v14 = vadd.f32 %v962_v51, %v958_v50  ;;  %v990_v25 = vadd.f32 %v988_v36, %v984_v16 }
 0x152   : > { %v1016_v47 = vadd.f32 %v1014_v32, %v1010_v42  ;;  %v1042_v11 = vadd.f32 %v1040_v18, %v1036_v24  ;;  %v1068_v17 = vadd.f32 %v1066_v3, %v1062_v31  ;;  %v1094_v2 = vadd.f32 %v1092_v60, %v1088_v7 }
 0x153   : > { %v909_v57 = vmul.f32 %v908_v34, %v760_v5  ;;  %v935_v58 = vmul.f32 %v934_v35, %v760_v5  ;;  %v961_v27 = vmul.f32 %v960_v6, %v760_v5  ;;  %v987_v29 = vmul.f32 %v986_v38, %v760_v5 }
 0x154   : > { %v1013_v45 = vmul.f32 %v1012_v40, %v760_v5  ;;  %v1039_v42 = vmul.f32 %v1038_v46, %v760_v5  ;;  %v1065_v24 = vmul.f32 %v1064_v48, %v760_v5  ;;  %v1091_v34 = vmul.f32 %v1090_v59, %v760_v5 }
 0x155   : > { %v2498_v35 = vadd.f32 %v909_v57, %v905_v9  ;;  %v2500_v6 = vadd.f32 %v935_v58, %v931_v44  ;;  %v2502_v38 = vadd.f32 %v961_v27, %v957_v19  ;;  %v2504_v40 = vadd.f32 %v987_v29, %v983_v49 }
 0x156   : > { %v2506_v46 = vadd.f32 %v1013_v45, %v1009_v56  ;;  %v2508_v16 = vadd.f32 %v1039_v42, %v1035_v21  ;;  %v2510_v48 = vadd.f32 %v1065_v24, %v1061_v28  ;;  %v2512_v59 = vadd.f32 %v1091_v34, %v1087_v22 }
 0x157   : > { %v1172_v7 = vstv %s2442_s24  ;;  %v1176_v31 = vstv %s2448_s15  ;;  %v1185_v8 = vstv %s2455_s0  ;;  %v896_v50 = vadd.f32 %v894_v61, %v892_v62 }
 0x158   : > { %v1189_v9 = vstv %s2460_s2  ;;  %v1198_v44 = vstv %s2470_s29  ;;  %v1202_v19 = vstv %s2480_s22  ;;  %v2524_v49 = vadd.f32 %v894_v61, %v891_v12 }
 0x159   : > { %v916_v56 = vmul.f32 %v914_v20, %v896_v50  ;;  %v942_v21 = vmul.f32 %v940_v39, %v896_v50  ;;  %v968_v28 = vmul.f32 %v966_v55, %v896_v50  ;;  %v994_v22 = vmul.f32 %v992_v30, %v896_v50 }
 0x15a   : > { %v2871_v1 = vstv %s2258_s26  ;;  %v2873_v23 = vstv %s2270_s19  ;;  %v2875_v61 = vstv %s2283_s30  ;;  %v2877_v62 = vstv %s2294_s12  ;;  %s2885_s12 = sld [smem:[#allocation45_spill]] }
 0x15b   : > { %v1020_v53 = vmul.f32 %v2871_v1, %v896_v50  ;;  %v1046_v41 = vmul.f32 %v2873_v23, %v896_v50  ;;  %v1072_v5 = vmul.f32 %v2875_v61, %v896_v50  ;;  %v1098_v12 = vmul.f32 %v2877_v62, %v896_v50 }
 0x15c   : > { %v918_v13 = vadd.f32 %v916_v56, %v912_v54  ;;  %v944_v43 = vadd.f32 %v942_v21, %v938_v10  ;;  %v970_v51 = vadd.f32 %v968_v28, %v964_v14  ;;  %v996_v36 = vadd.f32 %v994_v22, %v990_v25 }
 0x15d   : > { %v1022_v32 = vadd.f32 %v1020_v53, %v1016_v47  ;;  %v1048_v18 = vadd.f32 %v1046_v41, %v1042_v11  ;;  %v1074_v3 = vadd.f32 %v1072_v5, %v1068_v17  ;;  %v1100_v60 = vadd.f32 %v1098_v12, %v1094_v2 }
 0x15e   : > { %v2882_v57 = vstv %s2868_s3  ;;  %v2883_v27 = vstv %s2869_s4  ;;  %v2884_v29 = vstv %s2870_s27  ;;  %v2886_v14 = vstv %s2872_s9  ;;  %s1459_s4 = sshll.u32 %s2880_s16, 7 }
 0x15f   : > { %v922_v58 = vadd.f32 %v2882_v57, %v918_v13  ;;  %v948_v54 = vadd.f32 %v2883_v27, %v944_v43  ;;  %v974_v10 = vadd.f32 %v2884_v29, %v970_v51  ;;  %v1000_v25 = vadd.f32 %v2886_v14, %v996_v36  ;;  %s2586_s25 = scalar_lea.vmem %s2893_s28, %s1459_s4  ;;  %s2896_s28 = sld [smem:[#allocation39_spill]] }
 0x160   : > { %v2887_v45 = vstv %s2874_s11  ;;  %v2888_v11 = vstv %s2876_s6  ;;  %v2889_v42 = vstv %s2878_s10  ;;  %v2890_v24 = vstv %s2879_s14 }
 0x161   : > { %v1026_v47 = vadd.f32 %v2887_v45, %v1022_v32  ;;  %v1052_v17 = vadd.f32 %v2888_v11, %v1048_v18  ;;  %v1078_v2 = vadd.f32 %v2889_v42, %v1074_v3  ;;  %v1104_v34 = vadd.f32 %v2890_v24, %v1100_v60 }
 0x162   : > { %v2891_v50 = vstv %s2881_s7  ;;  %v1122_v21 = vmul.f32 %v1120_v4, %v948_v54  ;;  %v1135_v28 = vmul.f32 %v1133_v52, %v974_v10  ;;  %v1148_v22 = vmul.f32 %v1146_v15, %v1000_v25 }
 0x163   : > { %v1108_v56 = vmul.f32 %v2891_v50, %v922_v58  ;;  %v1161_v1 = vmul.f32 %v1159_v63, %v1026_v47  ;;  %v1174_v53 = vmul.f32 %v1172_v7, %v1052_v17  ;;  %v1187_v23 = vmul.f32 %v1185_v8, %v1078_v2 }
 0x164   : > { %v1200_v41 = vmul.f32 %v1198_v44, %v1104_v34  ;;  %v2892_v61 = vstv %s2885_s12  ;;  %v1126_v62 = vadd.f32 %v1124_v26, %v1122_v21  ;;  %v1139_v12 = vadd.f32 %v1137_v33, %v1135_v28 }
 0x165   : > { %v1112_v5 = vadd.f32 %v2892_v61, %v1108_v56  ;;  %v1152_v13 = vadd.f32 %v1150_v37, %v1148_v22  ;;  %v1165_v43 = vadd.f32 %v1163_v0, %v1161_v1  ;;  %v1178_v51 = vadd.f32 %v1176_v31, %v1174_v53 }
 0x166   : > { %v1191_v36 = vadd.f32 %v1189_v9, %v1187_v23  ;;  %v1204_v32 = vadd.f32 %v1202_v19, %v1200_v41  ;;  %v1128_v3 = vmax.f32 %v1126_v62, 0.0  ;;  %v1141_v60 = vmax.f32 %v1139_v12, 0.0 }
 0x167   : > { %v1114_v18 = vmax.f32 %v1112_v5, 0.0  ;;  %v1154_v57 = vmax.f32 %v1152_v13, 0.0  ;;  %v1167_v58 = vmax.f32 %v1165_v43, 0.0  ;;  %v1180_v27 = vmax.f32 %v1178_v51, 0.0 }
 0x168   : > { %v1193_v54 = vmax.f32 %v1191_v36, 0.0  ;;  %v1206_v29 = vmax.f32 %v1204_v32, 0.0  ;;  %1431 = vst.msk [vmem:[%s2586_s25 + $0x18] sm:$0x3f] %vm1117_vm2, %v1128_v3  ;;  %1435 = vst.msk [vmem:[%s2586_s25 + $0x28] sm:$0x3f] %vm1117_vm2, %v1141_v60  ;;  %v915_v10 = vmul.f32 %v914_v20, %v2524_v49  ;;  %v941_v14 = vmul.f32 %v940_v39, %v2524_v49 }
 0x169   : > { %1118 = vst.msk [vmem:[%s2586_s25 + $0x8] sm:$0x3f] %vm1117_vm2, %v1114_v18  ;;  %1439 = vst.msk [vmem:[%s2586_s25 + $0x38] sm:$0x3f] %vm1117_vm2, %v1154_v57  ;;  %v967_v25 = vmul.f32 %v966_v55, %v2524_v49  ;;  %v993_v45 = vmul.f32 %v992_v30, %v2524_v49  ;;  %v2897_v20 = vstv %s2258_s26  ;;  %v2898_v55 = vstv %s2270_s19 }
 0x16a   : > { %1443 = vst.msk [vmem:[%s2586_s25 + $0x48] sm:$0x3f] %vm1117_vm2, %v1167_v58  ;;  %1447 = vst.msk [vmem:[%s2586_s25 + $0x58] sm:$0x3f] %vm1117_vm2, %v1180_v27  ;;  %v1019_v39 = vmul.f32 %v2897_v20, %v2524_v49  ;;  %v1045_v30 = vmul.f32 %v2898_v55, %v2524_v49  ;;  %v2899_v47 = vstv %s2283_s30  ;;  %v2900_v17 = vstv %s2895_s13 }
 0x16b   : > { %1451 = vst.msk [vmem:[%s2586_s25 + $0x68] sm:$0x3f] %vm1117_vm2, %v1193_v54  ;;  %1455 = vst.msk [vmem:[%s2586_s25 + $0x78] sm:$0x3f] %vm1117_vm2, %v1206_v29  ;;  %v1071_v11 = vmul.f32 %v2899_v47, %v2524_v49  ;;  %v1097_v42 = vmul.f32 %v2900_v17, %v2524_v49  ;;  %v917_v2 = vadd.f32 %v915_v10, %v2498_v35  ;;  %v2904_v28 = vstv %s2868_s3 }
 0x16c   : > { %v943_v24 = vadd.f32 %v941_v14, %v2500_v6  ;;  %v969_v34 = vadd.f32 %v967_v25, %v2502_v38  ;;  %v995_v50 = vadd.f32 %v993_v45, %v2504_v40  ;;  %v1021_v56 = vadd.f32 %v1019_v39, %v2506_v46 }
 0x16d   : > { %v1047_v21 = vadd.f32 %v1045_v30, %v2508_v16  ;;  %v1073_v49 = vadd.f32 %v1071_v11, %v2510_v48  ;;  %v1099_v35 = vadd.f32 %v1097_v42, %v2512_v59  ;;  %v921_v6 = vadd.f32 %v2904_v28, %v917_v2 }
 0x16e   : > { %v2905_v22 = vstv %s2896_s28  ;;  %v2906_v1 = vstv %s2870_s27  ;;  %v2907_v53 = vstv %s2872_s9  ;;  %v2908_v23 = vstv %s2874_s11 }
 0x16f   : > { %v947_v38 = vadd.f32 %v2905_v22, %v943_v24  ;;  %v973_v40 = vadd.f32 %v2906_v1, %v969_v34  ;;  %v999_v46 = vadd.f32 %v2907_v53, %v995_v50  ;;  %v1025_v16 = vadd.f32 %v2908_v23, %v1021_v56 }
 0x170   : > { %v2910_v41 = vstv %s2876_s6  ;;  %v2911_v61 = vstv %s2878_s10  ;;  %v2912_v5 = vstv %s2879_s14  ;;  %v2913_v12 = vstv %s2881_s7 }
 0x171   : > { %v1051_v48 = vadd.f32 %v2910_v41, %v1047_v21  ;;  %v1077_v59 = vadd.f32 %v2911_v61, %v1073_v49  ;;  %v1103_v62 = vadd.f32 %v2912_v5, %v1099_v35  ;;  %v1107_v13 = vmul.f32 %v2913_v12, %v921_v6 }
 0x172   : > { %v1121_v43 = vmul.f32 %v1120_v4, %v947_v38  ;;  %v1134_v51 = vmul.f32 %v1133_v52, %v973_v40  ;;  %v1147_v36 = vmul.f32 %v1146_v15, %v999_v46  ;;  %v1160_v32 = vmul.f32 %v1159_v63, %v1025_v16 }
 0x173   : > { %v1173_v18 = vmul.f32 %v1172_v7, %v1051_v48  ;;  %v1186_v3 = vmul.f32 %v1185_v8, %v1077_v59  ;;  %v1199_v60 = vmul.f32 %v1198_v44, %v1103_v62  ;;  %v2914_v57 = vstv %s2885_s12 }
 0x174   : > { %v1111_v58 = vadd.f32 %v2914_v57, %v1107_v13  ;;  %v1125_v27 = vadd.f32 %v1124_v26, %v1121_v43  ;;  %v1138_v4 = vadd.f32 %v1137_v33, %v1134_v51  ;;  %v1151_v52 = vadd.f32 %v1150_v37, %v1147_v36 }
 0x175   : > { %v1164_v15 = vadd.f32 %v1163_v0, %v1160_v32  ;;  %v1177_v63 = vadd.f32 %v1176_v31, %v1173_v18  ;;  %v1190_v7 = vadd.f32 %v1189_v9, %v1186_v3  ;;  %v1203_v8 = vadd.f32 %v1202_v19, %v1199_v60 }
 0x176   : > { %v1113_v26 = vmax.f32 %v1111_v58, 0.0  ;;  %v1127_v44 = vmax.f32 %v1125_v27, 0.0  ;;  %v1140_v54 = vmax.f32 %v1138_v4, 0.0  ;;  %v1153_v33 = vmax.f32 %v1151_v52, 0.0 }
 0x177   : > { %v1166_v29 = vmax.f32 %v1164_v15, 0.0  ;;  %v1179_v10 = vmax.f32 %v1177_v63, 0.0  ;;  %v1192_v37 = vmax.f32 %v1190_v7, 0.0  ;;  %v1205_v14 = vmax.f32 %v1203_v8, 0.0 }
 0x178   : > { %1116 = vst.msk [vmem:[%s2586_s25] sm:$0xff] %vm1115_vm3, %v1113_v26  ;;  %1430 = vst.msk [vmem:[%s2586_s25 + $0x10] sm:$0xff] %vm1115_vm3, %v1127_v44 }
 0x179   : > { %1434 = vst.msk [vmem:[%s2586_s25 + $0x20] sm:$0xff] %vm1115_vm3, %v1140_v54  ;;  %1438 = vst.msk [vmem:[%s2586_s25 + $0x30] sm:$0xff] %vm1115_vm3, %v1153_v33 }
 0x17a   : > { %1442 = vst.msk [vmem:[%s2586_s25 + $0x40] sm:$0xff] %vm1115_vm3, %v1166_v29  ;;  %1446 = vst.msk [vmem:[%s2586_s25 + $0x50] sm:$0xff] %vm1115_vm3, %v1179_v10 }
 0x17b   : > { %1450 = vst.msk [vmem:[%s2586_s25 + $0x60] sm:$0xff] %vm1115_vm3, %v1192_v37  ;;  %1454 = vst.msk [vmem:[%s2586_s25 + $0x70] sm:$0xff] %vm1115_vm3, %v1205_v14 }
 0x17c PF: > { %s2915_s7 = sld [smem:[#allocation16_spill]] }
 0x182   : > { %s21_s24 = sadd.s32 1, %s2915_s7  }
 0x183   : > { %p18_p11 = scmp.ge.s32.totalorder %s21_s24, 4  }
 0x185   :  { %20 = sbr.rel (!%p18_p11) target bundleno = 13 (0xd), region = 113 }
 0x18a   :  { %1231 = vsyncpa [#allocation3], 1 }
 0x18b   :  { %1233 = vsyncpa [#allocation3 + $0x1], 1 }
 0x18c   :  { %1234 = vsyncpa [#allocation5], 1 }
 0x18d   :  { %1235 = vsyncpa [#allocation8], 1 }
 0x18e   :  { %1236 = vsyncpa [#allocation11], 1 }

// kernel: dsconv2d.2
= control target key start
LH: loop header
LB: loop body
LE: loop exit
PB: predicated region body
PF: predicated region fallthrough
CT: control target
= control target key end

     0   :  { %s2979_s0 = inlined_call_operand.hbm [shape: f32[2,4,16,16], index: 0, kind: input, shape index: {}]   ;;  %s2980_s1 = inlined_call_operand.vmem [shape: f32[4,9], index: 1, kind: input, shape index: {}]   ;;  %s2981_s2 = inlined_call_operand.vmem [shape: f32[4], index: 2, kind: input, shape index: {}]   ;;  %s2982_s3 = inlined_call_operand.vmem [shape: f32[8,4], index: 3, kind: input, shape index: {}]   ;;  %s2983_s4 = inlined_call_operand.vmem [shape: f32[8], index: 4, kind: input, shape index: {}]   ;;  %s2984_s5 = inlined_call_operand.vmem [shape: f32[2,8,14], index: 5, kind: output, shape index: {0}]   ;;  %s2985_s6 = inlined_call_operand.vmem [shape: f32[2,8,14], index: 6, kind: output, shape index: {1}]  }
   0x1   :  { %3040 = sst [smem:[#allocation43_spill]] %s2979_s0 }
   0x2   :  { %3041 = sst [smem:[#allocation44_spill]] %s2980_s1 }
   0x3   :  { %3042 = sst [smem:[#allocation45_spill]] %s2981_s2 }
   0x4   :  { %3043 = sst [smem:[#allocation46_spill]] %s2982_s3 }
   0x5   :  { %3044 = sst [smem:[#allocation47_spill]] %s2983_s4 }
   0x6   :  { %3045 = sst [smem:[#allocation48_spill]] %s2984_s5 }
   0x7   :  { %3046 = sst [smem:[#allocation49_spill]] %s2985_s6 }
   0x8   :  { %12 = vsyncpa [#allocation3], 0 }
   0x9   :  { %14 = vsyncpa [#allocation3 + $0x1], 0 }
   0xa   :  { %15 = vsyncpa [#allocation4], 0 }
   0xb   :  { %16 = vsyncpa [#allocation7], 0 }
   0xc   :  { %17 = vsyncpa [#allocation10], 0  ;;  %s1813_s21 = smov 0   ;;  %s1815_s22 = smov 0  }
   0xd   :  { %s1817_s23 = smov 0   ;;  %s1819_s24 = smov 0  }
   0xe LB: > { %3047 = sst [smem:[#allocation15_spill]] %s1759_s22  ;;  %s1832_s25 = sadd.s32 4294967295, %s1767_s24   ;;  %s1767_s24 = sphi %s1819_s24, %s3136_s24   ;;  %s1763_s23 = sphi %s1817_s23, %s3139_s23   ;;  %s1759_s22 = sphi %s1815_s22, %s3138_s22   ;;  %s1755_s21 = sphi %s1813_s21, %s3137_s21  }
   0xf   : > { %3048 = sst [smem:[#allocation16_spill]] %s1763_s23  ;;  %p43_p0 = scmp.ne.s32.totalorder %s1759_s22, %s1755_s21 }
  0x10   : > { %3049 = sst [smem:[#allocation17_spill]] %s1832_s25  ;;  %p2986_p1 = scmp.eq.s32.totalorder %s1832_s25, 0 }
  0x11   : > { %p1447_p2 = scmp.ge.s32.totalorder %s1767_s24, 1  ;;  %p190_p3 = scmp.lt.s32.totalorder %s1767_s24, 3 }
  0x12   : > { %p1840_p4 = por %p2986_p1, %p43_p0  ;;  %s3051_s2 = sld [smem:[#allocation45_spill]] }
  0x13   : > { %p1847_p5 = pnand %p1447_p2, %p190_p3  ;;  %s3053_s1 = sld [smem:[#allocation44_spill]] }
  0x14   : > { %s3050_s26 = scalar_select %p1840_p4, 1, 0 }
  0x15   : > { %s3052_s30 = scalar_select %p1847_p5, 1, 0 }
  0x16   : > { %p1567_p6 = pneg %p1847_p5  ;;  %s3055_s3 = sld [smem:[#allocation46_spill]] }
  0x17   : > { %s3056_s4 = sld [smem:[#allocation47_spill]] }
  0x18   : > { %s214_s29 = sshll.u32 %s3051_s2, 4  ;;  %p1858_p7 = pnand %p1567_p6, %p2986_p1  ;;  %s215_s29 = int_to_ptr.vmem [resolvable:$true] %s214_s29 }
  0x19   : > { %s203_s9 = sshll.u32 %s3053_s1, 4  ;;  %s1633_s17 = scalar_lea.vmem %s215_s29, 16  ;;  %s204_s9 = int_to_ptr.vmem [resolvable:$true] %s203_s9 }
  0x1a   : > { %p1634_p8 = scmp.ne.s32.totalorder %s215_s29, %s1633_s17  ;;  %p1635_p9 = pneg %p1858_p7 }
  0x1b   : > { %p1641_p12 = scmp.lt.s32.totalorder %s215_s29, %s215_s29  ;;  %p1642_p13 = scmp.lt.s32.totalorder %s1633_s17, %s1633_s17 }
  0x1c   : > { %s225_s13 = sshll.u32 %s3055_s3, 4  ;;  %p1636_p10 = pnand %p1635_p9, %p1634_p8  ;;  %s1865_s13 = int_to_ptr.vmem [resolvable:$true] %s225_s13 }
  0x1d   : > { %s236_s16 = sshll.u32 %s3056_s4, 4  ;;  %p1643_p0 = por %p1642_p13, %p1641_p12  ;;  %s237_s16 = int_to_ptr.vmem [resolvable:$true] %s236_s16 }
  0x1e   : > { %p1637_p11 = pneg %p1636_p10 }
  0x20   : > { %p1644_p2 = pnand %p1643_p0, %p1637_p11 }
  0x22   : > { %1647 = shalt.err (!%p1644_p2)
}
  0x23   : > { %s1769_s18 = smov [#allocation6]   ;;  %s1648_s19 = scalar_lea.vmem %s204_s9, 64 }
  0x24   : > { %1573 = dma.vmem_to_smem (!%p1858_p7), %s215_s29, 16, %s1769_s18, [#allocation7]  }
  0x25   : > { %p1649_p3 = scmp.ne.s32.totalorder %s204_s9, %s1648_s19  ;;  %p1656_p4 = scmp.lt.s32.totalorder %s204_s9, %s204_s9 }
  0x26   : > { %p1657_p5 = scmp.lt.s32.totalorder %s1648_s19, %s1648_s19 }
  0x27   : > { %p1651_p6 = pnand %p1649_p3, %p1635_p9 }
  0x28   : > { %p1658_p8 = por %p1657_p5, %p1656_p4 }
  0x29   : > { %p1652_p1 = pneg %p1651_p6 }
  0x2b   : > { %p1659_p10 = pnand %p1658_p8, %p1652_p1 }
  0x2d   : > { %1662 = shalt.err (!%p1659_p10)
}
  0x2e   : > { %s1770_s20 = smov [#allocation5]   ;;  %s1663_s21 = scalar_lea.vmem %s1865_s13, 128 }
  0x2f   : > { %1570 = dma.vmem_to_smem (!%p1858_p7), %s204_s9, 64, %s1770_s20, [#allocation4]  }
  0x30   : > { %p1664_p11 = scmp.ne.s32.totalorder %s1865_s13, %s1663_s21  ;;  %p1671_p0 = scmp.lt.s32.totalorder %s1865_s13, %s1865_s13 }
  0x31   : > { %p1672_p2 = scmp.lt.s32.totalorder %s1663_s21, %s1663_s21 }
  0x32   : > { %p1666_p12 = pnand %p1664_p11, %p1635_p9 }
  0x33   : > { %p1673_p4 = por %p1672_p2, %p1671_p0 }
  0x34   : > { %p1667_p13 = pneg %p1666_p12 }
  0x36   : > { %p1674_p1 = pnand %p1673_p4, %p1667_p13 }
  0x38   : > { %1677 = shalt.err (!%p1674_p1)
}
  0x39   : > { %s1771_s27 = smov [#allocation8]   ;;  %s1678_s7 = scalar_lea.vmem %s237_s16, 16 }
  0x3a   : > { %1576 = dma.vmem_to_smem (!%p1858_p7), %s1865_s13, 128, %s1771_s27, [#allocation7]  }
  0x3b   : > { %p1679_p5 = scmp.ne.s32.totalorder %s237_s16, %s1678_s7  ;;  %p1686_p8 = scmp.lt.s32.totalorder %s237_s16, %s237_s16 }
  0x3c   : > { %p1687_p10 = scmp.lt.s32.totalorder %s1678_s7, %s1678_s7 }
  0x3d   : > { %p1681_p3 = pnand %p1679_p5, %p1635_p9 }
  0x3e   : > { %p1688_p11 = por %p1687_p10, %p1686_p8 }
  0x3f   : > { %p1682_p6 = pneg %p1681_p3 }
  0x41   : > { %p1689_p12 = pnand %p1688_p11, %p1682_p6 }
  0x43   : > { %1692 = shalt.err (!%p1689_p12)
}
  0x44   : > { %s1772_s8 = smov [#allocation9]   ;;  %s1902_s9 = sadd.s32 1, %s1767_s24  }
  0x45   : > { %1579 = dma.vmem_to_smem (!%p1858_p7), %s237_s16, 16, %s1772_s8, [#allocation10]  }
  0x46   : > { %3057 = sst [smem:[#allocation18_spill]] %s1902_s9  ;;  %s27_s11 = ssub.s32 %s1767_s24, %s1902_s9 }
  0x47   : > { %p28_p9 = scmp.eq.s32.totalorder %s27_s11, 0  ;;  %s30_s12 = sadd.s32 1, %s1763_s23 }
  0x48   : > { %p37_p13 = scmp.ne.s32.totalorder %s1763_s23, %s1759_s22  ;;  %p38_p0 = scmp.eq.s32.totalorder %s1767_s24, 0 }
  0x49   : > { %s1911_s10 = scalar_select %p28_p9, %s1763_s23, %s30_s12  }
  0x4a   : > { %p39_p2 = por %p38_p0, %p37_p13  ;;  %p1588_p4 = scmp.lt.s32.totalorder %s1767_s24, 2 }
  0x4b   : > { %3058 = sst [smem:[#allocation19_spill]] %s1911_s10  ;;  %s247_s13 = sand.u32 1, %s1763_s23  }
  0x4c   : > { %s1548_s14 = sshll.u32 %s1767_s24, 10  ;;  %s1453_s15 = sshll.u32 %s247_s13, 6 }
  0x4d   : > { %s3059_s0 = sld [smem:[#allocation43_spill]]  ;;  %s251_s16 = scalar_lea.vmem [#allocation2], %s1453_s15 }
  0x4e   : > { %s258_s20 = sshll.u32 %s251_s16, 4  ;;  %p1921_p7 = pnand %p1588_p4, %p39_p2  ;;  %s1925_s20 = int_to_ptr.vmem [resolvable:$true] %s258_s20 }
  0x4f   : > { %s1927_s27 = scalar_lea.sflag [#allocation3], %s247_s13 }
  0x50   : > { %p1695_p5 = pneg %p1921_p7 }
  0x53   : > { %s1919_s19 = scalar_lea.hbm %s3059_s0, %s1548_s14  ;;  %s1698_s7 = scalar_lea.hbm %s3059_s0, 2048 }
  0x54   : > { %s1693_s24 = scalar_lea.hbm %s1919_s19, 1024  ;;  %p1699_p8 = scmp.lt.s32.totalorder %s1919_s19, %s3059_s0 }
  0x55   : > { %p1694_p1 = scmp.ne.s32.totalorder %s1919_s19, %s1693_s24  ;;  %p1700_p10 = scmp.lt.s32.totalorder %s1698_s7, %s1693_s24 }
  0x57   : > { %p1696_p3 = pnand %p1695_p5, %p1694_p1  ;;  %p1701_p11 = por %p1700_p10, %p1699_p8 }
  0x59   : > { %p1697_p6 = pneg %p1696_p3 }
  0x5b   : > { %p1702_p12 = pnand %p1701_p11, %p1697_p6 }
  0x5d   : > { %1705 = shalt.err (!%p1702_p12)
}
  0x5e   : > { %s1706_s12 = scalar_lea.vmem %s1925_s20, 1024  ;;  %s1773_s13 = smov [#allocation2]  }
  0x5f   : > { %p1707_p9 = scmp.ne.s32.totalorder %s1925_s20, %s1706_s12  ;;  %s1711_s14 = sshll.u32 %s1773_s13, 4  ;;  %s1712_s14 = int_to_ptr.vmem [resolvable:$false] %s1711_s14 }
  0x60   : > { %s1713_s15 = scalar_lea.vmem %s1712_s14, 2048  ;;  %p1714_p2 = scmp.lt.s32.totalorder %s1925_s20, %s1712_s14 }
  0x61   : > { %p1709_p13 = pnand %p1707_p9, %p1695_p5  ;;  %p1715_p4 = scmp.lt.s32.totalorder %s1713_s15, %s1706_s12 }
  0x63   : > { %p1710_p0 = pneg %p1709_p13  ;;  %p1716_p1 = por %p1715_p4, %p1714_p2 }
  0x65   : > { %p1717_p3 = pnand %p1716_p1, %p1710_p0 }
  0x67   : > { %1720 = shalt.err (!%p1717_p3)
}
  0x68   : > { %s1774_s17 = smov 128   ;;  %s1775_s18 = smov 8  }
  0x69   : > { %1583 = dma.hbm_to_vmem [thread:$0]  (!%p1921_p7), %s1919_s19, 1024, %s1925_s20, %s1927_s27, %s1774_s17, %s1774_s17, %s1775_s18  }
  0x6a   : > { %p3061_p5 = scmp.ne.s32.totalorder %s3052_s30, 0 }
  0x6c   : > { %270 = sbr.rel (%p3061_p5) target bundleno = 563 (0x233), region = 40 }
  0x71   : > { %s272_s16 = sand.u32 1, %s1759_s22   ;;  %p3062_p6 = scmp.ne.s32.totalorder %s3050_s26, 0 }
  0x72   : > { %s1457_s24 = sshll.u32 %s272_s16, 6  ;;  %s273_s28 = scalar_lea.sflag [#allocation3], %s272_s16 }
  0x73   : > { %s1951_s29 = scalar_lea.vmem [#allocation2], %s1457_s24 }
  0x74   : > { %1738 = dma.done.wait (%p3062_p6), %s273_s28, 1024  }
  0x75   : > { %1740 = vsyncadd (%p3062_p6), %s273_s28, 4294966272  ;;  %p3063_p8 = scmp.eq.s32.totalorder %s1832_s25, 0 }
  0x77   : > { %1742 = dma.done.wait (%p3063_p8), [#allocation4], 64   ;;  %p3064_p7 = pmov %p3063_p8 }
  0x79   : > { %1744 = vsyncadd (%p3064_p7), [#allocation4], 4294967232  ;;  %p3065_p10 = pmov %p3064_p7 }
  0x7a   : > { %p3066_p11 = pmov %p3064_p7 }
  0x7b   : > { %1746 = dma.done.wait (%p3065_p10), [#allocation7], 144  }
  0x7c   : > { %1748 = vsyncadd (%p3066_p11), [#allocation7], 4294967152  ;;  %p3067_p12 = pmov %p3064_p7 }
  0x7d   : > { %p3068_p9 = pmov %p3064_p7 }
  0x7e   : > { %1750 = dma.done.wait (%p3067_p12), [#allocation10], 16  }
  0x7f   : > { %1752 = vsyncadd (%p3068_p9), [#allocation10], 4294967280 }
  0x80   : > { %297 = sfence }
  0x81   : > { %s1475_s26 = sld [smem:[#allocation5 + $0x81]]  ;;  %v1970_v0 = vld [vmem:[%s1951_s29 + $0x10] sm:$0xff]  ;;  %v1973_v1 = vld [vmem:[%s1951_s29] sm:$0xff]  ;;  %v1976_v2 = vld [vmem:[%s1951_s29 + $0x18] sm:$0xff]  ;;  %s1776_s21 = smov 127   ;;  %vm375_vm0 = vcmask 1046528  }
  0x82   : > { %s1464_s30 = sld [smem:[#allocation5 + $0x1]]  ;;  %v1980_v5 = vld [vmem:[%s1951_s29 + $0x8] sm:$0xff]  ;;  %s1777_s12 = smov 126   ;;  %v2009_v18 = vld [vmem:[%s1951_s29 + $0x20] sm:$0xff]  ;;  %v2031_v25 = vld [vmem:[%s1951_s29 + $0x38] sm:$0xff]  ;;  %vm423_vm1 = vcmask 1045504  }
  0x83   : > { %s1465_s19 = sld [smem:[#allocation5 + $0x2]]  ;;  %v2004_v16 = vld [vmem:[%s1951_s29 + $0x28] sm:$0xff]  ;;  %v2035_v27 = vld [vmem:[%s1951_s29 + $0x30] sm:$0xff]  ;;  %vm1084_vm2 = vcmask 111616   ;;  %vm1082_vm3 = vcmask 113664   ;;  %vm1099_vm4 = vcmask 106496  }
  0x84   : > { %s1476_s20 = sld [smem:[#allocation5 + $0x82]] }
  0x85   : > { %s1487_s27 = sld [smem:[#allocation5 + $0x101]] }
  0x86   : > { %s1989_s7 = sld [smem:[#allocation5 + $0x102]] }
  0x87   : > { %v479_v3 = vstv %s1475_s26  ;;  %s1993_s8 = sld [smem:[#allocation5 + $0x4]] }
  0x88   : > { %v480_v4 = vmul.f32 %v1970_v0, %v479_v3  ;;  %v342_v6 = vstv %s1464_s30  ;;  %v481_v8 = vmul.f32 %v1976_v2, %v479_v3  ;;  %s1995_s11 = sld [smem:[#allocation5 + $0x84]] }
  0x89   : > { %v343_v7 = vmul.f32 %v342_v6, %v1973_v1  ;;  %v344_v9 = vmul.f32 %v342_v6, %v1980_v5  ;;  %v356_v10 = vstv %s1465_s19  ;;  %s1999_s13 = sld [smem:[#allocation5 + $0x181]] }
  0x8a   : > { %484 = vrot.lane.b32.xlu1 %v480_v4, %s1776_s21  ;;  %v358_v11 = vmul.f32 %v356_v10, %v1980_v5  ;;  %v357_v12 = vmul.f32 %v356_v10, %v1973_v1  ;;  %v493_v13 = vstv %s1476_s20  ;;  %s2006_s14 = sld [smem:[#allocation5 + $0x182]] }
  0x8b   : > { %347 = vrot.lane.b32.xlu0 %v343_v7, %s1776_s21  ;;  %v495_v14 = vmul.f32 %v1976_v2, %v493_v13  ;;  %v494_v15 = vmul.f32 %v1970_v0, %v493_v13  ;;  %v614_v17 = vstv %s1487_s27  ;;  %s2011_s15 = sld [smem:[#allocation5 + $0x8]] }
  0x8c   : > { %s2013_s17 = sld [smem:[#allocation5 + $0x88]]  ;;  %v616_v19 = vmul.f32 %v2004_v16, %v614_v17  ;;  %v615_v20 = vmul.f32 %v2009_v18, %v614_v17  ;;  %v628_v21 = vstv %s1989_s7 }
  0x8d   : > { %s2017_s18 = sld [smem:[#allocation5 + $0x5]]  ;;  %v384_v22 = vstv %s1993_s8  ;;  %v630_v24 = vmul.f32 %v2004_v16, %v628_v21  ;;  %v629_v29 = vmul.f32 %v2009_v18, %v628_v21 }
  0x8e   : > { %486 = vrot.lane.b32.xlu1 %v481_v8, %s1776_s21  ;;  %s2023_s16 = sld [smem:[#allocation5 + $0x85]]  ;;  %v520_v23 = vstv %s1995_s11  ;;  %v386_v28 = vmul.f32 %v384_v22, %v1980_v5  ;;  %v385_v30 = vmul.f32 %v384_v22, %v1973_v1 }
  0x8f   : > { %349 = vrot.lane.b32.xlu0 %v344_v9, %s1776_s21  ;;  %s2025_s24 = sld [smem:[#allocation5 + $0x108]]  ;;  %v749_v26 = vstv %s1999_s13  ;;  %v2044_v31 = vmul.f32 %v1976_v2, %v520_v23  ;;  %v521_v37 = vmul.f32 %v1970_v0, %v520_v23 }
  0x90   : > { %s2040_s28 = sld [smem:[#allocation5 + $0x188]]  ;;  %v751_v32 = vmul.f32 %v2031_v25, %v749_v26  ;;  %v750_v33 = vmul.f32 %v2035_v27, %v749_v26  ;;  %v390_v36 = vrot.slane %v386_v28, 1  ;;  %v763_v38 = vstv %s2006_s14 }
  0x91   : > { %s2046_s26 = sld [smem:[#allocation5 + $0x104]]  ;;  %v449_v34 = vstv %s2011_s15  ;;  %v389_v44 = vrot.slane %v385_v30, 1  ;;  %v526_v45 = vrot.slane %v2044_v31, 1  ;;  %v525_v56 = vrot.slane %v521_v37, 1 }
  0x92   : > { %363 = vrot.lane.b32.xlu1 %v358_v11, %s1777_s12  ;;  %v584_v35 = vstv %s2013_s17  ;;  %s2057_s29 = sld [smem:[#allocation5 + $0x105]]  ;;  %v2060_v40 = vmul.f32 %v449_v34, %v1980_v5  ;;  %v450_v41 = vmul.f32 %v449_v34, %v1973_v1  ;;  %v765_v17 = vmul.f32 %v2031_v25, %v763_v38 }
  0x93   : > { %361 = vrot.lane.b32.xlu0 %v357_v12, %s1777_s12  ;;  %v401_v39 = vstv %s2017_s18  ;;  %v585_v42 = vmul.f32 %v1970_v0, %v584_v35  ;;  %v2065_v43 = vmul.f32 %v1976_v2, %v584_v35  ;;  %s2072_s30 = sld [smem:[#allocation5 + $0x3]]  ;;  %v391_v60 = vsel %vm375_vm0, %v389_v44, %v390_v36 }
  0x94   : > { %v537_v46 = vstv %s2023_s16  ;;  %v455_v48 = vrot.slane %v2060_v40, 2  ;;  %v454_v49 = vrot.slane %v450_v41, 2  ;;  %v2076_v52 = vmul.f32 %v401_v39, %v1980_v5  ;;  %s2083_s19 = sld [smem:[#allocation5 + $0x83]] }
  0x95   : > { %v719_v47 = vstv %s2025_s24  ;;  %v590_v50 = vrot.slane %v2065_v43, 2  ;;  %v589_v51 = vrot.slane %v585_v42, 2  ;;  %v402_v53 = vmul.f32 %v401_v39, %v1973_v1  ;;  %s2097_s20 = sld [smem:[#allocation5 + $0x103]] }
  0x96   : > { %500 = vrot.lane.b32.xlu1 %v495_v14, %s1777_s12  ;;  %v720_v54 = vmul.f32 %v2009_v18, %v719_v47  ;;  %v2081_v55 = vmul.f32 %v2004_v16, %v719_v47  ;;  %v2089_v57 = vsel %vm423_vm1, %v454_v49, %v455_v48  ;;  %v854_v59 = vstv %s2040_s28  ;;  %s2102_s27 = sld [smem:[#allocation5 + $0x183]] }
  0x97   : > { %498 = vrot.lane.b32.xlu0 %v494_v15, %s1777_s12  ;;  %v2094_v58 = vsel %vm423_vm1, %v589_v51, %v590_v50  ;;  %v655_v61 = vstv %s2046_s26  ;;  %v2105_v3 = vmul.f32 %v1970_v0, %v537_v46  ;;  %v2108_v4 = vmul.f32 %v1976_v2, %v537_v46  ;;  %s2114_s7 = sld [smem:[#allocation5 + $0x6]] }
  0x98   : > { %v725_v62 = vrot.slane %v2081_v55, 2  ;;  %v724_v63 = vrot.slane %v720_v54, 2  ;;  %v855_v6 = vmul.f32 %v2035_v27, %v854_v59  ;;  %v2112_v7 = vmul.f32 %v2031_v25, %v854_v59  ;;  %s2139_s8 = sld [smem:[#allocation5 + $0x86]] }
  0x99   : > { %v407_v8 = vrot.slane %v2076_v52, 1  ;;  %v406_v9 = vrot.slane %v402_v53, 1  ;;  %v2125_v11 = vmul.f32 %v2009_v18, %v655_v61  ;;  %v672_v12 = vstv %s2057_s29  ;;  %s2157_s11 = sld [smem:[#allocation5 + $0x106]] }
  0x9a   : > { %621 = vrot.lane.b32.xlu1 %v616_v19, %s1776_s21  ;;  %v2121_v10 = vsel %vm423_vm1, %v724_v63, %v725_v62  ;;  %v860_v13 = vrot.slane %v2112_v7, 2  ;;  %v859_v14 = vrot.slane %v855_v6, 2  ;;  %v527_v15 = vsel %vm375_vm0, %v525_v56, %v526_v45  ;;  %s2167_s13 = sld [smem:[#allocation5 + $0x184]] }
  0x9b   : > { %619 = vrot.lane.b32.xlu0 %v615_v20, %s1776_s21  ;;  %v764_v19 = vmul.f32 %v2035_v27, %v763_v38  ;;  %v543_v20 = vrot.slane %v2108_v4, 1  ;;  %v542_v21 = vrot.slane %v2105_v3, 1  ;;  %v408_v23 = vsel %vm375_vm0, %v406_v9, %v407_v8  ;;  %s2179_s14 = sld [smem:[#allocation5 + $0x7]] }
  0x9c   : > { %v2137_v22 = vsel %vm423_vm1, %v859_v14, %v860_v13  ;;  %v2147_v26 = vmul.f32 %v2009_v18, %v672_v12  ;;  %v2150_v28 = vmul.f32 %v2004_v16, %v672_v12  ;;  %v370_v30 = vstv %s2072_s30  ;;  %s2230_s15 = sld [smem:[#allocation5 + $0x87]] }
  0x9d   : > { %v507_v31 = vstv %s2083_s19  ;;  %v371_v34 = vmul.f32 %v370_v30, %v1973_v1  ;;  %v777_v39 = vstv %s2102_s27  ;;  %v418_v41 = vstv %s2114_s7  ;;  %s2244_s17 = sld [smem:[#allocation5 + $0x185]] }
  0x9e   : > { %635 = vrot.lane.b32.xlu1 %v630_v24, %s1777_s12  ;;  %v2144_v24 = vmul.f32 %v2004_v16, %v655_v61  ;;  %v508_v35 = vmul.f32 %v1970_v0, %v507_v31  ;;  %v778_v51 = vmul.f32 %v2035_v27, %v777_v39  ;;  %v2184_v52 = vmul.f32 %v2031_v25, %v777_v39  ;;  %s1504_s18 = sld [smem:[#allocation5 + $0x186]] }
  0x9f   : > { %633 = vrot.lane.b32.xlu0 %v629_v29, %s1777_s12  ;;  %v660_v29 = vrot.slane %v2125_v11, 1  ;;  %v376_v44 = vrot.slane %v371_v34, 1  ;;  %v2197_v56 = vmul.f32 %v418_v41, %v1980_v5  ;;  %v419_v59 = vmul.f32 %v418_v41, %v1973_v1  ;;  %s1493_s16 = sld [smem:[#allocation5 + $0x107]] }
  0xa0   : > { %v782_v61 = vrot.slane %v778_v51, 1  ;;  %v783_v63 = vrot.slane %v2184_v52, 1  ;;  %v554_v3 = vstv %s2139_s8  ;;  %v544_v12 = vsel %vm375_vm0, %v542_v21, %v543_v20  ;;  %s1505_s24 = sld [smem:[#allocation5 + $0x187]] }
  0xa1   : > { %v425_v4 = vrot.slane %v2197_v56, 2  ;;  %v424_v6 = vrot.slane %v419_v59, 2  ;;  %v555_v9 = vmul.f32 %v1970_v0, %v554_v3  ;;  %v2211_v11 = vmul.f32 %v1976_v2, %v554_v3  ;;  %s1474_s28 = sld [smem:[#allocation5 + $0x80]] }
  0xa2   : > { %756 = vrot.lane.b32.xlu1 %v751_v32, %s1776_s21  ;;  %v642_v32 = vstv %s2097_s20  ;;  %v661_v14 = vrot.slane %v2144_v24, 1  ;;  %v790_v21 = vstv %s2167_s13  ;;  %v678_v34 = vrot.slane %v2150_v28, 1  ;;  %s335_s26 = sld [smem:[#allocation5]] }
  0xa3   : > { %754 = vrot.lane.b32.xlu0 %v750_v33, %s1776_s21  ;;  %v2160_v33 = vmul.f32 %v370_v30, %v1980_v5  ;;  %v643_v37 = vmul.f32 %v2009_v18, %v642_v32  ;;  %v2171_v38 = vmul.f32 %v2004_v16, %v642_v32  ;;  %v560_v30 = vrot.slane %v2211_v11, 2  ;;  %s2346_s29 = sld [smem:[#allocation6]] }
  0xa4   : > { %v662_v39 = vsel %vm375_vm0, %v660_v29, %v661_v14  ;;  %v791_v41 = vmul.f32 %v2035_v27, %v790_v21  ;;  %v567_v59 = vstv %s2230_s15  ;;  %s2348_s30 = sld [smem:[#allocation8 + $0x80]] }
  0xa5   : > { %v377_v42 = vrot.slane %v2160_v33, 1  ;;  %v647_v47 = vrot.slane %v643_v37, 1  ;;  %v648_v49 = vrot.slane %v2171_v38, 1  ;;  %s2350_s19 = sld [smem:[#allocation8]] }
  0xa6   : > { %394 = vrot.lane.b32.xlu1 %v390_v36, %s1776_s21  ;;  %v2165_v36 = vmul.f32 %v1976_v2, %v507_v31  ;;  %s2352_s20 = sld [smem:[#allocation6 + $0x1]] }
  0xa7   : > { %392 = vrot.lane.b32.xlu0 %v391_v60, %s1776_s21  ;;  %v2189_v53 = vsel %vm375_vm0, %v376_v44, %v377_v42  ;;  %v2203_v60 = vsel %vm375_vm0, %v647_v47, %v648_v49  ;;  %v792_v44 = vmul.f32 %v2031_v25, %v790_v21  ;;  %v795_v47 = vrot.slane %v791_v41, 1  ;;  %s2354_s27 = sld [smem:[#allocation8 + $0x200]] }
  0xa8   : > { %v513_v46 = vrot.slane %v2165_v36, 1  ;;  %v336_v55 = vstv %s335_s26  ;;  %s2357_s7 = sld [smem:[#allocation8 + $0x81]] }
  0xa9   : > { %v338_v7 = vmul.f32 %v336_v55, %v1980_v5  ;;  %s2359_s8 = sld [smem:[#allocation8 + $0x1]] }
  0xaa   : > { %530 = vrot.lane.b32.xlu1 %v526_v45, %s1776_s21  ;;  %v512_v45 = vrot.slane %v508_v35, 1  ;;  %v432_v35 = vstv %s2179_s14  ;;  %s2366_s13 = sld [smem:[#allocation8 + $0x100]] }
  0xab   : > { %528 = vrot.lane.b32.xlu0 %v527_v15, %s1776_s21  ;;  %v2219_v15 = vsel %vm375_vm0, %v782_v61, %v783_v63  ;;  %v433_v51 = vmul.f32 %v432_v35, %v1973_v1  ;;  %v824_v61 = vstv %s1504_s18  ;;  %3069 = sst [smem:[#allocation20_spill]] %s2350_s19 }
  0xac   : > { %v2194_v54 = vsel %vm375_vm0, %v512_v45, %v513_v46  ;;  %v434_v45 = vmul.f32 %v432_v35, %v1980_v5  ;;  %3070 = sst [smem:[#allocation21_spill]] %s2352_s20 }
  0xad   : > { %s2368_s14 = sld [smem:[#allocation8 + $0x101]] }
  0xae   : > { %770 = vrot.lane.b32.xlu1 %v765_v17, %s1777_s12  ;;  %v2225_v17 = vsel %vm423_vm1, %v424_v6, %v425_v4  ;;  %v438_v3 = vrot.slane %v434_v45, 2  ;;  %v807_v6 = vstv %s2244_s17  ;;  %3071 = sst [smem:[#allocation22_spill]] %s2357_s7 }
  0xaf   : > { %768 = vrot.lane.b32.xlu0 %v764_v19, %s1777_s12  ;;  %v559_v19 = vrot.slane %v555_v9, 2  ;;  %v825_v9 = vmul.f32 %v2035_v27, %v824_v61  ;;  %3072 = sst [smem:[#allocation23_spill]] %s2359_s8 }
  0xb0   : > { %3074 = sst [smem:[#allocation25_spill]] %s2366_s13 }
  0xb1   : > { %v2239_v31 = vsel %vm423_vm1, %v559_v19, %v560_v30  ;;  %v568_v19 = vmul.f32 %v1970_v0, %v567_v59  ;;  %v829_v21 = vrot.slane %v825_v9, 2  ;;  %v837_v9 = vstv %s1505_s24  ;;  %s2370_s15 = sld [smem:[#allocation8 + $0x300]] }
  0xb2   : > { %411 = vrot.lane.b32.xlu1 %v407_v8, %s1777_s12  ;;  %v689_v8 = vstv %s2157_s11  ;;  %v839_v40 = vmul.f32 %v2031_v25, %v837_v9  ;;  %s2361_s11 = sld [smem:[#allocation8 + $0x201]] }
  0xb3   : > { %409 = vrot.lane.b32.xlu0 %v408_v23, %s1777_s12  ;;  %v690_v23 = vmul.f32 %v2009_v18, %v689_v8  ;;  %v2233_v24 = vmul.f32 %v2004_v16, %v689_v8  ;;  %v437_v8 = vrot.slane %v433_v51, 2  ;;  %v572_v41 = vrot.slane %v568_v19, 2  ;;  %3075 = sst [smem:[#allocation26_spill]] %s2368_s14 }
  0xb4   : > { %v702_v51 = vstv %s1493_s16  ;;  %s2372_s17 = sld [smem:[#allocation6 + $0x2]] }
  0xb5   : > { %v694_v32 = vrot.slane %v690_v23, 2  ;;  %v695_v37 = vrot.slane %v2233_v24, 2  ;;  %v569_v23 = vmul.f32 %v1976_v2, %v567_v59  ;;  %v703_v59 = vmul.f32 %v2009_v18, %v702_v51  ;;  %s2376_s18 = sld [smem:[#allocation8 + $0x301]] }
  0xb6   : > { %547 = vrot.lane.b32.xlu1 %v543_v20, %s1777_s12  ;;  %v677_v20 = vrot.slane %v2147_v26, 1  ;;  %v796_v26 = vrot.slane %v792_v44, 1  ;;  %v809_v44 = vmul.f32 %v2031_v25, %v807_v6  ;;  %s2378_s16 = sld [smem:[#allocation8 + $0x82]] }
  0xb7   : > { %545 = vrot.lane.b32.xlu0 %v544_v12, %s1777_s12  ;;  %v2254_v28 = vsel %vm423_vm1, %v694_v32, %v695_v37  ;;  %v2267_v12 = vmul.f32 %v2031_v25, %v824_v61  ;;  %v704_v61 = vmul.f32 %v2004_v16, %v702_v51  ;;  %3076 = sst [smem:[#allocation27_spill]] %s2370_s15 }
  0xb8   : > { %v679_v29 = vsel %vm375_vm0, %v677_v20, %v678_v34  ;;  %v573_v20 = vrot.slane %v569_v23, 2  ;;  %3073 = sst [smem:[#allocation24_spill]] %s2361_s11 }
  0xb9   : > { %v830_v32 = vrot.slane %v2267_v12, 2  ;;  %s2380_s24 = sld [smem:[#allocation8 + $0x2]] }
  0xba   : > { %665 = vrot.lane.b32.xlu1 %v661_v14, %s1776_s21  ;;  %v797_v14 = vsel %vm375_vm0, %v795_v47, %v796_v26  ;;  %v574_v45 = vsel %vm423_vm1, %v572_v41, %v573_v20  ;;  %3077 = sst [smem:[#allocation28_spill]] %s2372_s17 }
  0xbb   : > { %663 = vrot.lane.b32.xlu0 %v662_v39, %s1776_s21  ;;  %v2279_v35 = vsel %vm423_vm1, %v829_v21, %v830_v32  ;;  %v439_v39 = vsel %vm423_vm1, %v437_v8, %v438_v3  ;;  %v838_v8 = vmul.f32 %v2035_v27, %v837_v9  ;;  %3078 = sst [smem:[#allocation29_spill]] %s2376_s18 }
  0xbc   : > { %3079 = sst [smem:[#allocation30_spill]] %s2378_s16 }
  0xbd   : > { %s2387_s26 = sld [smem:[#allocation8 + $0x102]] }
  0xbe   : > { %682 = vrot.lane.b32.xlu1 %v678_v34, %s1777_s12  ;;  %v808_v34 = vmul.f32 %v2035_v27, %v807_v6  ;;  %v707_v6 = vrot.slane %v703_v59, 2  ;;  %s2389_s0 = sld [smem:[#allocation8 + $0x302]] }
  0xbf   : > { %680 = vrot.lane.b32.xlu0 %v679_v29, %s1777_s12  ;;  %v813_v29 = vrot.slane %v809_v44, 1  ;;  %3080 = sst [smem:[#allocation31_spill]] %s2380_s24 }
  0xc0   : > { %s2391_s1 = sld [smem:[#allocation8 + $0x180]] }
  0xc1   : > { %s2397_s2 = sld [smem:[#allocation6 + $0x3]] }
  0xc2   : > { %800 = vrot.lane.b32.xlu1 %v796_v26, %s1776_s21  ;;  %v812_v26 = vrot.slane %v808_v34, 1  ;;  %s2402_s3 = sld [smem:[#allocation8 + $0x181]] }
  0xc3   : > { %798 = vrot.lane.b32.xlu0 %v797_v14, %s1776_s21  ;;  %s2404_s4 = sld [smem:[#allocation8 + $0x83]] }
  0xc4   : > { %v814_v47 = vsel %vm375_vm0, %v812_v26, %v813_v29  ;;  %3081 = sst [smem:[#allocation32_spill]] %s2389_s0 }
  0xc5   : > { %s2406_s10 = sld [smem:[#allocation8 + $0x3]] }
  0xc6   : > { %442 = vrot.lane.b32.xlu1 %v438_v3, %s1776_s21  ;;  %v708_v3 = vrot.slane %v704_v61, 2  ;;  %s2412_s23 = sld [smem:[#allocation8 + $0x203]] }
  0xc7   : > { %440 = vrot.lane.b32.xlu0 %v439_v39, %s1776_s21  ;;  %s2419_s22 = sld [smem:[#allocation8 + $0x103]] }
  0xc8   : > { %v709_v14 = vsel %vm423_vm1, %v707_v6, %v708_v3  ;;  %s2421_s9 = sld [smem:[#allocation9 + $0x1]] }
  0xc9   : > { %s2423_s6 = sld [smem:[#allocation9]] }
  0xca   : > { %577 = vrot.lane.b32.xlu1 %v573_v20, %s1776_s21  ;;  %s2425_s5 = sld [smem:[#allocation9 + $0x4]] }
  0xcb   : > { %575 = vrot.lane.b32.xlu0 %v574_v45, %s1776_s21  ;;  %s2429_s25 = sld [smem:[#allocation9 + $0x2]] }
  0xcc   : > { %3082 = sst [smem:[#allocation33_spill]] %s2412_s23 }
  0xcd   : > { %3083 = sst [smem:[#allocation34_spill]] %s2419_s22 }
  0xce   : > { %817 = vrot.lane.b32.xlu1 %v813_v29, %s1777_s12  ;;  %3084 = sst [smem:[#allocation35_spill]] %s2421_s9 }
  0xcf   : > { %815 = vrot.lane.b32.xlu0 %v814_v47, %s1777_s12  ;;  %s2431_s23 = sld [smem:[#allocation8 + $0x303]] }
  0xd0   : > { %3085 = sst [smem:[#allocation36_spill]] %s2425_s5 }
  0xd1   : > { %3086 = sst [smem:[#allocation37_spill]] %s2429_s25 }
  0xd2   : > { %459 = vrot.lane.b32.xlu1 %v455_v48, %s1777_s12  ;;  %v843_v48 = vrot.slane %v839_v40, 2  ;;  %s2433_s22 = sld [smem:[#allocation8 + $0x182]] }
  0xd3   : > { %457 = vrot.lane.b32.xlu0 %v2089_v57, %s1777_s12  ;;  %v842_v57 = vrot.slane %v838_v8, 2  ;;  %s2435_s9 = sld [smem:[#allocation8 + $0x183]] }
  0xd4   : > { %s2442_s25 = sld [smem:[#allocation8 + $0x280]] }
  0xd5   : > { %v844_v43 = vsel %vm423_vm1, %v842_v57, %v843_v48  ;;  %s2444_s5 = sld [smem:[#allocation9 + $0x6]] }
  0xd6   : > { %594 = vrot.lane.b32.xlu1 %v590_v50, %s1777_s12  ;;  %v473_v50 = vstv %s1474_s28  ;;  %s2382_s28 = sld [smem:[#allocation8 + $0x202]] }
  0xd7   : > { %592 = vrot.lane.b32.xlu0 %v2094_v58, %s1777_s12  ;;  %v474_v58 = vmul.f32 %v1970_v0, %v473_v50  ;;  %v475_v21 = vmul.f32 %v1976_v2, %v473_v50 }
  0xd8   : > { %3087 = sst [smem:[#allocation38_spill]] %s2433_s22 }
  0xd9   : > { %3088 = sst [smem:[#allocation39_spill]] %s2435_s9 }
  0xda   : > { %712 = vrot.lane.b32.xlu1 %v708_v3, %s1776_s21  ;;  %s2452_s9 = sld [smem:[#allocation9 + $0x3]]  ;;  %v1005_v52 = vstv %s2442_s25 }
  0xdb   : > { %710 = vrot.lane.b32.xlu0 %v709_v14, %s1776_s21  ;;  %3089 = sst [smem:[#allocation40_spill]] %s2444_s5 }
  0xdc   : > { %s2454_s22 = sld [smem:[#allocation8 + $0x281]] }
  0xde   : > { %729 = vrot.lane.b32.xlu1 %v725_v62, %s1777_s12  ;;  %v337_v62 = vmul.f32 %v336_v55, %v1973_v1 }
  0xdf   : > { %727 = vrot.lane.b32.xlu0 %v2121_v10, %s1777_s12 }
  0xe0   : > { %3090 = sst [smem:[#allocation41_spill]] %s2452_s9 }
  0xe2   : > { %847 = vrot.lane.b32.xlu1 %v843_v48, %s1776_s21 }
  0xe3   : > { %845 = vrot.lane.b32.xlu0 %v844_v43, %s1776_s21  ;;  %s2325_s21 = sld [smem:[#allocation5 + $0x100]] }
  0xe6   : > { %864 = vrot.lane.b32.xlu1 %v860_v13, %s1777_s12 }
  0xe7   : > { %862 = vrot.lane.b32.xlu0 %v2137_v22, %s1777_s12  ;;  %s2341_s12 = sld [smem:[#allocation5 + $0x180]] }
  0xe9   : > { %v608_v47 = vstv %s2325_s21  ;;  %s2459_s21 = sld [smem:[#allocation8 + $0x380]] }
  0xea   : > { %v609_v3 = vmul.f32 %v2009_v18, %v608_v47 }
  0xfc   : > { %v485_v10 = vpop.permute.xlu1 %484 }
  0xfd   : > { %v490_v19 = vadd.f32 %v485_v10, %v474_v58  ;;  %v348_v23 = vpop.permute.xlu0 %347 }
  0xfe   : > { %v353_v34 = vadd.f32 %v348_v23, %v337_v62 }
 0x100   : > { %v487_v13 = vpop.permute.xlu1 %486 }
 0x101   : > { %v491_v39 = vadd.f32 %v487_v13, %v475_v21  ;;  %v350_v20 = vpop.permute.xlu0 %349 }
 0x102   : > { %v354_v22 = vadd.f32 %v350_v20, %v338_v7 }
 0x104   : > { %v364_v41 = vpop.permute.xlu1 %363 }
 0x105   : > { %v368_v0 = vadd.f32 %v364_v41, %v354_v22  ;;  %v362_v44 = vpop.permute.xlu0 %361 }
 0x106   : > { %v367_v1 = vadd.f32 %v362_v44, %v353_v34 }
 0x107   : > { %v382_v45 = vadd.f32 %v377_v42, %v368_v0 }
 0x108   : > { %v501_v29 = vpop.permute.xlu1 %500  ;;  %v381_v2 = vadd.f32 %v2189_v53, %v367_v1 }
 0x109   : > { %v505_v26 = vadd.f32 %v501_v29, %v491_v39  ;;  %v499_v5 = vpop.permute.xlu0 %498 }
 0x10a   : > { %v504_v51 = vadd.f32 %v499_v5, %v490_v19 }
 0x10b   : > { %v518_v59 = vadd.f32 %v513_v46, %v505_v26  ;;  %v610_v26 = vmul.f32 %v2004_v16, %v608_v47  ;;  %v601_v47 = vstv %s2352_s20  ;;  %s3098_s20 = sld [smem:[#allocation38_spill]] }
 0x10c   : > { %v2333_v61 = vpop.permute.xlu1 %621  ;;  %v517_v6 = vadd.f32 %v2194_v54, %v504_v51  ;;  %v743_v54 = vstv %s2341_s12  ;;  %v466_v51 = vstv %s2346_s29  ;;  %s2465_s12 = sld [smem:[#allocation8 + $0x282]] }
 0x10d   : > { %v620_v9 = vpop.permute.xlu0 %619  ;;  %v745_v5 = vmul.f32 %v2031_v25, %v743_v54  ;;  %v879_v25 = vstv %s2359_s8  ;;  %s2477_s8 = sld [smem:[#allocation8 + $0x283]] }
 0x10e   : > { %v625_v33 = vadd.f32 %v620_v9, %v609_v3  ;;  %v875_v3 = vstv %s2350_s19  ;;  %v979_v9 = vstv %s2354_s27  ;;  %s2471_s19 = sld [smem:[#allocation8 + $0x381]] }
 0x110   : > { %v2339_v42 = vpop.permute.xlu1 %635 }
 0x111   : > { %v634_v14 = vpop.permute.xlu0 %633 }
 0x112   : > { %v639_v53 = vadd.f32 %v634_v14, %v625_v33  ;;  %v626_v33 = vadd.f32 %v2333_v61, %v610_v26  ;;  %v963_v26 = vstv %s3098_s20 }
 0x114   : > { %v2343_v8 = vpop.permute.xlu1 %756  ;;  %v652_v36 = vadd.f32 %v2203_v60, %v639_v53  ;;  %v744_v60 = vmul.f32 %v2035_v27, %v743_v54  ;;  %v983_v53 = vstv %s2361_s11  ;;  %3091 = sst [smem:[#allocation42_spill]] %s2471_s19  ;;  %v1031_v54 = vstv %s2370_s15 }
 0x115   : > { %v755_v46 = vpop.permute.xlu0 %754  ;;  %v761_v14 = vadd.f32 %v2343_v8, %v745_v5  ;;  %v640_v61 = vadd.f32 %v2339_v42, %v626_v33  ;;  %s3092_s11 = sld [smem:[#allocation35_spill]]  ;;  %v871_v42 = vstv %s2397_s2 }
 0x116   : > { %v760_v43 = vadd.f32 %v755_v46, %v744_v60  ;;  %v736_v46 = vstv %s2372_s17  ;;  %s3094_s17 = sld [smem:[#allocation34_spill]] }
 0x117   : > { %s2489_s15 = sld [smem:[#allocation8 + $0x382]] }
 0x118   : > { %v395_v18 = vpop.permute.xlu1 %394  ;;  %s3115_s2 = sld [smem:[#allocation17_spill]] }
 0x119   : > { %v393_v40 = vpop.permute.xlu0 %392  ;;  %v399_v27 = vadd.f32 %v395_v18, %v382_v45  ;;  %v931_v18 = vstv %s2368_s14  ;;  %s2483_s14 = sld [smem:[#allocation9 + $0x5]] }
 0x11a   : > { %v398_v62 = vadd.f32 %v393_v40, %v381_v2  ;;  %v1035_v40 = vstv %s2376_s18  ;;  %s3096_s18 = sld [smem:[#allocation36_spill]] }
 0x11c   : > { %v531_v48 = vpop.permute.xlu1 %530 }
 0x11d   : > { %v529_v57 = vpop.permute.xlu0 %528  ;;  %v535_v7 = vadd.f32 %v531_v48, %v518_v59  ;;  %v901_v59 = vstv %s2348_s30  ;;  %v911_v48 = vstv %s2378_s16  ;;  %s3099_s16 = sld [smem:[#allocation39_spill]] }
 0x11e   : > { %v534_v39 = vadd.f32 %v529_v57, %v517_v6  ;;  %v905_v6 = vstv %s2357_s7  ;;  %s3093_s7 = sld [smem:[#allocation33_spill]]  ;;  %v885_v57 = vstv %s2380_s24  ;;  %p325_p13 = scmp.lt.s32.totalorder %s3115_s2, 1 }
 0x11f   : > { %3095 = sst [smem:[#allocation35_spill]] %s2483_s14 }
 0x120   : > { %v2374_v50 = vpop.permute.xlu1 %770  ;;  %s2495_s24 = sld [smem:[#allocation8 + $0x383]]  ;;  %s3141_s2 = smov (!%p325_p13, %s3115_s2), 1 }
 0x121   : > { %v769_v55 = vpop.permute.xlu0 %768  ;;  %v775_v8 = vadd.f32 %v2374_v50, %v761_v14  ;;  %v917_v50 = vstv %s2404_s4  ;;  %v1009_v14 = vstv %s2454_s22  ;;  %s3116_s4 = sld [smem:[#allocation40_spill]]  ;;  %s1462_s22 = sshll.u32 %s3141_s2, 3 }
 0x122   : > { %v774_v58 = vadd.f32 %v769_v55, %v760_v43  ;;  %v989_v55 = vstv %s2382_s28  ;;  %s3124_s27 = sld [smem:[#allocation35_spill]] }
 0x123   : > { %v969_v5 = vstv %s3099_s16  ;;  %s3135_s14 = sld [smem:[#allocation49_spill]] }
 0x124   : > { %v412_v10 = vpop.permute.xlu1 %411  ;;  %v2385_v19 = vadd.f32 %v2219_v15, %v774_v58  ;;  %v937_v58 = vstv %s2387_s26 }
 0x125   : > { %v416_v23 = vadd.f32 %v412_v10, %v399_v27  ;;  %v410_v21 = vpop.permute.xlu0 %409  ;;  %v1041_v27 = vstv %s2389_s0  ;;  %v891_v10 = vstv %s2406_s10  ;;  %s2501_s0 = sld [smem:[#allocation9 + $0x7]] }
 0x126   : > { %v415_v34 = vadd.f32 %v410_v21, %v398_v62  ;;  %v953_v62 = vstv %s2391_s1  ;;  %3100 = sst [smem:[#allocation33_spill]] %s2495_s24  ;;  %v923_v21 = vstv %s3092_s11 }
 0x127   : > { %v2395_v13 = vadd.f32 %v425_v4, %v416_v23  ;;  %v957_v23 = vstv %s2402_s3  ;;  %s3122_s10 = sld [smem:[#allocation48_spill]] }
 0x128   : > { %v548_v20 = vpop.permute.xlu1 %547  ;;  %v2400_v15 = vadd.f32 %v2225_v17, %v415_v34  ;;  %v897_v34 = vstv %s2423_s6  ;;  %s3117_s6 = sld [smem:[#allocation41_spill]] }
 0x129   : > { %v552_v22 = vadd.f32 %v548_v20, %v535_v7  ;;  %v546_v41 = vpop.permute.xlu0 %545  ;;  %v995_v7 = vstv %s3093_s7  ;;  %v653_v20 = vadd.f32 %v648_v49, %v640_v61  ;;  %s3125_s7 = sld [smem:[#allocation33_spill]] }
 0x12a   : > { %v551_v0 = vadd.f32 %v546_v41, %v534_v39  ;;  %v943_v39 = vstv %s3094_s17 }
 0x12b   : > { %v2410_v56 = vadd.f32 %v560_v30, %v552_v22  ;;  %3101 = sst [smem:[#allocation34_spill]] %s2501_s0  ;;  %v788_v22 = vadd.f32 %v783_v63, %v775_v8 }
 0x12c   : > { %v2414_v4 = vpop.permute.xlu1 %665  ;;  %v2417_v17 = vadd.f32 %v2239_v31, %v551_v0 }
 0x12d   : > { %v664_v44 = vpop.permute.xlu0 %663  ;;  %v670_v33 = vadd.f32 %v2414_v4, %v653_v20 }
 0x12e   : > { %v669_v11 = vadd.f32 %v664_v44, %v652_v36  ;;  %v927_v36 = vstv %s2366_s13  ;;  %s3097_s13 = sld [smem:[#allocation37_spill]]  ;;  %v1001_v44 = vstv %s3096_s18 }
 0x130   : > { %v2427_v30 = vpop.permute.xlu1 %682 }
 0x131   : > { %v681_v1 = vpop.permute.xlu0 %680  ;;  %v687_v61 = vadd.f32 %v2427_v30, %v670_v33 }
 0x132   : > { %v686_v31 = vadd.f32 %v681_v1, %v669_v11 }
 0x134   : > { %v2437_v45 = vpop.permute.xlu1 %800  ;;  %v2440_v29 = vadd.f32 %v2254_v28, %v686_v31  ;;  %v949_v1 = vstv %s3097_s13  ;;  %v1047_v31 = vstv %s2431_s23 }
 0x135   : > { %v799_v2 = vpop.permute.xlu0 %798  ;;  %v805_v38 = vadd.f32 %v2437_v45, %v788_v22 }
 0x136   : > { %v804_v41 = vadd.f32 %v799_v2, %v2385_v19  ;;  %v1021_v19 = vstv %s2477_s8  ;;  %s3132_s8 = sld [smem:[#allocation34_spill]] }
 0x138   : > { %v443_v28 = vpop.permute.xlu1 %442 }
 0x139   : > { %v441_v16 = vpop.permute.xlu0 %440  ;;  %v447_v63 = vadd.f32 %v443_v28, %v2395_v13  ;;  %v1015_v28 = vstv %s2465_s12 }
 0x13a   : > { %v446_v4 = vadd.f32 %v441_v16, %v2400_v15 }
 0x13c   : > { %v578_v60 = vpop.permute.xlu1 %577 }
 0x13d   : > { %v576_v43 = vpop.permute.xlu0 %575  ;;  %v582_v15 = vadd.f32 %v578_v60, %v2410_v56  ;;  %v700_v56 = vadd.f32 %v695_v37, %v687_v61 }
 0x140   : > { %v818_v0 = vpop.permute.xlu1 %817 }
 0x141   : > { %v816_v11 = vpop.permute.xlu0 %815  ;;  %v822_v8 = vadd.f32 %v818_v0, %v805_v38  ;;  %v581_v38 = vadd.f32 %v576_v43, %v2417_v17 }
 0x142   : > { %v821_v49 = vadd.f32 %v816_v11, %v804_v41  ;;  %v1057_v41 = vstv %s2459_s21  ;;  %v1061_v11 = vstv %s2471_s19  ;;  %s2825_s19 = scalar_lea.vmem %s3122_s10, %s1462_s22 }
 0x143   : > { %v835_v60 = vadd.f32 %v830_v32, %v822_v8 }
 0x144   : > { %v460_v45 = vpop.permute.xlu1 %459  ;;  %v2523_v20 = vadd.f32 %v2279_v35, %v821_v49 }
 0x145   : > { %v464_v22 = vadd.f32 %v460_v45, %v447_v63  ;;  %v458_v13 = vpop.permute.xlu0 %457 }
 0x146   : > { %v463_v2 = vadd.f32 %v458_v13, %v446_v4 }
 0x147   : > { %v2534_v16 = vadd.f32 %v466_v51, %v464_v22 }
 0x148   : > { %v2541_v49 = vadd.f32 %v466_v51, %v463_v2  ;;  %v595_v63 = vpop.permute.xlu1 %594 }
 0x149   : > { %v599_v4 = vadd.f32 %v595_v63, %v582_v15  ;;  %v593_v45 = vpop.permute.xlu0 %592  ;;  %v903_v17 = vmul.f32 %v901_v59, %v2534_v16  ;;  %v877_v51 = vmul.f32 %v875_v3, %v2534_v16  ;;  %v981_v43 = vmul.f32 %v979_v9, %v2534_v16 }
 0x14a   : > { %v598_v24 = vadd.f32 %v593_v45, %v581_v38  ;;  %v902_v37 = vmul.f32 %v901_v59, %v2541_v49  ;;  %v876_v12 = vmul.f32 %v875_v3, %v2541_v49  ;;  %v980_v32 = vmul.f32 %v979_v9, %v2541_v49 }
 0x14b   : > { %v2567_v2 = vadd.f32 %v601_v47, %v599_v4  ;;  %v928_v61 = vmul.f32 %v927_v36, %v2541_v49  ;;  %v929_v8 = vmul.f32 %v927_v36, %v2534_v16  ;;  %v1032_v59 = vmul.f32 %v1031_v54, %v2541_v49 }
 0x14c   : > { %v2580_v3 = vadd.f32 %v601_v47, %v598_v24  ;;  %v713_v22 = vpop.permute.xlu1 %712  ;;  %v1033_v9 = vmul.f32 %v1031_v54, %v2534_v16  ;;  %v954_v13 = vmul.f32 %v953_v62, %v2541_v49  ;;  %v955_v15 = vmul.f32 %v953_v62, %v2534_v16 }
 0x14d   : > { %v717_v38 = vadd.f32 %v713_v22, %v700_v56  ;;  %v711_v63 = vpop.permute.xlu0 %710  ;;  %v907_v36 = vmul.f32 %v905_v6, %v2567_v2  ;;  %v881_v47 = vmul.f32 %v879_v25, %v2567_v2  ;;  %v985_v4 = vmul.f32 %v983_v53, %v2567_v2 }
 0x14e   : > { %v716_v54 = vadd.f32 %v711_v63, %v2440_v29  ;;  %v906_v45 = vmul.f32 %v905_v6, %v2580_v3  ;;  %v880_v62 = vmul.f32 %v879_v25, %v2580_v3  ;;  %v984_v56 = vmul.f32 %v983_v53, %v2580_v3 }
 0x14f   : > { %v909_v24 = vadd.f32 %v907_v36, %v903_v17  ;;  %v883_v22 = vadd.f32 %v881_v47, %v877_v51  ;;  %v987_v0 = vadd.f32 %v985_v4, %v981_v43  ;;  %v932_v29 = vmul.f32 %v931_v18, %v2580_v3 }
 0x150   : > { %v730_v63 = vpop.permute.xlu1 %729  ;;  %v908_v35 = vadd.f32 %v906_v45, %v902_v37  ;;  %v882_v6 = vadd.f32 %v880_v62, %v876_v12  ;;  %v986_v30 = vadd.f32 %v984_v56, %v980_v32  ;;  %v933_v25 = vmul.f32 %v931_v18, %v2567_v2 }
 0x151   : > { %v734_v33 = vadd.f32 %v730_v63, %v717_v38  ;;  %v728_v53 = vpop.permute.xlu0 %727  ;;  %v934_v17 = vadd.f32 %v932_v29, %v928_v61  ;;  %v1036_v51 = vmul.f32 %v1035_v40, %v2580_v3  ;;  %v1037_v43 = vmul.f32 %v1035_v40, %v2567_v2 }
 0x152   : > { %v733_v36 = vadd.f32 %v728_v53, %v716_v54  ;;  %v935_v37 = vadd.f32 %v933_v25, %v929_v8  ;;  %v958_v12 = vmul.f32 %v957_v23, %v2580_v3  ;;  %v959_v18 = vmul.f32 %v957_v23, %v2567_v2 }
 0x153   : > { %v2630_v32 = vadd.f32 %v736_v46, %v734_v33  ;;  %v1038_v61 = vadd.f32 %v1036_v51, %v1032_v59  ;;  %v1039_v38 = vadd.f32 %v1037_v43, %v1033_v9  ;;  %v2635_v40 = vmul.f32 %v1005_v52, %v2541_v49 }
 0x154   : > { %v2639_v8 = vadd.f32 %v736_v46, %v733_v36  ;;  %v848_v47 = vpop.permute.xlu1 %847  ;;  %v960_v4 = vadd.f32 %v958_v12, %v954_v13  ;;  %v961_v54 = vadd.f32 %v959_v18, %v955_v15  ;;  %v2644_v23 = vmul.f32 %v1005_v52, %v2534_v16 }
 0x155   : > { %v852_v33 = vadd.f32 %v848_v47, %v835_v60  ;;  %v846_v45 = vpop.permute.xlu0 %845  ;;  %v913_v59 = vmul.f32 %v911_v48, %v2630_v32  ;;  %v887_v9 = vmul.f32 %v885_v57, %v2630_v32  ;;  %v991_v46 = vmul.f32 %v989_v55, %v2630_v32 }
 0x156   : > { %v851_v62 = vadd.f32 %v846_v45, %v2523_v20  ;;  %v912_v13 = vmul.f32 %v911_v48, %v2639_v8  ;;  %v886_v52 = vmul.f32 %v885_v57, %v2639_v8  ;;  %v990_v60 = vmul.f32 %v989_v55, %v2639_v8 }
 0x157   : > { %v915_v15 = vadd.f32 %v913_v59, %v909_v24  ;;  %v889_v56 = vadd.f32 %v887_v9, %v883_v22  ;;  %v993_v29 = vadd.f32 %v991_v46, %v987_v0  ;;  %v938_v63 = vmul.f32 %v937_v58, %v2639_v8 }
 0x158   : > { %v865_v20 = vpop.permute.xlu1 %864  ;;  %v914_v25 = vadd.f32 %v912_v13, %v908_v35  ;;  %v888_v48 = vadd.f32 %v886_v52, %v882_v6  ;;  %v992_v57 = vadd.f32 %v990_v60, %v986_v30  ;;  %v939_v55 = vmul.f32 %v937_v58, %v2630_v32 }
 0x159   : > { %v869_v53 = vadd.f32 %v865_v20, %v852_v33  ;;  %v863_v24 = vpop.permute.xlu0 %862  ;;  %v940_v0 = vadd.f32 %v938_v63, %v934_v17  ;;  %v1042_v22 = vmul.f32 %v1041_v27, %v2639_v8  ;;  %v1043_v35 = vmul.f32 %v1041_v27, %v2630_v32 }
 0x15a   : > { %v868_v30 = vadd.f32 %v863_v24, %v851_v62  ;;  %v941_v6 = vadd.f32 %v939_v55, %v935_v37  ;;  %v964_v58 = vmul.f32 %v963_v26, %v2639_v8  ;;  %v965_v17 = vmul.f32 %v963_v26, %v2630_v32 }
 0x15b   : > { %v2685_v51 = vadd.f32 %v871_v42, %v869_v53  ;;  %v1044_v43 = vadd.f32 %v1042_v22, %v1038_v61  ;;  %v1045_v36 = vadd.f32 %v1043_v35, %v1039_v38  ;;  %v2690_v27 = vmul.f32 %v1009_v14, %v2580_v3 }
 0x15c   : > { %v2694_v37 = vadd.f32 %v871_v42, %v868_v30  ;;  %v966_v12 = vadd.f32 %v964_v58, %v960_v4  ;;  %v967_v18 = vadd.f32 %v965_v17, %v961_v54  ;;  %v2699_v47 = vmul.f32 %v1009_v14, %v2567_v2 }
 0x15d   : > { %v919_v26 = vmul.f32 %v917_v50, %v2685_v51  ;;  %v893_v61 = vmul.f32 %v891_v10, %v2685_v51  ;;  %v997_v38 = vmul.f32 %v995_v7, %v2685_v51  ;;  %v945_v42 = vmul.f32 %v943_v39, %v2685_v51 }
 0x15e   : > { %v918_v14 = vmul.f32 %v917_v50, %v2694_v37  ;;  %v892_v4 = vmul.f32 %v891_v10, %v2694_v37  ;;  %v996_v54 = vmul.f32 %v995_v7, %v2694_v37  ;;  %v944_v33 = vmul.f32 %v943_v39, %v2694_v37 }
 0x15f   : > { %v921_v45 = vadd.f32 %v919_v26, %v915_v15  ;;  %v895_v59 = vadd.f32 %v893_v61, %v889_v56  ;;  %v999_v9 = vadd.f32 %v997_v38, %v993_v29  ;;  %v947_v46 = vadd.f32 %v945_v42, %v941_v6 }
 0x160   : > { %v920_v62 = vadd.f32 %v918_v14, %v914_v25  ;;  %v894_v13 = vadd.f32 %v892_v4, %v888_v48  ;;  %v998_v50 = vadd.f32 %v996_v54, %v992_v57  ;;  %v946_v52 = vadd.f32 %v944_v33, %v940_v0 }
 0x161   : > { %v2727_v60 = vadd.f32 %v923_v21, %v921_v45  ;;  %v2731_v10 = vadd.f32 %v897_v34, %v895_v59  ;;  %v2735_v7 = vadd.f32 %v1001_v44, %v999_v9  ;;  %v2739_v39 = vadd.f32 %v949_v1, %v947_v46 }
 0x162   : > { %v2743_v15 = vadd.f32 %v923_v21, %v920_v62  ;;  %v2747_v56 = vadd.f32 %v897_v34, %v894_v13  ;;  %v2751_v29 = vadd.f32 %v1001_v44, %v998_v50  ;;  %v2755_v63 = vadd.f32 %v949_v1, %v946_v52 }
 0x163   : > { %v1114_v20 = vsel %vm1084_vm2, %v2727_v60, 0.0  ;;  %v1085_v21 = vsel %vm1084_vm2, %v2731_v10, 0.0  ;;  %v1198_v34 = vsel %vm1084_vm2, %v2735_v7, 0.0  ;;  %v1142_v25 = vsel %vm1084_vm2, %v2739_v39, 0.0 }
 0x164   : > { %v1113_v44 = vsel %vm1082_vm3, %v2743_v15, 0.0  ;;  %v1083_v1 = vsel %vm1082_vm3, %v2747_v56, 0.0  ;;  %v1197_v48 = vsel %vm1082_vm3, %v2751_v29, 0.0  ;;  %v1141_v57 = vsel %vm1082_vm3, %v2755_v63, 0.0 }
 0x165   : > { %v1115_v55 = vadd.f32 %v1114_v20, %v1113_v44  ;;  %v1086_v53 = vadd.f32 %v1085_v21, %v1083_v1  ;;  %v1199_v24 = vadd.f32 %v1198_v34, %v1197_v48  ;;  %v1143_v0 = vadd.f32 %v1142_v25, %v1141_v57 }
 0x166   : > { %v1048_v22 = vmul.f32 %v1047_v31, %v2694_v37  ;;  %v1049_v35 = vmul.f32 %v1047_v31, %v2685_v51  ;;  %v970_v30 = vmul.f32 %v969_v5, %v2694_v37  ;;  %v971_v6 = vmul.f32 %v969_v5, %v2685_v51 }
 0x167   : > { %v1116_v58 = vrot.slane %v1115_v55, 4  ;;  %v1087_v17 = vrot.slane %v1086_v53, 4  ;;  %v1200_v26 = vrot.slane %v1199_v24, 4  ;;  %v1144_v61 = vrot.slane %v1143_v0, 4 }
 0x168   : > { %v1050_v38 = vadd.f32 %v1048_v22, %v1044_v43  ;;  %v1051_v42 = vadd.f32 %v1049_v35, %v1045_v36  ;;  %v972_v14 = vadd.f32 %v970_v30, %v966_v12  ;;  %v973_v4 = vadd.f32 %v971_v6, %v967_v18 }
 0x169   : > { %v1117_v31 = vadd.f32 %v1116_v58, %v1115_v55  ;;  %v1088_v54 = vadd.f32 %v1087_v17, %v1086_v53  ;;  %v1201_v33 = vadd.f32 %v1200_v26, %v1199_v24  ;;  %v1145_v5 = vadd.f32 %v1144_v61, %v1143_v0 }
 0x16a   : > { %v3118_v45 = vstv %s3116_s4  ;;  %v3120_v62 = vstv %s3117_s6  ;;  %v1012_v24 = vadd.f32 %v2690_v27, %v2635_v40  ;;  %v1013_v0 = vadd.f32 %v2699_v47, %v2644_v23 }
 0x16b   : > { %v2793_v59 = vadd.f32 %v3118_v45, %v1050_v38  ;;  %v3119_v9 = vmov %v3118_v45  ;;  %v2801_v13 = vadd.f32 %v3120_v62, %v972_v14  ;;  %v3121_v43 = vmov %v3120_v62 }
 0x16c   : > { %v2797_v46 = vadd.f32 %v3119_v9, %v1051_v42  ;;  %v2805_v36 = vadd.f32 %v3121_v43, %v973_v4  ;;  %v1118_v12 = vrot.slane %v1117_v31, 2  ;;  %v1089_v18 = vrot.slane %v1088_v54, 2 }
 0x16d   : > { %v1202_v50 = vrot.slane %v1201_v33, 2  ;;  %v1146_v52 = vrot.slane %v1145_v5, 2  ;;  %v1253_v20 = vsel %vm1082_vm3, %v2793_v59, 0.0  ;;  %v1169_v34 = vsel %vm1082_vm3, %v2801_v13, 0.0 }
 0x16e   : > { %v1254_v21 = vsel %vm1084_vm2, %v2797_v46, 0.0  ;;  %v1170_v25 = vsel %vm1084_vm2, %v2805_v36, 0.0  ;;  %v1119_v44 = vadd.f32 %v1118_v12, %v1117_v31  ;;  %v1090_v1 = vadd.f32 %v1089_v18, %v1088_v54 }
 0x16f   : > { %v1203_v48 = vadd.f32 %v1202_v50, %v1201_v33  ;;  %v1147_v57 = vadd.f32 %v1146_v52, %v1145_v5  ;;  %v1255_v55 = vadd.f32 %v1254_v21, %v1253_v20  ;;  %v1171_v53 = vadd.f32 %v1170_v25, %v1169_v34 }
 0x170   : > { %v1120_v22 = vrot.slane %v1119_v44, 1  ;;  %v1091_v35 = vrot.slane %v1090_v1, 1  ;;  %v1016_v40 = vmul.f32 %v1015_v28, %v2639_v8  ;;  %v1017_v23 = vmul.f32 %v1015_v28, %v2630_v32 }
 0x171   : > { %v1204_v30 = vrot.slane %v1203_v48, 1  ;;  %v1148_v6 = vrot.slane %v1147_v57, 1  ;;  %v1256_v58 = vrot.slane %v1255_v55, 4  ;;  %v1172_v17 = vrot.slane %v1171_v53, 4 }
 0x172   : > { %v1121_v27 = vadd.f32 %v1120_v22, %v1119_v44  ;;  %v1092_v47 = vadd.f32 %v1091_v35, %v1090_v1  ;;  %v1018_v14 = vadd.f32 %v1016_v40, %v1012_v24  ;;  %v1019_v4 = vadd.f32 %v1017_v23, %v1013_v0 }
 0x173   : > { %v1205_v26 = vadd.f32 %v1204_v30, %v1203_v48  ;;  %v1149_v61 = vadd.f32 %v1148_v6, %v1147_v57  ;;  %v1257_v38 = vadd.f32 %v1256_v58, %v1255_v55  ;;  %v1173_v42 = vadd.f32 %v1172_v17, %v1171_v53 }
 0x174   : > { %v1122_v31 = vsel %vm1082_vm3, %v1121_v27, 0.0  ;;  %1128 = vst.msk [vmem:[%s2825_s19 + $0x1] sm:$0x1] %vm1099_vm4, %v1121_v27  ;;  %v1093_v28 = vsel %vm1082_vm3, %v1092_v47, 0.0  ;;  %1100 = vst.msk [vmem:[%s2825_s19] sm:$0x1] %vm1099_vm4, %v1092_v47  ;;  %v1022_v9 = vmul.f32 %v1021_v19, %v2694_v37  ;;  %v1023_v62 = vmul.f32 %v1021_v19, %v2685_v51 }
 0x175   : > { %v1206_v54 = vsel %vm1082_vm3, %v1205_v26, 0.0  ;;  %1212 = vst.msk [vmem:[%s2825_s19 + $0x4] sm:$0x1] %vm1099_vm4, %v1205_v26  ;;  %v1150_v33 = vsel %vm1082_vm3, %v1149_v61, 0.0  ;;  %1156 = vst.msk [vmem:[%s2825_s19 + $0x2] sm:$0x1] %vm1099_vm4, %v1149_v61  ;;  %1123 = vadd.xlane.f32.xlu1 %v1122_v31  ;;  %1094 = vadd.xlane.f32.xlu0 %v1093_v28  ;;  %v1058_v43 = vmul.f32 %v1057_v41, %v2541_v49  ;;  %v3126_v49 = vstv %s2489_s15  ;;  %s2938_s15 = scalar_lea.vmem %s3135_s14, %s1462_s22 }
 0x176   : > { %v1258_v5 = vrot.slane %v1257_v38, 2  ;;  %v1174_v45 = vrot.slane %v1173_v42, 2  ;;  %v1059_v12 = vmul.f32 %v1057_v41, %v2534_v16  ;;  %v1062_v18 = vmul.f32 %v1061_v11, %v2580_v3 }
 0x177   : > { %v1063_v50 = vmul.f32 %v1061_v11, %v2567_v2  ;;  %v1024_v21 = vadd.f32 %v1022_v9, %v1018_v14  ;;  %v1025_v19 = vadd.f32 %v1023_v62, %v1019_v4  ;;  %v1068_v44 = vmul.f32 %v3126_v49, %v2639_v8 }
 0x178   : > { %v1259_v52 = vadd.f32 %v1258_v5, %v1257_v38  ;;  %v1175_v20 = vadd.f32 %v1174_v45, %v1173_v42  ;;  %v1064_v34 = vadd.f32 %v1062_v18, %v1058_v43  ;;  %v3127_v41 = vmov %v3126_v49 }
 0x179   : > { %v1065_v25 = vadd.f32 %v1063_v50, %v1059_v12  ;;  %v1069_v16 = vmul.f32 %v3127_v41, %v2630_v32  ;;  %1207 = vadd.xlane.f32.xlu1 %v1206_v54  ;;  %1151 = vadd.xlane.f32.xlu0 %v1150_v33  ;;  %v3128_v11 = vstv %s3124_s27  ;;  %v3130_v24 = vstv %s3125_s7 }
 0x17a   : > { %v1260_v3 = vrot.slane %v1259_v52, 1  ;;  %v1176_v1 = vrot.slane %v1175_v20, 1  ;;  %v2871_v2 = vadd.f32 %v3128_v11, %v1024_v21  ;;  %v3129_v48 = vmov %v3128_v11 }
 0x17b   : > { %v2875_v57 = vadd.f32 %v3129_v48, %v1025_v19  ;;  %v1070_v55 = vadd.f32 %v1068_v44, %v1064_v34  ;;  %v1071_v53 = vadd.f32 %v1069_v16, %v1065_v25  ;;  %v1074_v8 = vmul.f32 %v3130_v24, %v2694_v37 }
 0x17c   : > { %v3131_v0 = vmov %v3130_v24  ;;  %v1261_v22 = vadd.f32 %v1260_v3, %v1259_v52  ;;  %v1177_v35 = vadd.f32 %v1176_v1, %v1175_v20  ;;  %v1225_v30 = vsel %vm1082_vm3, %v2871_v2, 0.0 }
 0x17d   : > { %v1075_v32 = vmul.f32 %v3131_v0, %v2685_v51  ;;  %v1226_v6 = vsel %vm1084_vm2, %v2875_v57, 0.0  ;;  %v1076_v17 = vadd.f32 %v1074_v8, %v1070_v55  ;;  %v3133_v27 = vstv %s3132_s8 }
 0x17e   : > { %v1227_v58 = vadd.f32 %v1226_v6, %v1225_v30  ;;  %v1262_v23 = vsel %vm1082_vm3, %v1261_v22, 0.0  ;;  %1268 = vst.msk [vmem:[%s2825_s19 + $0x6] sm:$0x1] %vm1099_vm4, %v1261_v22  ;;  %v1178_v37 = vsel %vm1082_vm3, %v1177_v35, 0.0  ;;  %1184 = vst.msk [vmem:[%s2825_s19 + $0x3] sm:$0x1] %vm1099_vm4, %v1177_v35  ;;  %v3134_v26 = vmov %v3133_v27 }
 0x17f   : > { %v1077_v40 = vadd.f32 %v1075_v32, %v1071_v53  ;;  %1263 = vadd.xlane.f32.xlu1 %v1262_v23  ;;  %1179 = vadd.xlane.f32.xlu0 %v1178_v37  ;;  %v2895_v47 = vadd.f32 %v3133_v27, %v1076_v17 }
 0x180   : > { %v1228_v51 = vrot.slane %v1227_v58, 4 }
 0x181   : > { %v2899_v61 = vadd.f32 %v3134_v26, %v1077_v40  ;;  %v1281_v42 = vsel %vm1082_vm3, %v2895_v47, 0.0 }
 0x182   : > { %v1229_v38 = vadd.f32 %v1228_v51, %v1227_v58 }
 0x183   : > { %v1282_v14 = vsel %vm1084_vm2, %v2899_v61, 0.0 }
 0x184   : > { %v1283_v4 = vadd.f32 %v1282_v14, %v1281_v42  ;;  %v1230_v31 = vrot.slane %v1229_v38, 2 }
 0x186   : > { %v1284_v28 = vrot.slane %v1283_v4, 4  ;;  %v1231_v54 = vadd.f32 %v1230_v31, %v1229_v38 }
 0x188   : > { %v1285_v33 = vadd.f32 %v1284_v28, %v1283_v4  ;;  %v1232_v5 = vrot.slane %v1231_v54, 1 }
 0x18a   : > { %v1286_v45 = vrot.slane %v1285_v33, 2  ;;  %v1233_v9 = vadd.f32 %v1232_v5, %v1231_v54 }
 0x18c   : > { %v1287_v62 = vadd.f32 %v1286_v45, %v1285_v33  ;;  %v1234_v43 = vsel %vm1082_vm3, %v1233_v9, 0.0  ;;  %1240 = vst.msk [vmem:[%s2825_s19 + $0x5] sm:$0x1] %vm1099_vm4, %v1233_v9 }
 0x18d   : > { %1235 = vadd.xlane.f32.xlu0 %v1234_v43 }
 0x18e   : > { %v1288_v12 = vrot.slane %v1287_v62, 1 }
 0x190   : > { %v1289_v18 = vadd.f32 %v1288_v12, %v1287_v62 }
 0x192   : > { %v1290_v50 = vsel %vm1082_vm3, %v1289_v18, 0.0  ;;  %1296 = vst.msk [vmem:[%s2825_s19 + $0x7] sm:$0x1] %vm1099_vm4, %v1289_v18 }
 0x193   : > { %1291 = vadd.xlane.f32.xlu0 %v1290_v50 }
 0x1fe   : > { %v1124_v52 = vpop.xlane.xlu1 %1123  ;;  %v1095_v20 = vpop.xlane.xlu0 %1094 }
 0x1ff   : > { %v1125_v21 = vmul.f32 0.0051020407, %v1124_v52  ;;  %v1096_v19 = vmul.f32 0.0051020407, %v1095_v20 }
 0x201   : > { %v1126_v34 = vsub.f32 %v2743_v15, %v1125_v21  ;;  %v1127_v25 = vsub.f32 %v2727_v60, %v1125_v21  ;;  %v1097_v49 = vsub.f32 %v2747_v56, %v1096_v19  ;;  %v1098_v44 = vsub.f32 %v2731_v10, %v1096_v19 }
 0x202   : > { %v1208_v41 = vpop.xlane.xlu1 %1207  ;;  %v1152_v16 = vpop.xlane.xlu0 %1151 }
 0x203   : > { %v1129_v3 = vmul.f32 %v1126_v34, %v1126_v34  ;;  %v1130_v1 = vmul.f32 %v1127_v25, %v1127_v25  ;;  %v1101_v11 = vmul.f32 %v1097_v49, %v1097_v49  ;;  %v1102_v48 = vmul.f32 %v1098_v44, %v1098_v44 }
 0x204   : > { %v1209_v55 = vmul.f32 0.0051020407, %v1208_v41  ;;  %v1153_v53 = vmul.f32 0.0051020407, %v1152_v16 }
 0x205   : > { %v1131_v24 = vsel %vm1082_vm3, %v1129_v3, 0.0  ;;  %v1132_v8 = vsel %vm1084_vm2, %v1130_v1, 0.0  ;;  %v1103_v15 = vsel %vm1082_vm3, %v1101_v11, 0.0  ;;  %v1104_v60 = vsel %vm1084_vm2, %v1102_v48, 0.0 }
 0x206   : > { %v1133_v0 = vadd.f32 %v1132_v8, %v1131_v24  ;;  %v1105_v56 = vadd.f32 %v1104_v60, %v1103_v15  ;;  %v1210_v10 = vsub.f32 %v2751_v29, %v1209_v55  ;;  %v1211_v32 = vsub.f32 %v2735_v7, %v1209_v55 }
 0x207   : > { %v1154_v22 = vsub.f32 %v2755_v63, %v1153_v53  ;;  %v1155_v35 = vsub.f32 %v2739_v39, %v1153_v53 }
 0x208   : > { %v1264_v30 = vpop.xlane.xlu1 %1263  ;;  %v1180_v6 = vpop.xlane.xlu0 %1179  ;;  %v1134_v58 = vrot.slane %v1133_v0, 4  ;;  %v1106_v17 = vrot.slane %v1105_v56, 4  ;;  %v1213_v40 = vmul.f32 %v1210_v10, %v1210_v10  ;;  %v1214_v23 = vmul.f32 %v1211_v32, %v1211_v32 }
 0x209   : > { %v1157_v37 = vmul.f32 %v1154_v22, %v1154_v22  ;;  %v1158_v51 = vmul.f32 %v1155_v35, %v1155_v35  ;;  %v1265_v27 = vmul.f32 0.0051020407, %v1264_v30  ;;  %v1181_v26 = vmul.f32 0.0051020407, %v1180_v6 }
 0x20a   : > { %v1135_v38 = vadd.f32 %v1134_v58, %v1133_v0  ;;  %v1107_v42 = vadd.f32 %v1106_v17, %v1105_v56  ;;  %v1215_v29 = vsel %vm1082_vm3, %v1213_v40, 0.0  ;;  %v1216_v7 = vsel %vm1084_vm2, %v1214_v23, 0.0 }
 0x20b   : > { %v1217_v14 = vadd.f32 %v1216_v7, %v1215_v29  ;;  %v1159_v63 = vsel %vm1082_vm3, %v1157_v37, 0.0  ;;  %v1160_v39 = vsel %vm1084_vm2, %v1158_v51, 0.0  ;;  %v1266_v4 = vsub.f32 %v2793_v59, %v1265_v27 }
 0x20c   : > { %v1136_v31 = vrot.slane %v1135_v38, 2  ;;  %v1108_v28 = vrot.slane %v1107_v42, 2  ;;  %v1161_v54 = vadd.f32 %v1160_v39, %v1159_v63  ;;  %v1267_v33 = vsub.f32 %v2797_v46, %v1265_v27 }
 0x20d   : > { %v1218_v5 = vrot.slane %v1217_v14, 4  ;;  %v1269_v45 = vmul.f32 %v1266_v4, %v1266_v4  ;;  %v1182_v9 = vsub.f32 %v2801_v13, %v1181_v26  ;;  %v1183_v62 = vsub.f32 %v2805_v36, %v1181_v26 }
 0x20e   : > { %v1137_v43 = vadd.f32 %v1136_v31, %v1135_v38  ;;  %v1109_v12 = vadd.f32 %v1108_v28, %v1107_v42  ;;  %v1162_v18 = vrot.slane %v1161_v54, 4  ;;  %v1270_v50 = vmul.f32 %v1267_v33, %v1267_v33 }
 0x20f   : > { %v1219_v52 = vadd.f32 %v1218_v5, %v1217_v14  ;;  %v1271_v20 = vsel %vm1082_vm3, %v1269_v45, 0.0  ;;  %v1185_v59 = vmul.f32 %v1182_v9, %v1182_v9  ;;  %v1186_v21 = vmul.f32 %v1183_v62, %v1183_v62 }
 0x210   : > { %v1138_v19 = vrot.slane %v1137_v43, 1  ;;  %v1110_v34 = vrot.slane %v1109_v12, 1  ;;  %v1163_v25 = vadd.f32 %v1162_v18, %v1161_v54  ;;  %v1272_v46 = vsel %vm1084_vm2, %v1270_v50, 0.0 }
 0x211   : > { %v1220_v13 = vrot.slane %v1219_v52, 2  ;;  %v1273_v36 = vadd.f32 %v1272_v46, %v1271_v20  ;;  %v1187_v49 = vsel %vm1082_vm3, %v1185_v59, 0.0  ;;  %v1188_v44 = vsel %vm1084_vm2, %v1186_v21, 0.0 }
 0x212   : > { %v1139_v41 = vadd.f32 %v1138_v19, %v1137_v43  ;;  %v1111_v16 = vadd.f32 %v1110_v34, %v1109_v12  ;;  %v1164_v3 = vrot.slane %v1163_v25, 2  ;;  %v1189_v1 = vadd.f32 %v1188_v44, %v1187_v49 }
 0x213   : > { %v1221_v11 = vadd.f32 %v1220_v13, %v1219_v52  ;;  %v1274_v48 = vrot.slane %v1273_v36, 4 }
 0x214   : > { %1140 = vst.msk [vmem:[%s2938_s15 + $0x1] sm:$0x1] %vm1099_vm4, %v1139_v41  ;;  %1112 = vst.msk [vmem:[%s2938_s15] sm:$0x1] %vm1099_vm4, %v1111_v16  ;;  %v1165_v55 = vadd.f32 %v1164_v3, %v1163_v25  ;;  %v1190_v53 = vrot.slane %v1189_v1, 4 }
 0x215   : > { %v1222_v8 = vrot.slane %v1221_v11, 1  ;;  %v1275_v15 = vadd.f32 %v1274_v48, %v1273_v36 }
 0x216   : > { %v1236_v24 = vpop.xlane.xlu0 %1235  ;;  %v1166_v0 = vrot.slane %v1165_v55, 1  ;;  %v1191_v56 = vadd.f32 %v1190_v53, %v1189_v1 }
 0x217   : > { %v1237_v60 = vmul.f32 0.0051020407, %v1236_v24  ;;  %v1223_v10 = vadd.f32 %v1222_v8, %v1221_v11  ;;  %v1276_v32 = vrot.slane %v1275_v15, 2 }
 0x218   : > { %v1167_v30 = vadd.f32 %v1166_v0, %v1165_v55  ;;  %v1192_v6 = vrot.slane %v1191_v56, 2 }
 0x219   : > { %v1238_v22 = vsub.f32 %v2871_v2, %v1237_v60  ;;  %v1239_v35 = vsub.f32 %v2875_v57, %v1237_v60  ;;  %1224 = vst.msk [vmem:[%s2938_s15 + $0x4] sm:$0x1] %vm1099_vm4, %v1223_v10  ;;  %v1277_v58 = vadd.f32 %v1276_v32, %v1275_v15 }
 0x21a   : > { %1168 = vst.msk [vmem:[%s2938_s15 + $0x2] sm:$0x1] %vm1099_vm4, %v1167_v30  ;;  %v1193_v37 = vadd.f32 %v1192_v6, %v1191_v56 }
 0x21b   : > { %v1241_v17 = vmul.f32 %v1238_v22, %v1238_v22  ;;  %v1242_v40 = vmul.f32 %v1239_v35, %v1239_v35  ;;  %v1278_v27 = vrot.slane %v1277_v58, 1 }
 0x21c   : > { %v1292_v23 = vpop.xlane.xlu0 %1291  ;;  %v1194_v57 = vrot.slane %v1193_v37, 1 }
 0x21d   : > { %v1293_v51 = vmul.f32 0.0051020407, %v1292_v23  ;;  %v1243_v26 = vsel %vm1082_vm3, %v1241_v17, 0.0  ;;  %v1244_v2 = vsel %vm1084_vm2, %v1242_v40, 0.0  ;;  %v1279_v7 = vadd.f32 %v1278_v27, %v1277_v58 }
 0x21e   : > { %v1245_v38 = vadd.f32 %v1244_v2, %v1243_v26  ;;  %v1195_v14 = vadd.f32 %v1194_v57, %v1193_v37 }
 0x21f   : > { %v1294_v42 = vsub.f32 %v2895_v47, %v1293_v51  ;;  %v1295_v29 = vsub.f32 %v2899_v61, %v1293_v51  ;;  %1280 = vst.msk [vmem:[%s2938_s15 + $0x6] sm:$0x1] %vm1099_vm4, %v1279_v7 }
 0x220   : > { %v1246_v63 = vrot.slane %v1245_v38, 4  ;;  %1196 = vst.msk [vmem:[%s2938_s15 + $0x3] sm:$0x1] %vm1099_vm4, %v1195_v14 }
 0x221   : > { %v1297_v39 = vmul.f32 %v1294_v42, %v1294_v42  ;;  %v1298_v4 = vmul.f32 %v1295_v29, %v1295_v29 }
 0x222   : > { %v1247_v31 = vadd.f32 %v1246_v63, %v1245_v38 }
 0x223   : > { %v1299_v28 = vsel %vm1082_vm3, %v1297_v39, 0.0  ;;  %v1300_v54 = vsel %vm1084_vm2, %v1298_v4, 0.0 }
 0x224   : > { %v1301_v33 = vadd.f32 %v1300_v54, %v1299_v28  ;;  %v1248_v47 = vrot.slane %v1247_v31, 2 }
 0x226   : > { %v1302_v5 = vrot.slane %v1301_v33, 4  ;;  %v1249_v61 = vadd.f32 %v1248_v47, %v1247_v31 }
 0x228   : > { %v1303_v45 = vadd.f32 %v1302_v5, %v1301_v33  ;;  %v1250_v9 = vrot.slane %v1249_v61, 1 }
 0x22a   : > { %v1304_v62 = vrot.slane %v1303_v45, 2  ;;  %v1251_v43 = vadd.f32 %v1250_v9, %v1249_v61 }
 0x22c   : > { %v1305_v12 = vadd.f32 %v1304_v62, %v1303_v45  ;;  %1252 = vst.msk [vmem:[%s2938_s15 + $0x5] sm:$0x1] %vm1099_vm4, %v1251_v43 }
 0x22e   : > { %v1306_v18 = vrot.slane %v1305_v12, 1 }
 0x230   : > { %v1307_v50 = vadd.f32 %v1306_v18, %v1305_v12 }
 0x232   : > { %1308 = vst.msk [vmem:[%s2938_s15 + $0x7] sm:$0x1] %vm1099_vm4, %v1307_v50 }
 0x233 PF: > { %s3136_s24 = sld [smem:[#allocation18_spill]] }
 0x234   : > { %s3137_s21 = sld [smem:[#allocation15_spill]] }
 0x235   : > { %s3138_s22 = sld [smem:[#allocation16_spill]] }
 0x236   : > { %s3139_s23 = sld [smem:[#allocation19_spill]] }
 0x239   : > { %p20_p0 = scmp.ge.s32.totalorder %s3136_s24, 4  }
 0x23b   :  { %22 = sbr.rel (!%p20_p0) target bundleno = 14 (0xe), region = 112 }
 0x240   :  { %1342 = vsyncpa [#allocation3], 1 }
 0x241   :  { %1344 = vsyncpa [#allocation3 + $0x1], 1 }
 0x242   :  { %1345 = vsyncpa [#allocation4], 1 }
 0x243   :  { %1347 = vsyncpa [#allocation4 + $0x1], 1 }
 0x244   :  { %1348 = vsyncpa [#allocation7], 1 }
 0x245   :  { %1349 = vsyncpa [#allocation10], 1 }

</bundles_post_ra>
